<compile_context>
chip_gen: v7x
topology: tpu7x:2x2x1
jax: 0.10.0
libtpu: 0.0.40
codegen_flags: <defaults>
</compile_context>

<pallas_src>
import math

import jax
import jax.numpy as jnp
from jax import lax
from jax.experimental import pallas as pl
from jax.experimental.pallas import tpu as pltpu

B, T = 2, 8                       # batch, sequence length
IN_CH, OUT_CH = 3, 5              # module defaults: in_channels=3, out_channels=5
# (input_size, hidden_size per direction) for the 3 bidirectional LSTM layers
LSTM_DIMS = [(IN_CH, 8), (16, 16), (32, 16)]
MLP_DIMS = [(3 * 32, 32), (32, 16), (16, OUT_CH)]
LANES = 128

# raw per-gate order: 0=i, 1=f, 2=g, 3=o (PyTorch order).
# fused column-block order (each block is H wide):
#   [i_fwd, i_bwd, f_fwd, f_bwd, o_fwd, o_bwd, g_fwd, g_bwd]
_FWD_BLK = {0: 0, 1: 2, 3: 4, 2: 6}
_BWD_BLK = {0: 1, 1: 3, 3: 5, 2: 7}


def _param_layout():
    """Static row layout of the single packed (rows, 128) parameter matrix."""
    layout = {}
    row = 0

    def add(name, rows, cols):
        nonlocal row
        layout[name] = (row, rows, cols)
        row += ((rows + 7) // 8) * 8          # keep every block 8-sublane aligned

    for li, (insz, hid) in enumerate(LSTM_DIMS):
        g = 8 * hid
        add(f"l{li}_wa", insz, g)             # input weight applied to work[t]
        add(f"l{li}_wb", insz, g)             # input weight applied to work[T-1-t]
        add(f"l{li}_whh", 2 * hid, g)         # block-diagonal recurrent weights, both dirs
        add(f"l{li}_b", 1, g)                 # b_ih + b_hh, both dirs, fused gate layout
    for mi, (fin, fout) in enumerate(MLP_DIMS):
        add(f"m{mi}_w", fin, fout)
        add(f"m{mi}_b", 1, fout)
    return layout, row


LAYOUT, PACK_ROWS = _param_layout()


# ----------------------------------------------------------------------------- kernel
def _sigmoid_k(x):
    # sigmoid(x) = 0.5*tanh(x/2) + 0.5 : single EUP tanh, no exp+reciprocal on the chain
    return 0.5 * jnp.tanh(0.5 * x) + 0.5


def classifier_kernel(x_ref, p_ref, out_ref, zsum_ref, work_ref):
    def pread(name):
        r0, r, c = LAYOUT[name]
        return p_ref[r0:r0 + r, 0:c]

    pool_mn = pool_mx = pool_sm = None
    n_layers = len(LSTM_DIMS)

    # ---- encoder: 3 stacked bidirectional LSTMs (gates + directions fused) ----
    for li, (insz, hid) in enumerate(LSTM_DIMS):
        G, H2 = 8 * hid, 2 * hid
        is_last = li == n_layers - 1

        # batched input projection (one matmul per direction) + direction pre-sum,
        # all off the serial critical path
        wa = pread(f"l{li}_wa")
        wb = pread(f"l{li}_wb")
        bias = pread(f"l{li}_b")
        xin = x_ref[...] if li == 0 else work_ref[:, 0:insz]        # (T*B, insz)
        za = jnp.dot(xin, wa, preferred_element_type=jnp.float32)   # (T*B, G)
        zb = jnp.dot(xin, wb, preferred_element_type=jnp.float32)   # (T*B, G)
        for t in range(T):
            zsum_ref[t * B:(t + 1) * B, 0:G] = (
                za[t * B:(t + 1) * B] + zb[(T - 1 - t) * B:(T - t) * B] + bias)

        whh = pread(f"l{li}_whh")                                   # (2H, 8H) block-diag
        # TODO(synk): keep whh MXU-resident across timesteps via
        # pltpu.matmul_push_rhs/matmul_acc_lhs/matmul_pop once the tiny (B=2, 2H<=32)
        # shapes are verified to lower cleanly; jnp.dot is used here for robustness.

        # fused fwd+bwd recurrence: one matmul + grouped tanh-sigmoid/tanh per step
        def step(t, carry, G=G, hid=hid, H2=H2, whh=whh, is_last=is_last):
            if is_last:
                h, c, mn, mx, sm = carry
            else:
                h, c = carry                                  # (B, 2H) = [fwd | bwd]
            row = t * B
            pre = zsum_ref[pl.ds(row, B), 0:G] + jnp.dot(
                h, whh, preferred_element_type=jnp.float32)   # (B, 8H)
            sg = _sigmoid_k(pre[:, 0:6 * hid])                # i|f|o gates, both dirs
            g = jnp.tanh(pre[:, 6 * hid:G])                   # g gate, both dirs
            i = sg[:, 0:H2]
            f = sg[:, H2:2 * H2]
            o = sg[:, 2 * H2:3 * H2]
            c_new = f * c + i * g
            h_new = o * jnp.tanh(c_new)                       # [h_fwd(t) | h_bwd(T-1-t)]
            if is_last:
                # pooling is permutation-invariant over t -> pool fused h_new directly
                return (h_new, c_new, jnp.minimum(mn, h_new),
                        jnp.maximum(mx, h_new), sm + h_new)
            work_ref[pl.ds(row, B), 0:H2] = h_new             # single store per step
            return h_new, c_new

        zeros = jnp.zeros((B, H2), jnp.float32)
        if is_last:
            init = (zeros, zeros,
                    jnp.full((B, H2), jnp.inf, jnp.float32),
                    jnp.full((B, H2), -jnp.inf, jnp.float32),
                    zeros)
            _, _, pool_mn, pool_mx, pool_sm = lax.fori_loop(
                0, T, step, init, unroll=True)
        else:
            lax.fori_loop(0, T, step, (zeros, zeros), unroll=True)

    # ---- classifier MLP (w1 split by pooled chunk; avoids the 96-wide concat) ----
    W = 2 * LSTM_DIMS[-1][1]                                  # 32
    mean = pool_sm * (1.0 / float(T))
    r0, _, c1 = LAYOUT["m0_w"]
    h1 = jnp.tanh(
        jnp.dot(pool_mn, p_ref[r0:r0 + W, 0:c1], preferred_element_type=jnp.float32)
        + jnp.dot(mean, p_ref[r0 + W:r0 + 2 * W, 0:c1],
                  preferred_element_type=jnp.float32)
        + jnp.dot(pool_mx, p_ref[r0 + 2 * W:r0 + 3 * W, 0:c1],
                  preferred_element_type=jnp.float32)
        + pread("m0_b"))
    h2 = jnp.tanh(jnp.dot(h1, pread("m1_w"), preferred_element_type=jnp.float32)
                  + pread("m1_b"))
    out_ref[...] = _sigmoid_k(
        jnp.dot(h2, pread("m2_w"), preferred_element_type=jnp.float32)
        + pread("m2_b"))


def _cost_estimate():
    flops = 0
    trans = 0
    for insz, hid in LSTM_DIMS:
        G = 8 * hid
        flops += 2 * 2 * (T * B) * insz * G       # batched ZA / ZB projections
        flops += T * 2 * B * (2 * hid) * G        # recurrent matmuls
        flops += T * B * G * 8                    # gate elementwise (approx)
        trans += T * B * 10 * hid                 # tanh slabs (gates + g + tanh(c))
    flops += 2 * B * (96 * 32 + 32 * 16 + 16 * OUT_CH)
    trans += B * (32 + 16 + OUT_CH)
    bytes_accessed = 4 * (PACK_ROWS * LANES + T * B * IN_CH + B * OUT_CH)
    return pl.CostEstimate(flops=flops, transcendentals=trans,
                           bytes_accessed=bytes_accessed)


@jax.jit
def classifier_forward(x, packed_params):
    # time-major flat layer-0 input: row t*B + b holds x[b, t, :]
    x_flat = jnp.transpose(x, (1, 0, 2)).reshape(T * B, IN_CH)
    return pl.pallas_call(
        classifier_kernel,
        out_shape=jax.ShapeDtypeStruct((x.shape[0], OUT_CH), jnp.float32),
        in_specs=[pl.BlockSpec(memory_space=pltpu.MemorySpace.VMEM)] * 2,
        out_specs=pl.BlockSpec(memory_space=pltpu.MemorySpace.VMEM),
        scratch_shapes=[
            pltpu.VMEM((T * B, LANES), jnp.float32),   # fused, pre-summed pre-activations
            pltpu.VMEM((T * B, LANES), jnp.float32),   # per-layer fused output sequence
        ],
        cost_estimate=_cost_estimate(),
    )(x_flat, packed_params)


# ------------------------------------------------------------------- params / packing
def init_params(key):
    """Synthetic PyTorch-style parameters, stored per-gate (i,f,g,o):
    wih (4,in,H), whh (4,H,H), b (4,1,H) with b = b_ih + b_hh pre-summed.
    Linear weights as (in,out); biases as (1,out)."""
    params = []
    for (insz, hid) in LSTM_DIMS:
        bound = 1.0 / math.sqrt(hid)
        for _direction in range(2):                        # forward, backward
            key, k1, k2, k3 = jax.random.split(key, 4)
            wih = jax.random.uniform(k1, (4, insz, hid), jnp.float32, -bound, bound)
            whh = jax.random.uniform(k2, (4, hid, hid), jnp.float32, -bound, bound)
            b = jax.random.uniform(k3, (4, 1, hid), jnp.float32, -bound, bound)
            params += [wih, whh, b]
    for (fin, fout) in MLP_DIMS:
        key, k1, k2 = jax.random.split(key, 3)
        bound = 1.0 / math.sqrt(fin)
        w = jax.random.uniform(k1, (fin, fout), jnp.float32, -bound, bound)
        b = jax.random.uniform(k2, (1, fout), jnp.float32, -bound, bound)
        params += [w, b]
    return params


def pack_params(raw_params):
    """Build the single (PACK_ROWS, 128) fused-layout parameter matrix."""
    packed = jnp.zeros((PACK_ROWS, LANES), jnp.float32)

    def put(buf, name, mat):
        r0, r, c = LAYOUT[name]
        return buf.at[r0:r0 + r, 0:c].set(mat)

    idx = 0
    for li, (insz, hid) in enumerate(LSTM_DIMS):
        wih_f, whh_f, b_f, wih_b, whh_b, b_b = raw_params[idx:idx + 6]
        idx += 6
        G = 8 * hid
        wf = jnp.zeros((insz, G), jnp.float32)
        wb = jnp.zeros((insz, G), jnp.float32)
        whh = jnp.zeros((2 * hid, G), jnp.float32)
        bc = jnp.zeros((1, G), jnp.float32)
        for g, blk in _FWD_BLK.items():
            c0 = blk * hid
            wf = wf.at[:, c0:c0 + hid].set(wih_f[g])
            whh = whh.at[:hid, c0:c0 + hid].set(whh_f[g])
            bc = bc.at[:, c0:c0 + hid].set(b_f[g])
        for g, blk in _BWD_BLK.items():
            c0 = blk * hid
            wb = wb.at[:, c0:c0 + hid].set(wih_b[g])
            whh = whh.at[hid:, c0:c0 + hid].set(whh_b[g])
            bc = bc.at[:, c0:c0 + hid].set(b_b[g])
        if li == 0:
            wa_mat, wb_mat = wf, wb
        else:
            # previous layer output arrives "work-packed": work[t] = [fwd(t) | bwd(T-1-t)],
            # so swap the bwd-feature row halves between the two direction weights:
            #   zsum[t] = work[t] @ WA + work[T-1-t] @ WB + bias
            half = insz // 2
            wa_mat = jnp.concatenate([wf[:half], wb[half:]], axis=0)
            wb_mat = jnp.concatenate([wb[:half], wf[half:]], axis=0)
        packed = put(packed, f"l{li}_wa", wa_mat)
        packed = put(packed, f"l{li}_wb", wb_mat)
        packed = put(packed, f"l{li}_whh", whh)
        packed = put(packed, f"l{li}_b", bc)
    for mi in range(len(MLP_DIMS)):
        w, b = raw_params[idx], raw_params[idx + 1]
        idx += 2
        packed = put(packed, f"m{mi}_w", w)
        packed = put(packed, f"m{mi}_b", b)
    return packed


# ----------------------------------------------------------------- pure-JAX reference
def _sigmoid(x):
    return 1.0 / (1.0 + jnp.exp(-x))


def _lstm_cell(x_t, h, c, wih, whh, b):
    def gate(idx):
        return x_t @ wih[idx] + h @ whh[idx] + b[idx]
    i = _sigmoid(gate(0))
    f = _sigmoid(gate(1))
    g = jnp.tanh(gate(2))
    o = _sigmoid(gate(3))
    c_new = f * c + i * g
    h_new = o * jnp.tanh(c_new)
    return h_new, c_new


def _bidir_lstm(seq, wih_f, whh_f, b_f, wih_b, whh_b, b_b, hidden):
    n = len(seq)
    zeros = jnp.zeros((seq[0].shape[0], hidden), jnp.float32)
    h, c = zeros, zeros
    fwd = []
    for t in range(n):
        h, c = _lstm_cell(seq[t], h, c, wih_f, whh_f, b_f)
        fwd.append(h)
    h, c = zeros, zeros
    bwd = [None] * n
    for t in reversed(range(n)):
        h, c = _lstm_cell(seq[t], h, c, wih_b, whh_b, b_b)
        bwd[t] = h
    return [jnp.concatenate([fwd[t], bwd[t]], axis=1) for t in range(n)]


def reference_forward(x, params):
    seq = [x[:, t, :] for t in range(x.shape[1])]
    idx = 0
    for (_insz, hidden) in LSTM_DIMS:
        wih_f, whh_f, b_f, wih_b, whh_b, b_b = params[idx:idx + 6]
        idx += 6
        seq = _bidir_lstm(seq, wih_f, whh_f, b_f, wih_b, whh_b, b_b, hidden)
    arr = jnp.stack(seq, axis=1)                           # (B, T, 32)
    feat = jnp.concatenate([arr.min(axis=1), arr.mean(axis=1), arr.max(axis=1)], axis=1)
    w1, b1, w2, b2, w3, b3 = params[idx:idx + 6]
    h1 = jnp.tanh(feat @ w1 + b1)
    h2 = jnp.tanh(h1 @ w2 + b2)
    return _sigmoid(h2 @ w3 + b3)


if __name__ == "__main__":
    key = jax.random.PRNGKey(0)
    kx, kp = jax.random.split(key)
    x = jax.random.normal(kx, (B, T, IN_CH), jnp.float32)
    raw_params = init_params(kp)
    packed = pack_params(raw_params)

    out = classifier_forward(x, packed)
    jax.block_until_ready(out)

    ref = reference_forward(x, raw_params)
    assert out.shape == (B, OUT_CH), out.shape
    assert jnp.allclose(out, ref, atol=1e-3, rtol=1e-3), (out, ref)
    print("KERNEL_OK")
</pallas_src>

<mosaic_0001>
module attributes {stable_mosaic.version = 11 : i64} {
  func.func @classifier_kernel(%arg0: memref<16x3xf32, #tpu.memory_space<vmem>>, %arg1: memref<384x128xf32, #tpu.memory_space<vmem>>, %arg2: memref<2x5xf32, #tpu.memory_space<vmem>>, %arg3: memref<16x128xf32, #tpu.memory_space<vmem>>, %arg4: memref<16x128xf32, #tpu.memory_space<vmem>>) attributes {dimension_semantics = [], scalar_prefetch = 0 : i64, scratch_operands = 2 : i64, tpu.core_type = #tpu.core_type<tc>} {
    %c0 = arith.constant 0 : index
    %c0_0 = arith.constant 0 : index
    %0 = vector.load %arg1[%c0, %c0_0] : memref<384x128xf32, #tpu.memory_space<vmem>>, vector<3x64xf32>
    %c8 = arith.constant 8 : index
    %c0_1 = arith.constant 0 : index
    %1 = vector.load %arg1[%c8, %c0_1] : memref<384x128xf32, #tpu.memory_space<vmem>>, vector<3x64xf32>
    %c32 = arith.constant 32 : index
    %c0_2 = arith.constant 0 : index
    %2 = vector.load %arg1[%c32, %c0_2] : memref<384x128xf32, #tpu.memory_space<vmem>>, vector<1x64xf32>
    %c0_3 = arith.constant 0 : index
    %c0_4 = arith.constant 0 : index
    %3 = vector.load %arg0[%c0_3, %c0_4] : memref<16x3xf32, #tpu.memory_space<vmem>>, vector<16x3xf32>
    %cst = arith.constant dense<0.000000e+00> : vector<16x64xf32>
    %4 = tpu.matmul %3, %0, %cst {dimension_numbers = #tpu.dot_dimension_numbers<[1], [0], [0], [1], [0, 0, 1, 1], [], []>} : vector<16x3xf32>, vector<3x64xf32>, vector<16x64xf32> -> vector<16x64xf32>
    %cst_5 = arith.constant dense<0.000000e+00> : vector<16x64xf32>
    %5 = tpu.matmul %3, %1, %cst_5 {dimension_numbers = #tpu.dot_dimension_numbers<[1], [0], [0], [1], [0, 0, 1, 1], [], []>} : vector<16x3xf32>, vector<3x64xf32>, vector<16x64xf32> -> vector<16x64xf32>
    %6 = vector.extract_strided_slice %4 {offsets = [0, 0], sizes = [2, 64], strides = [1, 1]} : vector<16x64xf32> to vector<2x64xf32>
    %7 = vector.extract_strided_slice %5 {offsets = [14, 0], sizes = [2, 64], strides = [1, 1]} : vector<16x64xf32> to vector<2x64xf32>
    %8 = arith.addf %6, %7 : vector<2x64xf32>
    %9 = vector.broadcast %2 : vector<1x64xf32> to vector<2x64xf32>
    %10 = arith.addf %8, %9 : vector<2x64xf32>
    %c0_6 = arith.constant 0 : index
    %c0_7 = arith.constant 0 : index
    %11 = vector.load %arg3[%c0_6, %c0_7] : memref<16x128xf32, #tpu.memory_space<vmem>>, vector<2x64xf32>
    tpu.vector_store %arg3[%c0_6, %c0_7], %10 {strides = array<i32>} : memref<16x128xf32, #tpu.memory_space<vmem>>, vector<2x64xf32>,
    %12 = vector.extract_strided_slice %4 {offsets = [2, 0], sizes = [2, 64], strides = [1, 1]} : vector<16x64xf32> to vector<2x64xf32>
    %13 = vector.extract_strided_slice %5 {offsets = [12, 0], sizes = [2, 64], strides = [1, 1]} : vector<16x64xf32> to vector<2x64xf32>
    %14 = arith.addf %12, %13 : vector<2x64xf32>
    %15 = vector.broadcast %2 : vector<1x64xf32> to vector<2x64xf32>
    %16 = arith.addf %14, %15 : vector<2x64xf32>
    %c2 = arith.constant 2 : index
    %c0_8 = arith.constant 0 : index
    %17 = vector.load %arg3[%c2, %c0_8] : memref<16x128xf32, #tpu.memory_space<vmem>>, vector<2x64xf32>
    tpu.vector_store %arg3[%c2, %c0_8], %16 {strides = array<i32>} : memref<16x128xf32, #tpu.memory_space<vmem>>, vector<2x64xf32>,
    %18 = vector.extract_strided_slice %4 {offsets = [4, 0], sizes = [2, 64], strides = [1, 1]} : vector<16x64xf32> to vector<2x64xf32>
    %19 = vector.extract_strided_slice %5 {offsets = [10, 0], sizes = [2, 64], strides = [1, 1]} : vector<16x64xf32> to vector<2x64xf32>
    %20 = arith.addf %18, %19 : vector<2x64xf32>
    %21 = vector.broadcast %2 : vector<1x64xf32> to vector<2x64xf32>
    %22 = arith.addf %20, %21 : vector<2x64xf32>
    %c4 = arith.constant 4 : index
    %c0_9 = arith.constant 0 : index
    %23 = vector.load %arg3[%c4, %c0_9] : memref<16x128xf32, #tpu.memory_space<vmem>>, vector<2x64xf32>
    tpu.vector_store %arg3[%c4, %c0_9], %22 {strides = array<i32>} : memref<16x128xf32, #tpu.memory_space<vmem>>, vector<2x64xf32>,
    %24 = vector.extract_strided_slice %4 {offsets = [6, 0], sizes = [2, 64], strides = [1, 1]} : vector<16x64xf32> to vector<2x64xf32>
    %25 = vector.extract_strided_slice %5 {offsets = [8, 0], sizes = [2, 64], strides = [1, 1]} : vector<16x64xf32> to vector<2x64xf32>
    %26 = arith.addf %24, %25 : vector<2x64xf32>
    %27 = vector.broadcast %2 : vector<1x64xf32> to vector<2x64xf32>
    %28 = arith.addf %26, %27 : vector<2x64xf32>
    %c6 = arith.constant 6 : index
    %c0_10 = arith.constant 0 : index
    %29 = vector.load %arg3[%c6, %c0_10] : memref<16x128xf32, #tpu.memory_space<vmem>>, vector<2x64xf32>
    tpu.vector_store %arg3[%c6, %c0_10], %28 {strides = array<i32>} : memref<16x128xf32, #tpu.memory_space<vmem>>, vector<2x64xf32>,
    %30 = vector.extract_strided_slice %4 {offsets = [8, 0], sizes = [2, 64], strides = [1, 1]} : vector<16x64xf32> to vector<2x64xf32>
    %31 = vector.extract_strided_slice %5 {offsets = [6, 0], sizes = [2, 64], strides = [1, 1]} : vector<16x64xf32> to vector<2x64xf32>
    %32 = arith.addf %30, %31 : vector<2x64xf32>
    %33 = vector.broadcast %2 : vector<1x64xf32> to vector<2x64xf32>
    %34 = arith.addf %32, %33 : vector<2x64xf32>
    %c8_11 = arith.constant 8 : index
    %c0_12 = arith.constant 0 : index
    %35 = vector.load %arg3[%c8_11, %c0_12] : memref<16x128xf32, #tpu.memory_space<vmem>>, vector<2x64xf32>
    tpu.vector_store %arg3[%c8_11, %c0_12], %34 {strides = array<i32>} : memref<16x128xf32, #tpu.memory_space<vmem>>, vector<2x64xf32>,
    %36 = vector.extract_strided_slice %4 {offsets = [10, 0], sizes = [2, 64], strides = [1, 1]} : vector<16x64xf32> to vector<2x64xf32>
    %37 = vector.extract_strided_slice %5 {offsets = [4, 0], sizes = [2, 64], strides = [1, 1]} : vector<16x64xf32> to vector<2x64xf32>
    %38 = arith.addf %36, %37 : vector<2x64xf32>
    %39 = vector.broadcast %2 : vector<1x64xf32> to vector<2x64xf32>
    %40 = arith.addf %38, %39 : vector<2x64xf32>
    %c10 = arith.constant 10 : index
    %c0_13 = arith.constant 0 : index
    %41 = vector.load %arg3[%c10, %c0_13] : memref<16x128xf32, #tpu.memory_space<vmem>>, vector<2x64xf32>
    tpu.vector_store %arg3[%c10, %c0_13], %40 {strides = array<i32>} : memref<16x128xf32, #tpu.memory_space<vmem>>, vector<2x64xf32>,
    %42 = vector.extract_strided_slice %4 {offsets = [12, 0], sizes = [2, 64], strides = [1, 1]} : vector<16x64xf32> to vector<2x64xf32>
    %43 = vector.extract_strided_slice %5 {offsets = [2, 0], sizes = [2, 64], strides = [1, 1]} : vector<16x64xf32> to vector<2x64xf32>
    %44 = arith.addf %42, %43 : vector<2x64xf32>
    %45 = vector.broadcast %2 : vector<1x64xf32> to vector<2x64xf32>
    %46 = arith.addf %44, %45 : vector<2x64xf32>
    %c12 = arith.constant 12 : index
    %c0_14 = arith.constant 0 : index
    %47 = vector.load %arg3[%c12, %c0_14] : memref<16x128xf32, #tpu.memory_space<vmem>>, vector<2x64xf32>
    tpu.vector_store %arg3[%c12, %c0_14], %46 {strides = array<i32>} : memref<16x128xf32, #tpu.memory_space<vmem>>, vector<2x64xf32>,
    %48 = vector.extract_strided_slice %4 {offsets = [14, 0], sizes = [2, 64], strides = [1, 1]} : vector<16x64xf32> to vector<2x64xf32>
    %49 = vector.extract_strided_slice %5 {offsets = [0, 0], sizes = [2, 64], strides = [1, 1]} : vector<16x64xf32> to vector<2x64xf32>
    %50 = arith.addf %48, %49 : vector<2x64xf32>
    %51 = vector.broadcast %2 : vector<1x64xf32> to vector<2x64xf32>
    %52 = arith.addf %50, %51 : vector<2x64xf32>
    %c14 = arith.constant 14 : index
    %c0_15 = arith.constant 0 : index
    %53 = vector.load %arg3[%c14, %c0_15] : memref<16x128xf32, #tpu.memory_space<vmem>>, vector<2x64xf32>
    tpu.vector_store %arg3[%c14, %c0_15], %52 {strides = array<i32>} : memref<16x128xf32, #tpu.memory_space<vmem>>, vector<2x64xf32>,
    %c16 = arith.constant 16 : index
    %c0_16 = arith.constant 0 : index
    %54 = vector.load %arg1[%c16, %c0_16] : memref<384x128xf32, #tpu.memory_space<vmem>>, vector<16x64xf32>
    %cst_17 = arith.constant 0.000000e+00 : f32
    %55 = vector.broadcast %cst_17 : f32 to vector<2x16xf32>
    %c0_i32 = arith.constant 0 : i32
    %c2_i32 = arith.constant 2 : i32
    %56 = arith.muli %c0_i32, %c2_i32 : i32
    %57 = arith.index_cast %56 : i32 to index
    %c0_18 = arith.constant 0 : index
    %58 = vector.load %arg3[%57, %c0_18] : memref<16x128xf32, #tpu.memory_space<vmem>>, vector<2x64xf32>
    %cst_19 = arith.constant dense<0.000000e+00> : vector<2x64xf32>
    %59 = tpu.matmul %55, %54, %cst_19 {dimension_numbers = #tpu.dot_dimension_numbers<[1], [0], [0], [1], [0, 0, 1, 1], [], []>} : vector<2x16xf32>, vector<16x64xf32>, vector<2x64xf32> -> vector<2x64xf32>
    %60 = arith.addf %58, %59 : vector<2x64xf32>
    %61 = vector.extract_strided_slice %60 {offsets = [0, 0], sizes = [2, 48], strides = [1, 1]} : vector<2x64xf32> to vector<2x48xf32>
    %cst_20 = arith.constant 5.000000e-01 : f32
    %62 = vector.broadcast %cst_20 : f32 to vector<2x48xf32>
    %63 = arith.mulf %62, %61 : vector<2x48xf32>
    %64 = math.tanh %63 : vector<2x48xf32>
    %cst_21 = arith.constant 5.000000e-01 : f32
    %65 = vector.broadcast %cst_21 : f32 to vector<2x48xf32>
    %66 = arith.mulf %65, %64 : vector<2x48xf32>
    %cst_22 = arith.constant 5.000000e-01 : f32
    %67 = vector.broadcast %cst_22 : f32 to vector<2x48xf32>
    %68 = arith.addf %66, %67 : vector<2x48xf32>
    %69 = vector.extract_strided_slice %60 {offsets = [0, 48], sizes = [2, 16], strides = [1, 1]} : vector<2x64xf32> to vector<2x16xf32>
    %70 = math.tanh %69 : vector<2x16xf32>
    %71 = vector.extract_strided_slice %68 {offsets = [0, 0], sizes = [2, 16], strides = [1, 1]} : vector<2x48xf32> to vector<2x16xf32>
    %72 = vector.extract_strided_slice %68 {offsets = [0, 16], sizes = [2, 16], strides = [1, 1]} : vector<2x48xf32> to vector<2x16xf32>
    %73 = vector.extract_strided_slice %68 {offsets = [0, 32], sizes = [2, 16], strides = [1, 1]} : vector<2x48xf32> to vector<2x16xf32>
    %74 = arith.mulf %72, %55 : vector<2x16xf32>
    %75 = arith.mulf %71, %70 : vector<2x16xf32>
    %76 = arith.addf %74, %75 : vector<2x16xf32>
    %77 = math.tanh %76 : vector<2x16xf32>
    %78 = arith.mulf %73, %77 : vector<2x16xf32>
    %79 = arith.index_cast %56 : i32 to index
    %c0_23 = arith.constant 0 : index
    %80 = vector.load %arg4[%79, %c0_23] : memref<16x128xf32, #tpu.memory_space<vmem>>, vector<2x16xf32>
    tpu.vector_store %arg4[%79, %c0_23], %78 {strides = array<i32>} : memref<16x128xf32, #tpu.memory_space<vmem>>, vector<2x16xf32>,
    %c1_i32 = arith.constant 1 : i32
    %c2_i32_24 = arith.constant 2 : i32
    %81 = arith.muli %c1_i32, %c2_i32_24 : i32
    %82 = arith.index_cast %81 : i32 to index
    %c0_25 = arith.constant 0 : index
    %83 = vector.load %arg3[%82, %c0_25] : memref<16x128xf32, #tpu.memory_space<vmem>>, vector<2x64xf32>
    %cst_26 = arith.constant dense<0.000000e+00> : vector<2x64xf32>
    %84 = tpu.matmul %78, %54, %cst_26 {dimension_numbers = #tpu.dot_dimension_numbers<[1], [0], [0], [1], [0, 0, 1, 1], [], []>} : vector<2x16xf32>, vector<16x64xf32>, vector<2x64xf32> -> vector<2x64xf32>
    %85 = arith.addf %83, %84 : vector<2x64xf32>
    %86 = vector.extract_strided_slice %85 {offsets = [0, 0], sizes = [2, 48], strides = [1, 1]} : vector<2x64xf32> to vector<2x48xf32>
    %cst_27 = arith.constant 5.000000e-01 : f32
    %87 = vector.broadcast %cst_27 : f32 to vector<2x48xf32>
    %88 = arith.mulf %87, %86 : vector<2x48xf32>
    %89 = math.tanh %88 : vector<2x48xf32>
    %cst_28 = arith.constant 5.000000e-01 : f32
    %90 = vector.broadcast %cst_28 : f32 to vector<2x48xf32>
    %91 = arith.mulf %90, %89 : vector<2x48xf32>
    %cst_29 = arith.constant 5.000000e-01 : f32
    %92 = vector.broadcast %cst_29 : f32 to vector<2x48xf32>
    %93 = arith.addf %91, %92 : vector<2x48xf32>
    %94 = vector.extract_strided_slice %85 {offsets = [0, 48], sizes = [2, 16], strides = [1, 1]} : vector<2x64xf32> to vector<2x16xf32>
    %95 = math.tanh %94 : vector<2x16xf32>
    %96 = vector.extract_strided_slice %93 {offsets = [0, 0], sizes = [2, 16], strides = [1, 1]} : vector<2x48xf32> to vector<2x16xf32>
    %97 = vector.extract_strided_slice %93 {offsets = [0, 16], sizes = [2, 16], strides = [1, 1]} : vector<2x48xf32> to vector<2x16xf32>
    %98 = vector.extract_strided_slice %93 {offsets = [0, 32], sizes = [2, 16], strides = [1, 1]} : vector<2x48xf32> to vector<2x16xf32>
    %99 = arith.mulf %97, %76 : vector<2x16xf32>
    %100 = arith.mulf %96, %95 : vector<2x16xf32>
    %101 = arith.addf %99, %100 : vector<2x16xf32>
    %102 = math.tanh %101 : vector<2x16xf32>
    %103 = arith.mulf %98, %102 : vector<2x16xf32>
    %104 = arith.index_cast %81 : i32 to index
    %c0_30 = arith.constant 0 : index
    %105 = vector.load %arg4[%104, %c0_30] : memref<16x128xf32, #tpu.memory_space<vmem>>, vector<2x16xf32>
    tpu.vector_store %arg4[%104, %c0_30], %103 {strides = array<i32>} : memref<16x128xf32, #tpu.memory_space<vmem>>, vector<2x16xf32>,
    %c2_i32_31 = arith.constant 2 : i32
    %c2_i32_32 = arith.constant 2 : i32
    %106 = arith.muli %c2_i32_31, %c2_i32_32 : i32
    %107 = arith.index_cast %106 : i32 to index
    %c0_33 = arith.constant 0 : index
    %108 = vector.load %arg3[%107, %c0_33] : memref<16x128xf32, #tpu.memory_space<vmem>>, vector<2x64xf32>
    %cst_34 = arith.constant dense<0.000000e+00> : vector<2x64xf32>
    %109 = tpu.matmul %103, %54, %cst_34 {dimension_numbers = #tpu.dot_dimension_numbers<[1], [0], [0], [1], [0, 0, 1, 1], [], []>} : vector<2x16xf32>, vector<16x64xf32>, vector<2x64xf32> -> vector<2x64xf32>
    %110 = arith.addf %108, %109 : vector<2x64xf32>
    %111 = vector.extract_strided_slice %110 {offsets = [0, 0], sizes = [2, 48], strides = [1, 1]} : vector<2x64xf32> to vector<2x48xf32>
    %cst_35 = arith.constant 5.000000e-01 : f32
    %112 = vector.broadcast %cst_35 : f32 to vector<2x48xf32>
    %113 = arith.mulf %112, %111 : vector<2x48xf32>
    %114 = math.tanh %113 : vector<2x48xf32>
    %cst_36 = arith.constant 5.000000e-01 : f32
    %115 = vector.broadcast %cst_36 : f32 to vector<2x48xf32>
    %116 = arith.mulf %115, %114 : vector<2x48xf32>
    %cst_37 = arith.constant 5.000000e-01 : f32
    %117 = vector.broadcast %cst_37 : f32 to vector<2x48xf32>
    %118 = arith.addf %116, %117 : vector<2x48xf32>
    %119 = vector.extract_strided_slice %110 {offsets = [0, 48], sizes = [2, 16], strides = [1, 1]} : vector<2x64xf32> to vector<2x16xf32>
    %120 = math.tanh %119 : vector<2x16xf32>
    %121 = vector.extract_strided_slice %118 {offsets = [0, 0], sizes = [2, 16], strides = [1, 1]} : vector<2x48xf32> to vector<2x16xf32>
    %122 = vector.extract_strided_slice %118 {offsets = [0, 16], sizes = [2, 16], strides = [1, 1]} : vector<2x48xf32> to vector<2x16xf32>
    %123 = vector.extract_strided_slice %118 {offsets = [0, 32], sizes = [2, 16], strides = [1, 1]} : vector<2x48xf32> to vector<2x16xf32>
    %124 = arith.mulf %122, %101 : vector<2x16xf32>
    %125 = arith.mulf %121, %120 : vector<2x16xf32>
    %126 = arith.addf %124, %125 : vector<2x16xf32>
    %127 = math.tanh %126 : vector<2x16xf32>
    %128 = arith.mulf %123, %127 : vector<2x16xf32>
    %129 = arith.index_cast %106 : i32 to index
    %c0_38 = arith.constant 0 : index
    %130 = vector.load %arg4[%129, %c0_38] : memref<16x128xf32, #tpu.memory_space<vmem>>, vector<2x16xf32>
    tpu.vector_store %arg4[%129, %c0_38], %128 {strides = array<i32>} : memref<16x128xf32, #tpu.memory_space<vmem>>, vector<2x16xf32>,
    %c3_i32 = arith.constant 3 : i32
    %c2_i32_39 = arith.constant 2 : i32
    %131 = arith.muli %c3_i32, %c2_i32_39 : i32
    %132 = arith.index_cast %131 : i32 to index
    %c0_40 = arith.constant 0 : index
    %133 = vector.load %arg3[%132, %c0_40] : memref<16x128xf32, #tpu.memory_space<vmem>>, vector<2x64xf32>
    %cst_41 = arith.constant dense<0.000000e+00> : vector<2x64xf32>
    %134 = tpu.matmul %128, %54, %cst_41 {dimension_numbers = #tpu.dot_dimension_numbers<[1], [0], [0], [1], [0, 0, 1, 1], [], []>} : vector<2x16xf32>, vector<16x64xf32>, vector<2x64xf32> -> vector<2x64xf32>
    %135 = arith.addf %133, %134 : vector<2x64xf32>
    %136 = vector.extract_strided_slice %135 {offsets = [0, 0], sizes = [2, 48], strides = [1, 1]} : vector<2x64xf32> to vector<2x48xf32>
    %cst_42 = arith.constant 5.000000e-01 : f32
    %137 = vector.broadcast %cst_42 : f32 to vector<2x48xf32>
    %138 = arith.mulf %137, %136 : vector<2x48xf32>
    %139 = math.tanh %138 : vector<2x48xf32>
    %cst_43 = arith.constant 5.000000e-01 : f32
    %140 = vector.broadcast %cst_43 : f32 to vector<2x48xf32>
    %141 = arith.mulf %140, %139 : vector<2x48xf32>
    %cst_44 = arith.constant 5.000000e-01 : f32
    %142 = vector.broadcast %cst_44 : f32 to vector<2x48xf32>
    %143 = arith.addf %141, %142 : vector<2x48xf32>
    %144 = vector.extract_strided_slice %135 {offsets = [0, 48], sizes = [2, 16], strides = [1, 1]} : vector<2x64xf32> to vector<2x16xf32>
    %145 = math.tanh %144 : vector<2x16xf32>
    %146 = vector.extract_strided_slice %143 {offsets = [0, 0], sizes = [2, 16], strides = [1, 1]} : vector<2x48xf32> to vector<2x16xf32>
    %147 = vector.extract_strided_slice %143 {offsets = [0, 16], sizes = [2, 16], strides = [1, 1]} : vector<2x48xf32> to vector<2x16xf32>
    %148 = vector.extract_strided_slice %143 {offsets = [0, 32], sizes = [2, 16], strides = [1, 1]} : vector<2x48xf32> to vector<2x16xf32>
    %149 = arith.mulf %147, %126 : vector<2x16xf32>
    %150 = arith.mulf %146, %145 : vector<2x16xf32>
    %151 = arith.addf %149, %150 : vector<2x16xf32>
    %152 = math.tanh %151 : vector<2x16xf32>
    %153 = arith.mulf %148, %152 : vector<2x16xf32>
    %154 = arith.index_cast %131 : i32 to index
    %c0_45 = arith.constant 0 : index
    %155 = vector.load %arg4[%154, %c0_45] : memref<16x128xf32, #tpu.memory_space<vmem>>, vector<2x16xf32>
    tpu.vector_store %arg4[%154, %c0_45], %153 {strides = array<i32>} : memref<16x128xf32, #tpu.memory_space<vmem>>, vector<2x16xf32>,
    %c4_i32 = arith.constant 4 : i32
    %c2_i32_46 = arith.constant 2 : i32
    %156 = arith.muli %c4_i32, %c2_i32_46 : i32
    %157 = arith.index_cast %156 : i32 to index
    %c0_47 = arith.constant 0 : index
    %158 = vector.load %arg3[%157, %c0_47] : memref<16x128xf32, #tpu.memory_space<vmem>>, vector<2x64xf32>
    %cst_48 = arith.constant dense<0.000000e+00> : vector<2x64xf32>
    %159 = tpu.matmul %153, %54, %cst_48 {dimension_numbers = #tpu.dot_dimension_numbers<[1], [0], [0], [1], [0, 0, 1, 1], [], []>} : vector<2x16xf32>, vector<16x64xf32>, vector<2x64xf32> -> vector<2x64xf32>
    %160 = arith.addf %158, %159 : vector<2x64xf32>
    %161 = vector.extract_strided_slice %160 {offsets = [0, 0], sizes = [2, 48], strides = [1, 1]} : vector<2x64xf32> to vector<2x48xf32>
    %cst_49 = arith.constant 5.000000e-01 : f32
    %162 = vector.broadcast %cst_49 : f32 to vector<2x48xf32>
    %163 = arith.mulf %162, %161 : vector<2x48xf32>
    %164 = math.tanh %163 : vector<2x48xf32>
    %cst_50 = arith.constant 5.000000e-01 : f32
    %165 = vector.broadcast %cst_50 : f32 to vector<2x48xf32>
    %166 = arith.mulf %165, %164 : vector<2x48xf32>
    %cst_51 = arith.constant 5.000000e-01 : f32
    %167 = vector.broadcast %cst_51 : f32 to vector<2x48xf32>
    %168 = arith.addf %166, %167 : vector<2x48xf32>
    %169 = vector.extract_strided_slice %160 {offsets = [0, 48], sizes = [2, 16], strides = [1, 1]} : vector<2x64xf32> to vector<2x16xf32>
    %170 = math.tanh %169 : vector<2x16xf32>
    %171 = vector.extract_strided_slice %168 {offsets = [0, 0], sizes = [2, 16], strides = [1, 1]} : vector<2x48xf32> to vector<2x16xf32>
    %172 = vector.extract_strided_slice %168 {offsets = [0, 16], sizes = [2, 16], strides = [1, 1]} : vector<2x48xf32> to vector<2x16xf32>
    %173 = vector.extract_strided_slice %168 {offsets = [0, 32], sizes = [2, 16], strides = [1, 1]} : vector<2x48xf32> to vector<2x16xf32>
    %174 = arith.mulf %172, %151 : vector<2x16xf32>
    %175 = arith.mulf %171, %170 : vector<2x16xf32>
    %176 = arith.addf %174, %175 : vector<2x16xf32>
    %177 = math.tanh %176 : vector<2x16xf32>
    %178 = arith.mulf %173, %177 : vector<2x16xf32>
    %179 = arith.index_cast %156 : i32 to index
    %c0_52 = arith.constant 0 : index
    %180 = vector.load %arg4[%179, %c0_52] : memref<16x128xf32, #tpu.memory_space<vmem>>, vector<2x16xf32>
    tpu.vector_store %arg4[%179, %c0_52], %178 {strides = array<i32>} : memref<16x128xf32, #tpu.memory_space<vmem>>, vector<2x16xf32>,
    %c5_i32 = arith.constant 5 : i32
    %c2_i32_53 = arith.constant 2 : i32
    %181 = arith.muli %c5_i32, %c2_i32_53 : i32
    %182 = arith.index_cast %181 : i32 to index
    %c0_54 = arith.constant 0 : index
    %183 = vector.load %arg3[%182, %c0_54] : memref<16x128xf32, #tpu.memory_space<vmem>>, vector<2x64xf32>
    %cst_55 = arith.constant dense<0.000000e+00> : vector<2x64xf32>
    %184 = tpu.matmul %178, %54, %cst_55 {dimension_numbers = #tpu.dot_dimension_numbers<[1], [0], [0], [1], [0, 0, 1, 1], [], []>} : vector<2x16xf32>, vector<16x64xf32>, vector<2x64xf32> -> vector<2x64xf32>
    %185 = arith.addf %183, %184 : vector<2x64xf32>
    %186 = vector.extract_strided_slice %185 {offsets = [0, 0], sizes = [2, 48], strides = [1, 1]} : vector<2x64xf32> to vector<2x48xf32>
    %cst_56 = arith.constant 5.000000e-01 : f32
    %187 = vector.broadcast %cst_56 : f32 to vector<2x48xf32>
    %188 = arith.mulf %187, %186 : vector<2x48xf32>
    %189 = math.tanh %188 : vector<2x48xf32>
    %cst_57 = arith.constant 5.000000e-01 : f32
    %190 = vector.broadcast %cst_57 : f32 to vector<2x48xf32>
    %191 = arith.mulf %190, %189 : vector<2x48xf32>
    %cst_58 = arith.constant 5.000000e-01 : f32
    %192 = vector.broadcast %cst_58 : f32 to vector<2x48xf32>
    %193 = arith.addf %191, %192 : vector<2x48xf32>
    %194 = vector.extract_strided_slice %185 {offsets = [0, 48], sizes = [2, 16], strides = [1, 1]} : vector<2x64xf32> to vector<2x16xf32>
    %195 = math.tanh %194 : vector<2x16xf32>
    %196 = vector.extract_strided_slice %193 {offsets = [0, 0], sizes = [2, 16], strides = [1, 1]} : vector<2x48xf32> to vector<2x16xf32>
    %197 = vector.extract_strided_slice %193 {offsets = [0, 16], sizes = [2, 16], strides = [1, 1]} : vector<2x48xf32> to vector<2x16xf32>
    %198 = vector.extract_strided_slice %193 {offsets = [0, 32], sizes = [2, 16], strides = [1, 1]} : vector<2x48xf32> to vector<2x16xf32>
    %199 = arith.mulf %197, %176 : vector<2x16xf32>
    %200 = arith.mulf %196, %195 : vector<2x16xf32>
    %201 = arith.addf %199, %200 : vector<2x16xf32>
    %202 = math.tanh %201 : vector<2x16xf32>
    %203 = arith.mulf %198, %202 : vector<2x16xf32>
    %204 = arith.index_cast %181 : i32 to index
    %c0_59 = arith.constant 0 : index
    %205 = vector.load %arg4[%204, %c0_59] : memref<16x128xf32, #tpu.memory_space<vmem>>, vector<2x16xf32>
    tpu.vector_store %arg4[%204, %c0_59], %203 {strides = array<i32>} : memref<16x128xf32, #tpu.memory_space<vmem>>, vector<2x16xf32>,
    %c6_i32 = arith.constant 6 : i32
    %c2_i32_60 = arith.constant 2 : i32
    %206 = arith.muli %c6_i32, %c2_i32_60 : i32
    %207 = arith.index_cast %206 : i32 to index
    %c0_61 = arith.constant 0 : index
    %208 = vector.load %arg3[%207, %c0_61] : memref<16x128xf32, #tpu.memory_space<vmem>>, vector<2x64xf32>
    %cst_62 = arith.constant dense<0.000000e+00> : vector<2x64xf32>
    %209 = tpu.matmul %203, %54, %cst_62 {dimension_numbers = #tpu.dot_dimension_numbers<[1], [0], [0], [1], [0, 0, 1, 1], [], []>} : vector<2x16xf32>, vector<16x64xf32>, vector<2x64xf32> -> vector<2x64xf32>
    %210 = arith.addf %208, %209 : vector<2x64xf32>
    %211 = vector.extract_strided_slice %210 {offsets = [0, 0], sizes = [2, 48], strides = [1, 1]} : vector<2x64xf32> to vector<2x48xf32>
    %cst_63 = arith.constant 5.000000e-01 : f32
    %212 = vector.broadcast %cst_63 : f32 to vector<2x48xf32>
    %213 = arith.mulf %212, %211 : vector<2x48xf32>
    %214 = math.tanh %213 : vector<2x48xf32>
    %cst_64 = arith.constant 5.000000e-01 : f32
    %215 = vector.broadcast %cst_64 : f32 to vector<2x48xf32>
    %216 = arith.mulf %215, %214 : vector<2x48xf32>
    %cst_65 = arith.constant 5.000000e-01 : f32
    %217 = vector.broadcast %cst_65 : f32 to vector<2x48xf32>
    %218 = arith.addf %216, %217 : vector<2x48xf32>
    %219 = vector.extract_strided_slice %210 {offsets = [0, 48], sizes = [2, 16], strides = [1, 1]} : vector<2x64xf32> to vector<2x16xf32>
    %220 = math.tanh %219 : vector<2x16xf32>
    %221 = vector.extract_strided_slice %218 {offsets = [0, 0], sizes = [2, 16], strides = [1, 1]} : vector<2x48xf32> to vector<2x16xf32>
    %222 = vector.extract_strided_slice %218 {offsets = [0, 16], sizes = [2, 16], strides = [1, 1]} : vector<2x48xf32> to vector<2x16xf32>
    %223 = vector.extract_strided_slice %218 {offsets = [0, 32], sizes = [2, 16], strides = [1, 1]} : vector<2x48xf32> to vector<2x16xf32>
    %224 = arith.mulf %222, %201 : vector<2x16xf32>
    %225 = arith.mulf %221, %220 : vector<2x16xf32>
    %226 = arith.addf %224, %225 : vector<2x16xf32>
    %227 = math.tanh %226 : vector<2x16xf32>
    %228 = arith.mulf %223, %227 : vector<2x16xf32>
    %229 = arith.index_cast %206 : i32 to index
    %c0_66 = arith.constant 0 : index
    %230 = vector.load %arg4[%229, %c0_66] : memref<16x128xf32, #tpu.memory_space<vmem>>, vector<2x16xf32>
    tpu.vector_store %arg4[%229, %c0_66], %228 {strides = array<i32>} : memref<16x128xf32, #tpu.memory_space<vmem>>, vector<2x16xf32>,
    %c7_i32 = arith.constant 7 : i32
    %c2_i32_67 = arith.constant 2 : i32
    %231 = arith.muli %c7_i32, %c2_i32_67 : i32
    %232 = arith.index_cast %231 : i32 to index
    %c0_68 = arith.constant 0 : index
    %233 = vector.load %arg3[%232, %c0_68] : memref<16x128xf32, #tpu.memory_space<vmem>>, vector<2x64xf32>
    %cst_69 = arith.constant dense<0.000000e+00> : vector<2x64xf32>
    %234 = tpu.matmul %228, %54, %cst_69 {dimension_numbers = #tpu.dot_dimension_numbers<[1], [0], [0], [1], [0, 0, 1, 1], [], []>} : vector<2x16xf32>, vector<16x64xf32>, vector<2x64xf32> -> vector<2x64xf32>
    %235 = arith.addf %233, %234 : vector<2x64xf32>
    %236 = vector.extract_strided_slice %235 {offsets = [0, 0], sizes = [2, 48], strides = [1, 1]} : vector<2x64xf32> to vector<2x48xf32>
    %cst_70 = arith.constant 5.000000e-01 : f32
    %237 = vector.broadcast %cst_70 : f32 to vector<2x48xf32>
    %238 = arith.mulf %237, %236 : vector<2x48xf32>
    %239 = math.tanh %238 : vector<2x48xf32>
    %cst_71 = arith.constant 5.000000e-01 : f32
    %240 = vector.broadcast %cst_71 : f32 to vector<2x48xf32>
    %241 = arith.mulf %240, %239 : vector<2x48xf32>
    %cst_72 = arith.constant 5.000000e-01 : f32
    %242 = vector.broadcast %cst_72 : f32 to vector<2x48xf32>
    %243 = arith.addf %241, %242 : vector<2x48xf32>
    %244 = vector.extract_strided_slice %235 {offsets = [0, 48], sizes = [2, 16], strides = [1, 1]} : vector<2x64xf32> to vector<2x16xf32>
    %245 = math.tanh %244 : vector<2x16xf32>
    %246 = vector.extract_strided_slice %243 {offsets = [0, 0], sizes = [2, 16], strides = [1, 1]} : vector<2x48xf32> to vector<2x16xf32>
    %247 = vector.extract_strided_slice %243 {offsets = [0, 16], sizes = [2, 16], strides = [1, 1]} : vector<2x48xf32> to vector<2x16xf32>
    %248 = vector.extract_strided_slice %243 {offsets = [0, 32], sizes = [2, 16], strides = [1, 1]} : vector<2x48xf32> to vector<2x16xf32>
    %249 = arith.mulf %247, %226 : vector<2x16xf32>
    %250 = arith.mulf %246, %245 : vector<2x16xf32>
    %251 = arith.addf %249, %250 : vector<2x16xf32>
    %252 = math.tanh %251 : vector<2x16xf32>
    %253 = arith.mulf %248, %252 : vector<2x16xf32>
    %254 = arith.index_cast %231 : i32 to index
    %c0_73 = arith.constant 0 : index
    %255 = vector.load %arg4[%254, %c0_73] : memref<16x128xf32, #tpu.memory_space<vmem>>, vector<2x16xf32>
    tpu.vector_store %arg4[%254, %c0_73], %253 {strides = array<i32>} : memref<16x128xf32, #tpu.memory_space<vmem>>, vector<2x16xf32>,
    %c8_i32 = arith.constant 8 : i32
    %c40 = arith.constant 40 : index
    %c0_74 = arith.constant 0 : index
    %256 = vector.load %arg1[%c40, %c0_74] : memref<384x128xf32, #tpu.memory_space<vmem>>, vector<16x128xf32>
    %c56 = arith.constant 56 : index
    %c0_75 = arith.constant 0 : index
    %257 = vector.load %arg1[%c56, %c0_75] : memref<384x128xf32, #tpu.memory_space<vmem>>, vector<16x128xf32>
    %c104 = arith.constant 104 : index
    %c0_76 = arith.constant 0 : index
    %258 = vector.load %arg1[%c104, %c0_76] : memref<384x128xf32, #tpu.memory_space<vmem>>, vector<1x128xf32>
    %c0_77 = arith.constant 0 : index
    %c0_78 = arith.constant 0 : index
    %259 = vector.load %arg4[%c0_77, %c0_78] : memref<16x128xf32, #tpu.memory_space<vmem>>, vector<16x16xf32>
    %cst_79 = arith.constant dense<0.000000e+00> : vector<16x128xf32>
    %260 = tpu.matmul %259, %256, %cst_79 {dimension_numbers = #tpu.dot_dimension_numbers<[1], [0], [0], [1], [0, 0, 1, 1], [], []>} : vector<16x16xf32>, vector<16x128xf32>, vector<16x128xf32> -> vector<16x128xf32>
    %cst_80 = arith.constant dense<0.000000e+00> : vector<16x128xf32>
    %261 = tpu.matmul %259, %257, %cst_80 {dimension_numbers = #tpu.dot_dimension_numbers<[1], [0], [0], [1], [0, 0, 1, 1], [], []>} : vector<16x16xf32>, vector<16x128xf32>, vector<16x128xf32> -> vector<16x128xf32>
    %262 = vector.extract_strided_slice %260 {offsets = [0, 0], sizes = [2, 128], strides = [1, 1]} : vector<16x128xf32> to vector<2x128xf32>
    %263 = vector.extract_strided_slice %261 {offsets = [14, 0], sizes = [2, 128], strides = [1, 1]} : vector<16x128xf32> to vector<2x128xf32>
    %264 = arith.addf %262, %263 : vector<2x128xf32>
    %265 = vector.broadcast %258 : vector<1x128xf32> to vector<2x128xf32>
    %266 = arith.addf %264, %265 : vector<2x128xf32>
    %c0_81 = arith.constant 0 : index
    %c0_82 = arith.constant 0 : index
    %267 = vector.load %arg3[%c0_81, %c0_82] : memref<16x128xf32, #tpu.memory_space<vmem>>, vector<2x128xf32>
    tpu.vector_store %arg3[%c0_81, %c0_82], %266 {strides = array<i32>} : memref<16x128xf32, #tpu.memory_space<vmem>>, vector<2x128xf32>,
    %268 = vector.extract_strided_slice %260 {offsets = [2, 0], sizes = [2, 128], strides = [1, 1]} : vector<16x128xf32> to vector<2x128xf32>
    %269 = vector.extract_strided_slice %261 {offsets = [12, 0], sizes = [2, 128], strides = [1, 1]} : vector<16x128xf32> to vector<2x128xf32>
    %270 = arith.addf %268, %269 : vector<2x128xf32>
    %271 = vector.broadcast %258 : vector<1x128xf32> to vector<2x128xf32>
    %272 = arith.addf %270, %271 : vector<2x128xf32>
    %c2_83 = arith.constant 2 : index
    %c0_84 = arith.constant 0 : index
    %273 = vector.load %arg3[%c2_83, %c0_84] : memref<16x128xf32, #tpu.memory_space<vmem>>, vector<2x128xf32>
    tpu.vector_store %arg3[%c2_83, %c0_84], %272 {strides = array<i32>} : memref<16x128xf32, #tpu.memory_space<vmem>>, vector<2x128xf32>,
    %274 = vector.extract_strided_slice %260 {offsets = [4, 0], sizes = [2, 128], strides = [1, 1]} : vector<16x128xf32> to vector<2x128xf32>
    %275 = vector.extract_strided_slice %261 {offsets = [10, 0], sizes = [2, 128], strides = [1, 1]} : vector<16x128xf32> to vector<2x128xf32>
    %276 = arith.addf %274, %275 : vector<2x128xf32>
    %277 = vector.broadcast %258 : vector<1x128xf32> to vector<2x128xf32>
    %278 = arith.addf %276, %277 : vector<2x128xf32>
    %c4_85 = arith.constant 4 : index
    %c0_86 = arith.constant 0 : index
    %279 = vector.load %arg3[%c4_85, %c0_86] : memref<16x128xf32, #tpu.memory_space<vmem>>, vector<2x128xf32>
    tpu.vector_store %arg3[%c4_85, %c0_86], %278 {strides = array<i32>} : memref<16x128xf32, #tpu.memory_space<vmem>>, vector<2x128xf32>,
    %280 = vector.extract_strided_slice %260 {offsets = [6, 0], sizes = [2, 128], strides = [1, 1]} : vector<16x128xf32> to vector<2x128xf32>
    %281 = vector.extract_strided_slice %261 {offsets = [8, 0], sizes = [2, 128], strides = [1, 1]} : vector<16x128xf32> to vector<2x128xf32>
    %282 = arith.addf %280, %281 : vector<2x128xf32>
    %283 = vector.broadcast %258 : vector<1x128xf32> to vector<2x128xf32>
    %284 = arith.addf %282, %283 : vector<2x128xf32>
    %c6_87 = arith.constant 6 : index
    %c0_88 = arith.constant 0 : index
    %285 = vector.load %arg3[%c6_87, %c0_88] : memref<16x128xf32, #tpu.memory_space<vmem>>, vector<2x128xf32>
    tpu.vector_store %arg3[%c6_87, %c0_88], %284 {strides = array<i32>} : memref<16x128xf32, #tpu.memory_space<vmem>>, vector<2x128xf32>,
    %286 = vector.extract_strided_slice %260 {offsets = [8, 0], sizes = [2, 128], strides = [1, 1]} : vector<16x128xf32> to vector<2x128xf32>
    %287 = vector.extract_strided_slice %261 {offsets = [6, 0], sizes = [2, 128], strides = [1, 1]} : vector<16x128xf32> to vector<2x128xf32>
    %288 = arith.addf %286, %287 : vector<2x128xf32>
    %289 = vector.broadcast %258 : vector<1x128xf32> to vector<2x128xf32>
    %290 = arith.addf %288, %289 : vector<2x128xf32>
    %c8_89 = arith.constant 8 : index
    %c0_90 = arith.constant 0 : index
    %291 = vector.load %arg3[%c8_89, %c0_90] : memref<16x128xf32, #tpu.memory_space<vmem>>, vector<2x128xf32>
    tpu.vector_store %arg3[%c8_89, %c0_90], %290 {strides = array<i32>} : memref<16x128xf32, #tpu.memory_space<vmem>>, vector<2x128xf32>,
    %292 = vector.extract_strided_slice %260 {offsets = [10, 0], sizes = [2, 128], strides = [1, 1]} : vector<16x128xf32> to vector<2x128xf32>
    %293 = vector.extract_strided_slice %261 {offsets = [4, 0], sizes = [2, 128], strides = [1, 1]} : vector<16x128xf32> to vector<2x128xf32>
    %294 = arith.addf %292, %293 : vector<2x128xf32>
    %295 = vector.broadcast %258 : vector<1x128xf32> to vector<2x128xf32>
    %296 = arith.addf %294, %295 : vector<2x128xf32>
    %c10_91 = arith.constant 10 : index
    %c0_92 = arith.constant 0 : index
    %297 = vector.load %arg3[%c10_91, %c0_92] : memref<16x128xf32, #tpu.memory_space<vmem>>, vector<2x128xf32>
    tpu.vector_store %arg3[%c10_91, %c0_92], %296 {strides = array<i32>} : memref<16x128xf32, #tpu.memory_space<vmem>>, vector<2x128xf32>,
    %298 = vector.extract_strided_slice %260 {offsets = [12, 0], sizes = [2, 128], strides = [1, 1]} : vector<16x128xf32> to vector<2x128xf32>
    %299 = vector.extract_strided_slice %261 {offsets = [2, 0], sizes = [2, 128], strides = [1, 1]} : vector<16x128xf32> to vector<2x128xf32>
    %300 = arith.addf %298, %299 : vector<2x128xf32>
    %301 = vector.broadcast %258 : vector<1x128xf32> to vector<2x128xf32>
    %302 = arith.addf %300, %301 : vector<2x128xf32>
    %c12_93 = arith.constant 12 : index
    %c0_94 = arith.constant 0 : index
    %303 = vector.load %arg3[%c12_93, %c0_94] : memref<16x128xf32, #tpu.memory_space<vmem>>, vector<2x128xf32>
    tpu.vector_store %arg3[%c12_93, %c0_94], %302 {strides = array<i32>} : memref<16x128xf32, #tpu.memory_space<vmem>>, vector<2x128xf32>,
    %304 = vector.extract_strided_slice %260 {offsets = [14, 0], sizes = [2, 128], strides = [1, 1]} : vector<16x128xf32> to vector<2x128xf32>
    %305 = vector.extract_strided_slice %261 {offsets = [0, 0], sizes = [2, 128], strides = [1, 1]} : vector<16x128xf32> to vector<2x128xf32>
    %306 = arith.addf %304, %305 : vector<2x128xf32>
    %307 = vector.broadcast %258 : vector<1x128xf32> to vector<2x128xf32>
    %308 = arith.addf %306, %307 : vector<2x128xf32>
    %c14_95 = arith.constant 14 : index
    %c0_96 = arith.constant 0 : index
    %309 = vector.load %arg3[%c14_95, %c0_96] : memref<16x128xf32, #tpu.memory_space<vmem>>, vector<2x128xf32>
    tpu.vector_store %arg3[%c14_95, %c0_96], %308 {strides = array<i32>} : memref<16x128xf32, #tpu.memory_space<vmem>>, vector<2x128xf32>,
    %c72 = arith.constant 72 : index
    %c0_97 = arith.constant 0 : index
    %310 = vector.load %arg1[%c72, %c0_97] : memref<384x128xf32, #tpu.memory_space<vmem>>, vector<32x128xf32>
    %cst_98 = arith.constant 0.000000e+00 : f32
    %311 = vector.broadcast %cst_98 : f32 to vector<2x32xf32>
    %c0_i32_99 = arith.constant 0 : i32
    %c2_i32_100 = arith.constant 2 : i32
    %312 = arith.muli %c0_i32_99, %c2_i32_100 : i32
    %313 = arith.index_cast %312 : i32 to index
    %c0_101 = arith.constant 0 : index
    %314 = vector.load %arg3[%313, %c0_101] : memref<16x128xf32, #tpu.memory_space<vmem>>, vector<2x128xf32>
    %cst_102 = arith.constant dense<0.000000e+00> : vector<2x128xf32>
    %315 = tpu.matmul %311, %310, %cst_102 {dimension_numbers = #tpu.dot_dimension_numbers<[1], [0], [0], [1], [0, 0, 1, 1], [], []>} : vector<2x32xf32>, vector<32x128xf32>, vector<2x128xf32> -> vector<2x128xf32>
    %316 = arith.addf %314, %315 : vector<2x128xf32>
    %317 = vector.extract_strided_slice %316 {offsets = [0, 0], sizes = [2, 96], strides = [1, 1]} : vector<2x128xf32> to vector<2x96xf32>
    %cst_103 = arith.constant 5.000000e-01 : f32
    %318 = vector.broadcast %cst_103 : f32 to vector<2x96xf32>
    %319 = arith.mulf %318, %317 : vector<2x96xf32>
    %320 = math.tanh %319 : vector<2x96xf32>
    %cst_104 = arith.constant 5.000000e-01 : f32
    %321 = vector.broadcast %cst_104 : f32 to vector<2x96xf32>
    %322 = arith.mulf %321, %320 : vector<2x96xf32>
    %cst_105 = arith.constant 5.000000e-01 : f32
    %323 = vector.broadcast %cst_105 : f32 to vector<2x96xf32>
    %324 = arith.addf %322, %323 : vector<2x96xf32>
    %325 = vector.extract_strided_slice %316 {offsets = [0, 96], sizes = [2, 32], strides = [1, 1]} : vector<2x128xf32> to vector<2x32xf32>
    %326 = math.tanh %325 : vector<2x32xf32>
    %327 = vector.extract_strided_slice %324 {offsets = [0, 0], sizes = [2, 32], strides = [1, 1]} : vector<2x96xf32> to vector<2x32xf32>
    %328 = vector.extract_strided_slice %324 {offsets = [0, 32], sizes = [2, 32], strides = [1, 1]} : vector<2x96xf32> to vector<2x32xf32>
    %329 = vector.extract_strided_slice %324 {offsets = [0, 64], sizes = [2, 32], strides = [1, 1]} : vector<2x96xf32> to vector<2x32xf32>
    %330 = arith.mulf %328, %311 : vector<2x32xf32>
    %331 = arith.mulf %327, %326 : vector<2x32xf32>
    %332 = arith.addf %330, %331 : vector<2x32xf32>
    %333 = math.tanh %332 : vector<2x32xf32>
    %334 = arith.mulf %329, %333 : vector<2x32xf32>
    %335 = arith.index_cast %312 : i32 to index
    %c0_106 = arith.constant 0 : index
    %336 = vector.load %arg4[%335, %c0_106] : memref<16x128xf32, #tpu.memory_space<vmem>>, vector<2x32xf32>
    tpu.vector_store %arg4[%335, %c0_106], %334 {strides = array<i32>} : memref<16x128xf32, #tpu.memory_space<vmem>>, vector<2x32xf32>,
    %c1_i32_107 = arith.constant 1 : i32
    %c2_i32_108 = arith.constant 2 : i32
    %337 = arith.muli %c1_i32_107, %c2_i32_108 : i32
    %338 = arith.index_cast %337 : i32 to index
    %c0_109 = arith.constant 0 : index
    %339 = vector.load %arg3[%338, %c0_109] : memref<16x128xf32, #tpu.memory_space<vmem>>, vector<2x128xf32>
    %cst_110 = arith.constant dense<0.000000e+00> : vector<2x128xf32>
    %340 = tpu.matmul %334, %310, %cst_110 {dimension_numbers = #tpu.dot_dimension_numbers<[1], [0], [0], [1], [0, 0, 1, 1], [], []>} : vector<2x32xf32>, vector<32x128xf32>, vector<2x128xf32> -> vector<2x128xf32>
    %341 = arith.addf %339, %340 : vector<2x128xf32>
    %342 = vector.extract_strided_slice %341 {offsets = [0, 0], sizes = [2, 96], strides = [1, 1]} : vector<2x128xf32> to vector<2x96xf32>
    %cst_111 = arith.constant 5.000000e-01 : f32
    %343 = vector.broadcast %cst_111 : f32 to vector<2x96xf32>
    %344 = arith.mulf %343, %342 : vector<2x96xf32>
    %345 = math.tanh %344 : vector<2x96xf32>
    %cst_112 = arith.constant 5.000000e-01 : f32
    %346 = vector.broadcast %cst_112 : f32 to vector<2x96xf32>
    %347 = arith.mulf %346, %345 : vector<2x96xf32>
    %cst_113 = arith.constant 5.000000e-01 : f32
    %348 = vector.broadcast %cst_113 : f32 to vector<2x96xf32>
    %349 = arith.addf %347, %348 : vector<2x96xf32>
    %350 = vector.extract_strided_slice %341 {offsets = [0, 96], sizes = [2, 32], strides = [1, 1]} : vector<2x128xf32> to vector<2x32xf32>
    %351 = math.tanh %350 : vector<2x32xf32>
    %352 = vector.extract_strided_slice %349 {offsets = [0, 0], sizes = [2, 32], strides = [1, 1]} : vector<2x96xf32> to vector<2x32xf32>
    %353 = vector.extract_strided_slice %349 {offsets = [0, 32], sizes = [2, 32], strides = [1, 1]} : vector<2x96xf32> to vector<2x32xf32>
    %354 = vector.extract_strided_slice %349 {offsets = [0, 64], sizes = [2, 32], strides = [1, 1]} : vector<2x96xf32> to vector<2x32xf32>
    %355 = arith.mulf %353, %332 : vector<2x32xf32>
    %356 = arith.mulf %352, %351 : vector<2x32xf32>
    %357 = arith.addf %355, %356 : vector<2x32xf32>
    %358 = math.tanh %357 : vector<2x32xf32>
    %359 = arith.mulf %354, %358 : vector<2x32xf32>
    %360 = arith.index_cast %337 : i32 to index
    %c0_114 = arith.constant 0 : index
    %361 = vector.load %arg4[%360, %c0_114] : memref<16x128xf32, #tpu.memory_space<vmem>>, vector<2x32xf32>
    tpu.vector_store %arg4[%360, %c0_114], %359 {strides = array<i32>} : memref<16x128xf32, #tpu.memory_space<vmem>>, vector<2x32xf32>,
    %c2_i32_115 = arith.constant 2 : i32
    %c2_i32_116 = arith.constant 2 : i32
    %362 = arith.muli %c2_i32_115, %c2_i32_116 : i32
    %363 = arith.index_cast %362 : i32 to index
    %c0_117 = arith.constant 0 : index
    %364 = vector.load %arg3[%363, %c0_117] : memref<16x128xf32, #tpu.memory_space<vmem>>, vector<2x128xf32>
    %cst_118 = arith.constant dense<0.000000e+00> : vector<2x128xf32>
    %365 = tpu.matmul %359, %310, %cst_118 {dimension_numbers = #tpu.dot_dimension_numbers<[1], [0], [0], [1], [0, 0, 1, 1], [], []>} : vector<2x32xf32>, vector<32x128xf32>, vector<2x128xf32> -> vector<2x128xf32>
    %366 = arith.addf %364, %365 : vector<2x128xf32>
    %367 = vector.extract_strided_slice %366 {offsets = [0, 0], sizes = [2, 96], strides = [1, 1]} : vector<2x128xf32> to vector<2x96xf32>
    %cst_119 = arith.constant 5.000000e-01 : f32
    %368 = vector.broadcast %cst_119 : f32 to vector<2x96xf32>
    %369 = arith.mulf %368, %367 : vector<2x96xf32>
    %370 = math.tanh %369 : vector<2x96xf32>
    %cst_120 = arith.constant 5.000000e-01 : f32
    %371 = vector.broadcast %cst_120 : f32 to vector<2x96xf32>
    %372 = arith.mulf %371, %370 : vector<2x96xf32>
    %cst_121 = arith.constant 5.000000e-01 : f32
    %373 = vector.broadcast %cst_121 : f32 to vector<2x96xf32>
    %374 = arith.addf %372, %373 : vector<2x96xf32>
    %375 = vector.extract_strided_slice %366 {offsets = [0, 96], sizes = [2, 32], strides = [1, 1]} : vector<2x128xf32> to vector<2x32xf32>
    %376 = math.tanh %375 : vector<2x32xf32>
    %377 = vector.extract_strided_slice %374 {offsets = [0, 0], sizes = [2, 32], strides = [1, 1]} : vector<2x96xf32> to vector<2x32xf32>
    %378 = vector.extract_strided_slice %374 {offsets = [0, 32], sizes = [2, 32], strides = [1, 1]} : vector<2x96xf32> to vector<2x32xf32>
    %379 = vector.extract_strided_slice %374 {offsets = [0, 64], sizes = [2, 32], strides = [1, 1]} : vector<2x96xf32> to vector<2x32xf32>
    %380 = arith.mulf %378, %357 : vector<2x32xf32>
    %381 = arith.mulf %377, %376 : vector<2x32xf32>
    %382 = arith.addf %380, %381 : vector<2x32xf32>
    %383 = math.tanh %382 : vector<2x32xf32>
    %384 = arith.mulf %379, %383 : vector<2x32xf32>
    %385 = arith.index_cast %362 : i32 to index
    %c0_122 = arith.constant 0 : index
    %386 = vector.load %arg4[%385, %c0_122] : memref<16x128xf32, #tpu.memory_space<vmem>>, vector<2x32xf32>
    tpu.vector_store %arg4[%385, %c0_122], %384 {strides = array<i32>} : memref<16x128xf32, #tpu.memory_space<vmem>>, vector<2x32xf32>,
    %c3_i32_123 = arith.constant 3 : i32
    %c2_i32_124 = arith.constant 2 : i32
    %387 = arith.muli %c3_i32_123, %c2_i32_124 : i32
    %388 = arith.index_cast %387 : i32 to index
    %c0_125 = arith.constant 0 : index
    %389 = vector.load %arg3[%388, %c0_125] : memref<16x128xf32, #tpu.memory_space<vmem>>, vector<2x128xf32>
    %cst_126 = arith.constant dense<0.000000e+00> : vector<2x128xf32>
    %390 = tpu.matmul %384, %310, %cst_126 {dimension_numbers = #tpu.dot_dimension_numbers<[1], [0], [0], [1], [0, 0, 1, 1], [], []>} : vector<2x32xf32>, vector<32x128xf32>, vector<2x128xf32> -> vector<2x128xf32>
    %391 = arith.addf %389, %390 : vector<2x128xf32>
    %392 = vector.extract_strided_slice %391 {offsets = [0, 0], sizes = [2, 96], strides = [1, 1]} : vector<2x128xf32> to vector<2x96xf32>
    %cst_127 = arith.constant 5.000000e-01 : f32
    %393 = vector.broadcast %cst_127 : f32 to vector<2x96xf32>
    %394 = arith.mulf %393, %392 : vector<2x96xf32>
    %395 = math.tanh %394 : vector<2x96xf32>
    %cst_128 = arith.constant 5.000000e-01 : f32
    %396 = vector.broadcast %cst_128 : f32 to vector<2x96xf32>
    %397 = arith.mulf %396, %395 : vector<2x96xf32>
    %cst_129 = arith.constant 5.000000e-01 : f32
    %398 = vector.broadcast %cst_129 : f32 to vector<2x96xf32>
    %399 = arith.addf %397, %398 : vector<2x96xf32>
    %400 = vector.extract_strided_slice %391 {offsets = [0, 96], sizes = [2, 32], strides = [1, 1]} : vector<2x128xf32> to vector<2x32xf32>
    %401 = math.tanh %400 : vector<2x32xf32>
    %402 = vector.extract_strided_slice %399 {offsets = [0, 0], sizes = [2, 32], strides = [1, 1]} : vector<2x96xf32> to vector<2x32xf32>
    %403 = vector.extract_strided_slice %399 {offsets = [0, 32], sizes = [2, 32], strides = [1, 1]} : vector<2x96xf32> to vector<2x32xf32>
    %404 = vector.extract_strided_slice %399 {offsets = [0, 64], sizes = [2, 32], strides = [1, 1]} : vector<2x96xf32> to vector<2x32xf32>
    %405 = arith.mulf %403, %382 : vector<2x32xf32>
    %406 = arith.mulf %402, %401 : vector<2x32xf32>
    %407 = arith.addf %405, %406 : vector<2x32xf32>
    %408 = math.tanh %407 : vector<2x32xf32>
    %409 = arith.mulf %404, %408 : vector<2x32xf32>
    %410 = arith.index_cast %387 : i32 to index
    %c0_130 = arith.constant 0 : index
    %411 = vector.load %arg4[%410, %c0_130] : memref<16x128xf32, #tpu.memory_space<vmem>>, vector<2x32xf32>
    tpu.vector_store %arg4[%410, %c0_130], %409 {strides = array<i32>} : memref<16x128xf32, #tpu.memory_space<vmem>>, vector<2x32xf32>,
    %c4_i32_131 = arith.constant 4 : i32
    %c2_i32_132 = arith.constant 2 : i32
    %412 = arith.muli %c4_i32_131, %c2_i32_132 : i32
    %413 = arith.index_cast %412 : i32 to index
    %c0_133 = arith.constant 0 : index
    %414 = vector.load %arg3[%413, %c0_133] : memref<16x128xf32, #tpu.memory_space<vmem>>, vector<2x128xf32>
    %cst_134 = arith.constant dense<0.000000e+00> : vector<2x128xf32>
    %415 = tpu.matmul %409, %310, %cst_134 {dimension_numbers = #tpu.dot_dimension_numbers<[1], [0], [0], [1], [0, 0, 1, 1], [], []>} : vector<2x32xf32>, vector<32x128xf32>, vector<2x128xf32> -> vector<2x128xf32>
    %416 = arith.addf %414, %415 : vector<2x128xf32>
    %417 = vector.extract_strided_slice %416 {offsets = [0, 0], sizes = [2, 96], strides = [1, 1]} : vector<2x128xf32> to vector<2x96xf32>
    %cst_135 = arith.constant 5.000000e-01 : f32
    %418 = vector.broadcast %cst_135 : f32 to vector<2x96xf32>
    %419 = arith.mulf %418, %417 : vector<2x96xf32>
    %420 = math.tanh %419 : vector<2x96xf32>
    %cst_136 = arith.constant 5.000000e-01 : f32
    %421 = vector.broadcast %cst_136 : f32 to vector<2x96xf32>
    %422 = arith.mulf %421, %420 : vector<2x96xf32>
    %cst_137 = arith.constant 5.000000e-01 : f32
    %423 = vector.broadcast %cst_137 : f32 to vector<2x96xf32>
    %424 = arith.addf %422, %423 : vector<2x96xf32>
    %425 = vector.extract_strided_slice %416 {offsets = [0, 96], sizes = [2, 32], strides = [1, 1]} : vector<2x128xf32> to vector<2x32xf32>
    %426 = math.tanh %425 : vector<2x32xf32>
    %427 = vector.extract_strided_slice %424 {offsets = [0, 0], sizes = [2, 32], strides = [1, 1]} : vector<2x96xf32> to vector<2x32xf32>
    %428 = vector.extract_strided_slice %424 {offsets = [0, 32], sizes = [2, 32], strides = [1, 1]} : vector<2x96xf32> to vector<2x32xf32>
    %429 = vector.extract_strided_slice %424 {offsets = [0, 64], sizes = [2, 32], strides = [1, 1]} : vector<2x96xf32> to vector<2x32xf32>
    %430 = arith.mulf %428, %407 : vector<2x32xf32>
    %431 = arith.mulf %427, %426 : vector<2x32xf32>
    %432 = arith.addf %430, %431 : vector<2x32xf32>
    %433 = math.tanh %432 : vector<2x32xf32>
    %434 = arith.mulf %429, %433 : vector<2x32xf32>
    %435 = arith.index_cast %412 : i32 to index
    %c0_138 = arith.constant 0 : index
    %436 = vector.load %arg4[%435, %c0_138] : memref<16x128xf32, #tpu.memory_space<vmem>>, vector<2x32xf32>
    tpu.vector_store %arg4[%435, %c0_138], %434 {strides = array<i32>} : memref<16x128xf32, #tpu.memory_space<vmem>>, vector<2x32xf32>,
    %c5_i32_139 = arith.constant 5 : i32
    %c2_i32_140 = arith.constant 2 : i32
    %437 = arith.muli %c5_i32_139, %c2_i32_140 : i32
    %438 = arith.index_cast %437 : i32 to index
    %c0_141 = arith.constant 0 : index
    %439 = vector.load %arg3[%438, %c0_141] : memref<16x128xf32, #tpu.memory_space<vmem>>, vector<2x128xf32>
    %cst_142 = arith.constant dense<0.000000e+00> : vector<2x128xf32>
    %440 = tpu.matmul %434, %310, %cst_142 {dimension_numbers = #tpu.dot_dimension_numbers<[1], [0], [0], [1], [0, 0, 1, 1], [], []>} : vector<2x32xf32>, vector<32x128xf32>, vector<2x128xf32> -> vector<2x128xf32>
    %441 = arith.addf %439, %440 : vector<2x128xf32>
    %442 = vector.extract_strided_slice %441 {offsets = [0, 0], sizes = [2, 96], strides = [1, 1]} : vector<2x128xf32> to vector<2x96xf32>
    %cst_143 = arith.constant 5.000000e-01 : f32
    %443 = vector.broadcast %cst_143 : f32 to vector<2x96xf32>
    %444 = arith.mulf %443, %442 : vector<2x96xf32>
    %445 = math.tanh %444 : vector<2x96xf32>
    %cst_144 = arith.constant 5.000000e-01 : f32
    %446 = vector.broadcast %cst_144 : f32 to vector<2x96xf32>
    %447 = arith.mulf %446, %445 : vector<2x96xf32>
    %cst_145 = arith.constant 5.000000e-01 : f32
    %448 = vector.broadcast %cst_145 : f32 to vector<2x96xf32>
    %449 = arith.addf %447, %448 : vector<2x96xf32>
    %450 = vector.extract_strided_slice %441 {offsets = [0, 96], sizes = [2, 32], strides = [1, 1]} : vector<2x128xf32> to vector<2x32xf32>
    %451 = math.tanh %450 : vector<2x32xf32>
    %452 = vector.extract_strided_slice %449 {offsets = [0, 0], sizes = [2, 32], strides = [1, 1]} : vector<2x96xf32> to vector<2x32xf32>
    %453 = vector.extract_strided_slice %449 {offsets = [0, 32], sizes = [2, 32], strides = [1, 1]} : vector<2x96xf32> to vector<2x32xf32>
    %454 = vector.extract_strided_slice %449 {offsets = [0, 64], sizes = [2, 32], strides = [1, 1]} : vector<2x96xf32> to vector<2x32xf32>
    %455 = arith.mulf %453, %432 : vector<2x32xf32>
    %456 = arith.mulf %452, %451 : vector<2x32xf32>
    %457 = arith.addf %455, %456 : vector<2x32xf32>
    %458 = math.tanh %457 : vector<2x32xf32>
    %459 = arith.mulf %454, %458 : vector<2x32xf32>
    %460 = arith.index_cast %437 : i32 to index
    %c0_146 = arith.constant 0 : index
    %461 = vector.load %arg4[%460, %c0_146] : memref<16x128xf32, #tpu.memory_space<vmem>>, vector<2x32xf32>
    tpu.vector_store %arg4[%460, %c0_146], %459 {strides = array<i32>} : memref<16x128xf32, #tpu.memory_space<vmem>>, vector<2x32xf32>,
    %c6_i32_147 = arith.constant 6 : i32
    %c2_i32_148 = arith.constant 2 : i32
    %462 = arith.muli %c6_i32_147, %c2_i32_148 : i32
    %463 = arith.index_cast %462 : i32 to index
    %c0_149 = arith.constant 0 : index
    %464 = vector.load %arg3[%463, %c0_149] : memref<16x128xf32, #tpu.memory_space<vmem>>, vector<2x128xf32>
    %cst_150 = arith.constant dense<0.000000e+00> : vector<2x128xf32>
    %465 = tpu.matmul %459, %310, %cst_150 {dimension_numbers = #tpu.dot_dimension_numbers<[1], [0], [0], [1], [0, 0, 1, 1], [], []>} : vector<2x32xf32>, vector<32x128xf32>, vector<2x128xf32> -> vector<2x128xf32>
    %466 = arith.addf %464, %465 : vector<2x128xf32>
    %467 = vector.extract_strided_slice %466 {offsets = [0, 0], sizes = [2, 96], strides = [1, 1]} : vector<2x128xf32> to vector<2x96xf32>
    %cst_151 = arith.constant 5.000000e-01 : f32
    %468 = vector.broadcast %cst_151 : f32 to vector<2x96xf32>
    %469 = arith.mulf %468, %467 : vector<2x96xf32>
    %470 = math.tanh %469 : vector<2x96xf32>
    %cst_152 = arith.constant 5.000000e-01 : f32
    %471 = vector.broadcast %cst_152 : f32 to vector<2x96xf32>
    %472 = arith.mulf %471, %470 : vector<2x96xf32>
    %cst_153 = arith.constant 5.000000e-01 : f32
    %473 = vector.broadcast %cst_153 : f32 to vector<2x96xf32>
    %474 = arith.addf %472, %473 : vector<2x96xf32>
    %475 = vector.extract_strided_slice %466 {offsets = [0, 96], sizes = [2, 32], strides = [1, 1]} : vector<2x128xf32> to vector<2x32xf32>
    %476 = math.tanh %475 : vector<2x32xf32>
    %477 = vector.extract_strided_slice %474 {offsets = [0, 0], sizes = [2, 32], strides = [1, 1]} : vector<2x96xf32> to vector<2x32xf32>
    %478 = vector.extract_strided_slice %474 {offsets = [0, 32], sizes = [2, 32], strides = [1, 1]} : vector<2x96xf32> to vector<2x32xf32>
    %479 = vector.extract_strided_slice %474 {offsets = [0, 64], sizes = [2, 32], strides = [1, 1]} : vector<2x96xf32> to vector<2x32xf32>
    %480 = arith.mulf %478, %457 : vector<2x32xf32>
    %481 = arith.mulf %477, %476 : vector<2x32xf32>
    %482 = arith.addf %480, %481 : vector<2x32xf32>
    %483 = math.tanh %482 : vector<2x32xf32>
    %484 = arith.mulf %479, %483 : vector<2x32xf32>
    %485 = arith.index_cast %462 : i32 to index
    %c0_154 = arith.constant 0 : index
    %486 = vector.load %arg4[%485, %c0_154] : memref<16x128xf32, #tpu.memory_space<vmem>>, vector<2x32xf32>
    tpu.vector_store %arg4[%485, %c0_154], %484 {strides = array<i32>} : memref<16x128xf32, #tpu.memory_space<vmem>>, vector<2x32xf32>,
    %c7_i32_155 = arith.constant 7 : i32
    %c2_i32_156 = arith.constant 2 : i32
    %487 = arith.muli %c7_i32_155, %c2_i32_156 : i32
    %488 = arith.index_cast %487 : i32 to index
    %c0_157 = arith.constant 0 : index
    %489 = vector.load %arg3[%488, %c0_157] : memref<16x128xf32, #tpu.memory_space<vmem>>, vector<2x128xf32>
    %cst_158 = arith.constant dense<0.000000e+00> : vector<2x128xf32>
    %490 = tpu.matmul %484, %310, %cst_158 {dimension_numbers = #tpu.dot_dimension_numbers<[1], [0], [0], [1], [0, 0, 1, 1], [], []>} : vector<2x32xf32>, vector<32x128xf32>, vector<2x128xf32> -> vector<2x128xf32>
    %491 = arith.addf %489, %490 : vector<2x128xf32>
    %492 = vector.extract_strided_slice %491 {offsets = [0, 0], sizes = [2, 96], strides = [1, 1]} : vector<2x128xf32> to vector<2x96xf32>
    %cst_159 = arith.constant 5.000000e-01 : f32
    %493 = vector.broadcast %cst_159 : f32 to vector<2x96xf32>
    %494 = arith.mulf %493, %492 : vector<2x96xf32>
    %495 = math.tanh %494 : vector<2x96xf32>
    %cst_160 = arith.constant 5.000000e-01 : f32
    %496 = vector.broadcast %cst_160 : f32 to vector<2x96xf32>
    %497 = arith.mulf %496, %495 : vector<2x96xf32>
    %cst_161 = arith.constant 5.000000e-01 : f32
    %498 = vector.broadcast %cst_161 : f32 to vector<2x96xf32>
    %499 = arith.addf %497, %498 : vector<2x96xf32>
    %500 = vector.extract_strided_slice %491 {offsets = [0, 96], sizes = [2, 32], strides = [1, 1]} : vector<2x128xf32> to vector<2x32xf32>
    %501 = math.tanh %500 : vector<2x32xf32>
    %502 = vector.extract_strided_slice %499 {offsets = [0, 0], sizes = [2, 32], strides = [1, 1]} : vector<2x96xf32> to vector<2x32xf32>
    %503 = vector.extract_strided_slice %499 {offsets = [0, 32], sizes = [2, 32], strides = [1, 1]} : vector<2x96xf32> to vector<2x32xf32>
    %504 = vector.extract_strided_slice %499 {offsets = [0, 64], sizes = [2, 32], strides = [1, 1]} : vector<2x96xf32> to vector<2x32xf32>
    %505 = arith.mulf %503, %482 : vector<2x32xf32>
    %506 = arith.mulf %502, %501 : vector<2x32xf32>
    %507 = arith.addf %505, %506 : vector<2x32xf32>
    %508 = math.tanh %507 : vector<2x32xf32>
    %509 = arith.mulf %504, %508 : vector<2x32xf32>
    %510 = arith.index_cast %487 : i32 to index
    %c0_162 = arith.constant 0 : index
    %511 = vector.load %arg4[%510, %c0_162] : memref<16x128xf32, #tpu.memory_space<vmem>>, vector<2x32xf32>
    tpu.vector_store %arg4[%510, %c0_162], %509 {strides = array<i32>} : memref<16x128xf32, #tpu.memory_space<vmem>>, vector<2x32xf32>,
    %c8_i32_163 = arith.constant 8 : i32
    %c112 = arith.constant 112 : index
    %c0_164 = arith.constant 0 : index
    %512 = vector.load %arg1[%c112, %c0_164] : memref<384x128xf32, #tpu.memory_space<vmem>>, vector<32x128xf32>
    %c144 = arith.constant 144 : index
    %c0_165 = arith.constant 0 : index
    %513 = vector.load %arg1[%c144, %c0_165] : memref<384x128xf32, #tpu.memory_space<vmem>>, vector<32x128xf32>
    %c208 = arith.constant 208 : index
    %c0_166 = arith.constant 0 : index
    %514 = vector.load %arg1[%c208, %c0_166] : memref<384x128xf32, #tpu.memory_space<vmem>>, vector<1x128xf32>
    %c0_167 = arith.constant 0 : index
    %c0_168 = arith.constant 0 : index
    %515 = vector.load %arg4[%c0_167, %c0_168] : memref<16x128xf32, #tpu.memory_space<vmem>>, vector<16x32xf32>
    %cst_169 = arith.constant dense<0.000000e+00> : vector<16x128xf32>
    %516 = tpu.matmul %515, %512, %cst_169 {dimension_numbers = #tpu.dot_dimension_numbers<[1], [0], [0], [1], [0, 0, 1, 1], [], []>} : vector<16x32xf32>, vector<32x128xf32>, vector<16x128xf32> -> vector<16x128xf32>
    %cst_170 = arith.constant dense<0.000000e+00> : vector<16x128xf32>
    %517 = tpu.matmul %515, %513, %cst_170 {dimension_numbers = #tpu.dot_dimension_numbers<[1], [0], [0], [1], [0, 0, 1, 1], [], []>} : vector<16x32xf32>, vector<32x128xf32>, vector<16x128xf32> -> vector<16x128xf32>
    %518 = vector.extract_strided_slice %516 {offsets = [0, 0], sizes = [2, 128], strides = [1, 1]} : vector<16x128xf32> to vector<2x128xf32>
    %519 = vector.extract_strided_slice %517 {offsets = [14, 0], sizes = [2, 128], strides = [1, 1]} : vector<16x128xf32> to vector<2x128xf32>
    %520 = arith.addf %518, %519 : vector<2x128xf32>
    %521 = vector.broadcast %514 : vector<1x128xf32> to vector<2x128xf32>
    %522 = arith.addf %520, %521 : vector<2x128xf32>
    %c0_171 = arith.constant 0 : index
    %c0_172 = arith.constant 0 : index
    %523 = vector.load %arg3[%c0_171, %c0_172] : memref<16x128xf32, #tpu.memory_space<vmem>>, vector<2x128xf32>
    tpu.vector_store %arg3[%c0_171, %c0_172], %522 {strides = array<i32>} : memref<16x128xf32, #tpu.memory_space<vmem>>, vector<2x128xf32>,
    %524 = vector.extract_strided_slice %516 {offsets = [2, 0], sizes = [2, 128], strides = [1, 1]} : vector<16x128xf32> to vector<2x128xf32>
    %525 = vector.extract_strided_slice %517 {offsets = [12, 0], sizes = [2, 128], strides = [1, 1]} : vector<16x128xf32> to vector<2x128xf32>
    %526 = arith.addf %524, %525 : vector<2x128xf32>
    %527 = vector.broadcast %514 : vector<1x128xf32> to vector<2x128xf32>
    %528 = arith.addf %526, %527 : vector<2x128xf32>
    %c2_173 = arith.constant 2 : index
    %c0_174 = arith.constant 0 : index
    %529 = vector.load %arg3[%c2_173, %c0_174] : memref<16x128xf32, #tpu.memory_space<vmem>>, vector<2x128xf32>
    tpu.vector_store %arg3[%c2_173, %c0_174], %528 {strides = array<i32>} : memref<16x128xf32, #tpu.memory_space<vmem>>, vector<2x128xf32>,
    %530 = vector.extract_strided_slice %516 {offsets = [4, 0], sizes = [2, 128], strides = [1, 1]} : vector<16x128xf32> to vector<2x128xf32>
    %531 = vector.extract_strided_slice %517 {offsets = [10, 0], sizes = [2, 128], strides = [1, 1]} : vector<16x128xf32> to vector<2x128xf32>
    %532 = arith.addf %530, %531 : vector<2x128xf32>
    %533 = vector.broadcast %514 : vector<1x128xf32> to vector<2x128xf32>
    %534 = arith.addf %532, %533 : vector<2x128xf32>
    %c4_175 = arith.constant 4 : index
    %c0_176 = arith.constant 0 : index
    %535 = vector.load %arg3[%c4_175, %c0_176] : memref<16x128xf32, #tpu.memory_space<vmem>>, vector<2x128xf32>
    tpu.vector_store %arg3[%c4_175, %c0_176], %534 {strides = array<i32>} : memref<16x128xf32, #tpu.memory_space<vmem>>, vector<2x128xf32>,
    %536 = vector.extract_strided_slice %516 {offsets = [6, 0], sizes = [2, 128], strides = [1, 1]} : vector<16x128xf32> to vector<2x128xf32>
    %537 = vector.extract_strided_slice %517 {offsets = [8, 0], sizes = [2, 128], strides = [1, 1]} : vector<16x128xf32> to vector<2x128xf32>
    %538 = arith.addf %536, %537 : vector<2x128xf32>
    %539 = vector.broadcast %514 : vector<1x128xf32> to vector<2x128xf32>
    %540 = arith.addf %538, %539 : vector<2x128xf32>
    %c6_177 = arith.constant 6 : index
    %c0_178 = arith.constant 0 : index
    %541 = vector.load %arg3[%c6_177, %c0_178] : memref<16x128xf32, #tpu.memory_space<vmem>>, vector<2x128xf32>
    tpu.vector_store %arg3[%c6_177, %c0_178], %540 {strides = array<i32>} : memref<16x128xf32, #tpu.memory_space<vmem>>, vector<2x128xf32>,
    %542 = vector.extract_strided_slice %516 {offsets = [8, 0], sizes = [2, 128], strides = [1, 1]} : vector<16x128xf32> to vector<2x128xf32>
    %543 = vector.extract_strided_slice %517 {offsets = [6, 0], sizes = [2, 128], strides = [1, 1]} : vector<16x128xf32> to vector<2x128xf32>
    %544 = arith.addf %542, %543 : vector<2x128xf32>
    %545 = vector.broadcast %514 : vector<1x128xf32> to vector<2x128xf32>
    %546 = arith.addf %544, %545 : vector<2x128xf32>
    %c8_179 = arith.constant 8 : index
    %c0_180 = arith.constant 0 : index
    %547 = vector.load %arg3[%c8_179, %c0_180] : memref<16x128xf32, #tpu.memory_space<vmem>>, vector<2x128xf32>
    tpu.vector_store %arg3[%c8_179, %c0_180], %546 {strides = array<i32>} : memref<16x128xf32, #tpu.memory_space<vmem>>, vector<2x128xf32>,
    %548 = vector.extract_strided_slice %516 {offsets = [10, 0], sizes = [2, 128], strides = [1, 1]} : vector<16x128xf32> to vector<2x128xf32>
    %549 = vector.extract_strided_slice %517 {offsets = [4, 0], sizes = [2, 128], strides = [1, 1]} : vector<16x128xf32> to vector<2x128xf32>
    %550 = arith.addf %548, %549 : vector<2x128xf32>
    %551 = vector.broadcast %514 : vector<1x128xf32> to vector<2x128xf32>
    %552 = arith.addf %550, %551 : vector<2x128xf32>
    %c10_181 = arith.constant 10 : index
    %c0_182 = arith.constant 0 : index
    %553 = vector.load %arg3[%c10_181, %c0_182] : memref<16x128xf32, #tpu.memory_space<vmem>>, vector<2x128xf32>
    tpu.vector_store %arg3[%c10_181, %c0_182], %552 {strides = array<i32>} : memref<16x128xf32, #tpu.memory_space<vmem>>, vector<2x128xf32>,
    %554 = vector.extract_strided_slice %516 {offsets = [12, 0], sizes = [2, 128], strides = [1, 1]} : vector<16x128xf32> to vector<2x128xf32>
    %555 = vector.extract_strided_slice %517 {offsets = [2, 0], sizes = [2, 128], strides = [1, 1]} : vector<16x128xf32> to vector<2x128xf32>
    %556 = arith.addf %554, %555 : vector<2x128xf32>
    %557 = vector.broadcast %514 : vector<1x128xf32> to vector<2x128xf32>
    %558 = arith.addf %556, %557 : vector<2x128xf32>
    %c12_183 = arith.constant 12 : index
    %c0_184 = arith.constant 0 : index
    %559 = vector.load %arg3[%c12_183, %c0_184] : memref<16x128xf32, #tpu.memory_space<vmem>>, vector<2x128xf32>
    tpu.vector_store %arg3[%c12_183, %c0_184], %558 {strides = array<i32>} : memref<16x128xf32, #tpu.memory_space<vmem>>, vector<2x128xf32>,
    %560 = vector.extract_strided_slice %516 {offsets = [14, 0], sizes = [2, 128], strides = [1, 1]} : vector<16x128xf32> to vector<2x128xf32>
    %561 = vector.extract_strided_slice %517 {offsets = [0, 0], sizes = [2, 128], strides = [1, 1]} : vector<16x128xf32> to vector<2x128xf32>
    %562 = arith.addf %560, %561 : vector<2x128xf32>
    %563 = vector.broadcast %514 : vector<1x128xf32> to vector<2x128xf32>
    %564 = arith.addf %562, %563 : vector<2x128xf32>
    %c14_185 = arith.constant 14 : index
    %c0_186 = arith.constant 0 : index
    %565 = vector.load %arg3[%c14_185, %c0_186] : memref<16x128xf32, #tpu.memory_space<vmem>>, vector<2x128xf32>
    tpu.vector_store %arg3[%c14_185, %c0_186], %564 {strides = array<i32>} : memref<16x128xf32, #tpu.memory_space<vmem>>, vector<2x128xf32>,
    %c176 = arith.constant 176 : index
    %c0_187 = arith.constant 0 : index
    %566 = vector.load %arg1[%c176, %c0_187] : memref<384x128xf32, #tpu.memory_space<vmem>>, vector<32x128xf32>
    %cst_188 = arith.constant 0.000000e+00 : f32
    %567 = vector.broadcast %cst_188 : f32 to vector<2x32xf32>
    %cst_189 = arith.constant 0x7F800000 : f32
    %568 = vector.broadcast %cst_189 : f32 to vector<2x32xf32>
    %cst_190 = arith.constant 0xFF800000 : f32
    %569 = vector.broadcast %cst_190 : f32 to vector<2x32xf32>
    %c0_i32_191 = arith.constant 0 : i32
    %c2_i32_192 = arith.constant 2 : i32
    %570 = arith.muli %c0_i32_191, %c2_i32_192 : i32
    %571 = arith.index_cast %570 : i32 to index
    %c0_193 = arith.constant 0 : index
    %572 = vector.load %arg3[%571, %c0_193] : memref<16x128xf32, #tpu.memory_space<vmem>>, vector<2x128xf32>
    %cst_194 = arith.constant dense<0.000000e+00> : vector<2x128xf32>
    %573 = tpu.matmul %567, %566, %cst_194 {dimension_numbers = #tpu.dot_dimension_numbers<[1], [0], [0], [1], [0, 0, 1, 1], [], []>} : vector<2x32xf32>, vector<32x128xf32>, vector<2x128xf32> -> vector<2x128xf32>
    %574 = arith.addf %572, %573 : vector<2x128xf32>
    %575 = vector.extract_strided_slice %574 {offsets = [0, 0], sizes = [2, 96], strides = [1, 1]} : vector<2x128xf32> to vector<2x96xf32>
    %cst_195 = arith.constant 5.000000e-01 : f32
    %576 = vector.broadcast %cst_195 : f32 to vector<2x96xf32>
    %577 = arith.mulf %576, %575 : vector<2x96xf32>
    %578 = math.tanh %577 : vector<2x96xf32>
    %cst_196 = arith.constant 5.000000e-01 : f32
    %579 = vector.broadcast %cst_196 : f32 to vector<2x96xf32>
    %580 = arith.mulf %579, %578 : vector<2x96xf32>
    %cst_197 = arith.constant 5.000000e-01 : f32
    %581 = vector.broadcast %cst_197 : f32 to vector<2x96xf32>
    %582 = arith.addf %580, %581 : vector<2x96xf32>
    %583 = vector.extract_strided_slice %574 {offsets = [0, 96], sizes = [2, 32], strides = [1, 1]} : vector<2x128xf32> to vector<2x32xf32>
    %584 = math.tanh %583 : vector<2x32xf32>
    %585 = vector.extract_strided_slice %582 {offsets = [0, 0], sizes = [2, 32], strides = [1, 1]} : vector<2x96xf32> to vector<2x32xf32>
    %586 = vector.extract_strided_slice %582 {offsets = [0, 32], sizes = [2, 32], strides = [1, 1]} : vector<2x96xf32> to vector<2x32xf32>
    %587 = vector.extract_strided_slice %582 {offsets = [0, 64], sizes = [2, 32], strides = [1, 1]} : vector<2x96xf32> to vector<2x32xf32>
    %588 = arith.mulf %586, %567 : vector<2x32xf32>
    %589 = arith.mulf %585, %584 : vector<2x32xf32>
    %590 = arith.addf %588, %589 : vector<2x32xf32>
    %591 = math.tanh %590 : vector<2x32xf32>
    %592 = arith.mulf %587, %591 : vector<2x32xf32>
    %593 = arith.minimumf %568, %592 : vector<2x32xf32>
    %594 = arith.maximumf %569, %592 : vector<2x32xf32>
    %595 = arith.addf %567, %592 : vector<2x32xf32>
    %c1_i32_198 = arith.constant 1 : i32
    %c2_i32_199 = arith.constant 2 : i32
    %596 = arith.muli %c1_i32_198, %c2_i32_199 : i32
    %597 = arith.index_cast %596 : i32 to index
    %c0_200 = arith.constant 0 : index
    %598 = vector.load %arg3[%597, %c0_200] : memref<16x128xf32, #tpu.memory_space<vmem>>, vector<2x128xf32>
    %cst_201 = arith.constant dense<0.000000e+00> : vector<2x128xf32>
    %599 = tpu.matmul %592, %566, %cst_201 {dimension_numbers = #tpu.dot_dimension_numbers<[1], [0], [0], [1], [0, 0, 1, 1], [], []>} : vector<2x32xf32>, vector<32x128xf32>, vector<2x128xf32> -> vector<2x128xf32>
    %600 = arith.addf %598, %599 : vector<2x128xf32>
    %601 = vector.extract_strided_slice %600 {offsets = [0, 0], sizes = [2, 96], strides = [1, 1]} : vector<2x128xf32> to vector<2x96xf32>
    %cst_202 = arith.constant 5.000000e-01 : f32
    %602 = vector.broadcast %cst_202 : f32 to vector<2x96xf32>
    %603 = arith.mulf %602, %601 : vector<2x96xf32>
    %604 = math.tanh %603 : vector<2x96xf32>
    %cst_203 = arith.constant 5.000000e-01 : f32
    %605 = vector.broadcast %cst_203 : f32 to vector<2x96xf32>
    %606 = arith.mulf %605, %604 : vector<2x96xf32>
    %cst_204 = arith.constant 5.000000e-01 : f32
    %607 = vector.broadcast %cst_204 : f32 to vector<2x96xf32>
    %608 = arith.addf %606, %607 : vector<2x96xf32>
    %609 = vector.extract_strided_slice %600 {offsets = [0, 96], sizes = [2, 32], strides = [1, 1]} : vector<2x128xf32> to vector<2x32xf32>
    %610 = math.tanh %609 : vector<2x32xf32>
    %611 = vector.extract_strided_slice %608 {offsets = [0, 0], sizes = [2, 32], strides = [1, 1]} : vector<2x96xf32> to vector<2x32xf32>
    %612 = vector.extract_strided_slice %608 {offsets = [0, 32], sizes = [2, 32], strides = [1, 1]} : vector<2x96xf32> to vector<2x32xf32>
    %613 = vector.extract_strided_slice %608 {offsets = [0, 64], sizes = [2, 32], strides = [1, 1]} : vector<2x96xf32> to vector<2x32xf32>
    %614 = arith.mulf %612, %590 : vector<2x32xf32>
    %615 = arith.mulf %611, %610 : vector<2x32xf32>
    %616 = arith.addf %614, %615 : vector<2x32xf32>
    %617 = math.tanh %616 : vector<2x32xf32>
    %618 = arith.mulf %613, %617 : vector<2x32xf32>
    %619 = arith.minimumf %593, %618 : vector<2x32xf32>
    %620 = arith.maximumf %594, %618 : vector<2x32xf32>
    %621 = arith.addf %595, %618 : vector<2x32xf32>
    %c2_i32_205 = arith.constant 2 : i32
    %c2_i32_206 = arith.constant 2 : i32
    %622 = arith.muli %c2_i32_205, %c2_i32_206 : i32
    %623 = arith.index_cast %622 : i32 to index
    %c0_207 = arith.constant 0 : index
    %624 = vector.load %arg3[%623, %c0_207] : memref<16x128xf32, #tpu.memory_space<vmem>>, vector<2x128xf32>
    %cst_208 = arith.constant dense<0.000000e+00> : vector<2x128xf32>
    %625 = tpu.matmul %618, %566, %cst_208 {dimension_numbers = #tpu.dot_dimension_numbers<[1], [0], [0], [1], [0, 0, 1, 1], [], []>} : vector<2x32xf32>, vector<32x128xf32>, vector<2x128xf32> -> vector<2x128xf32>
    %626 = arith.addf %624, %625 : vector<2x128xf32>
    %627 = vector.extract_strided_slice %626 {offsets = [0, 0], sizes = [2, 96], strides = [1, 1]} : vector<2x128xf32> to vector<2x96xf32>
    %cst_209 = arith.constant 5.000000e-01 : f32
    %628 = vector.broadcast %cst_209 : f32 to vector<2x96xf32>
    %629 = arith.mulf %628, %627 : vector<2x96xf32>
    %630 = math.tanh %629 : vector<2x96xf32>
    %cst_210 = arith.constant 5.000000e-01 : f32
    %631 = vector.broadcast %cst_210 : f32 to vector<2x96xf32>
    %632 = arith.mulf %631, %630 : vector<2x96xf32>
    %cst_211 = arith.constant 5.000000e-01 : f32
    %633 = vector.broadcast %cst_211 : f32 to vector<2x96xf32>
    %634 = arith.addf %632, %633 : vector<2x96xf32>
    %635 = vector.extract_strided_slice %626 {offsets = [0, 96], sizes = [2, 32], strides = [1, 1]} : vector<2x128xf32> to vector<2x32xf32>
    %636 = math.tanh %635 : vector<2x32xf32>
    %637 = vector.extract_strided_slice %634 {offsets = [0, 0], sizes = [2, 32], strides = [1, 1]} : vector<2x96xf32> to vector<2x32xf32>
    %638 = vector.extract_strided_slice %634 {offsets = [0, 32], sizes = [2, 32], strides = [1, 1]} : vector<2x96xf32> to vector<2x32xf32>
    %639 = vector.extract_strided_slice %634 {offsets = [0, 64], sizes = [2, 32], strides = [1, 1]} : vector<2x96xf32> to vector<2x32xf32>
    %640 = arith.mulf %638, %616 : vector<2x32xf32>
    %641 = arith.mulf %637, %636 : vector<2x32xf32>
    %642 = arith.addf %640, %641 : vector<2x32xf32>
    %643 = math.tanh %642 : vector<2x32xf32>
    %644 = arith.mulf %639, %643 : vector<2x32xf32>
    %645 = arith.minimumf %619, %644 : vector<2x32xf32>
    %646 = arith.maximumf %620, %644 : vector<2x32xf32>
    %647 = arith.addf %621, %644 : vector<2x32xf32>
    %c3_i32_212 = arith.constant 3 : i32
    %c2_i32_213 = arith.constant 2 : i32
    %648 = arith.muli %c3_i32_212, %c2_i32_213 : i32
    %649 = arith.index_cast %648 : i32 to index
    %c0_214 = arith.constant 0 : index
    %650 = vector.load %arg3[%649, %c0_214] : memref<16x128xf32, #tpu.memory_space<vmem>>, vector<2x128xf32>
    %cst_215 = arith.constant dense<0.000000e+00> : vector<2x128xf32>
    %651 = tpu.matmul %644, %566, %cst_215 {dimension_numbers = #tpu.dot_dimension_numbers<[1], [0], [0], [1], [0, 0, 1, 1], [], []>} : vector<2x32xf32>, vector<32x128xf32>, vector<2x128xf32> -> vector<2x128xf32>
    %652 = arith.addf %650, %651 : vector<2x128xf32>
    %653 = vector.extract_strided_slice %652 {offsets = [0, 0], sizes = [2, 96], strides = [1, 1]} : vector<2x128xf32> to vector<2x96xf32>
    %cst_216 = arith.constant 5.000000e-01 : f32
    %654 = vector.broadcast %cst_216 : f32 to vector<2x96xf32>
    %655 = arith.mulf %654, %653 : vector<2x96xf32>
    %656 = math.tanh %655 : vector<2x96xf32>
    %cst_217 = arith.constant 5.000000e-01 : f32
    %657 = vector.broadcast %cst_217 : f32 to vector<2x96xf32>
    %658 = arith.mulf %657, %656 : vector<2x96xf32>
    %cst_218 = arith.constant 5.000000e-01 : f32
    %659 = vector.broadcast %cst_218 : f32 to vector<2x96xf32>
    %660 = arith.addf %658, %659 : vector<2x96xf32>
    %661 = vector.extract_strided_slice %652 {offsets = [0, 96], sizes = [2, 32], strides = [1, 1]} : vector<2x128xf32> to vector<2x32xf32>
    %662 = math.tanh %661 : vector<2x32xf32>
    %663 = vector.extract_strided_slice %660 {offsets = [0, 0], sizes = [2, 32], strides = [1, 1]} : vector<2x96xf32> to vector<2x32xf32>
    %664 = vector.extract_strided_slice %660 {offsets = [0, 32], sizes = [2, 32], strides = [1, 1]} : vector<2x96xf32> to vector<2x32xf32>
    %665 = vector.extract_strided_slice %660 {offsets = [0, 64], sizes = [2, 32], strides = [1, 1]} : vector<2x96xf32> to vector<2x32xf32>
    %666 = arith.mulf %664, %642 : vector<2x32xf32>
    %667 = arith.mulf %663, %662 : vector<2x32xf32>
    %668 = arith.addf %666, %667 : vector<2x32xf32>
    %669 = math.tanh %668 : vector<2x32xf32>
    %670 = arith.mulf %665, %669 : vector<2x32xf32>
    %671 = arith.minimumf %645, %670 : vector<2x32xf32>
    %672 = arith.maximumf %646, %670 : vector<2x32xf32>
    %673 = arith.addf %647, %670 : vector<2x32xf32>
    %c4_i32_219 = arith.constant 4 : i32
    %c2_i32_220 = arith.constant 2 : i32
    %674 = arith.muli %c4_i32_219, %c2_i32_220 : i32
    %675 = arith.index_cast %674 : i32 to index
    %c0_221 = arith.constant 0 : index
    %676 = vector.load %arg3[%675, %c0_221] : memref<16x128xf32, #tpu.memory_space<vmem>>, vector<2x128xf32>
    %cst_222 = arith.constant dense<0.000000e+00> : vector<2x128xf32>
    %677 = tpu.matmul %670, %566, %cst_222 {dimension_numbers = #tpu.dot_dimension_numbers<[1], [0], [0], [1], [0, 0, 1, 1], [], []>} : vector<2x32xf32>, vector<32x128xf32>, vector<2x128xf32> -> vector<2x128xf32>
    %678 = arith.addf %676, %677 : vector<2x128xf32>
    %679 = vector.extract_strided_slice %678 {offsets = [0, 0], sizes = [2, 96], strides = [1, 1]} : vector<2x128xf32> to vector<2x96xf32>
    %cst_223 = arith.constant 5.000000e-01 : f32
    %680 = vector.broadcast %cst_223 : f32 to vector<2x96xf32>
    %681 = arith.mulf %680, %679 : vector<2x96xf32>
    %682 = math.tanh %681 : vector<2x96xf32>
    %cst_224 = arith.constant 5.000000e-01 : f32
    %683 = vector.broadcast %cst_224 : f32 to vector<2x96xf32>
    %684 = arith.mulf %683, %682 : vector<2x96xf32>
    %cst_225 = arith.constant 5.000000e-01 : f32
    %685 = vector.broadcast %cst_225 : f32 to vector<2x96xf32>
    %686 = arith.addf %684, %685 : vector<2x96xf32>
    %687 = vector.extract_strided_slice %678 {offsets = [0, 96], sizes = [2, 32], strides = [1, 1]} : vector<2x128xf32> to vector<2x32xf32>
    %688 = math.tanh %687 : vector<2x32xf32>
    %689 = vector.extract_strided_slice %686 {offsets = [0, 0], sizes = [2, 32], strides = [1, 1]} : vector<2x96xf32> to vector<2x32xf32>
    %690 = vector.extract_strided_slice %686 {offsets = [0, 32], sizes = [2, 32], strides = [1, 1]} : vector<2x96xf32> to vector<2x32xf32>
    %691 = vector.extract_strided_slice %686 {offsets = [0, 64], sizes = [2, 32], strides = [1, 1]} : vector<2x96xf32> to vector<2x32xf32>
    %692 = arith.mulf %690, %668 : vector<2x32xf32>
    %693 = arith.mulf %689, %688 : vector<2x32xf32>
    %694 = arith.addf %692, %693 : vector<2x32xf32>
    %695 = math.tanh %694 : vector<2x32xf32>
    %696 = arith.mulf %691, %695 : vector<2x32xf32>
    %697 = arith.minimumf %671, %696 : vector<2x32xf32>
    %698 = arith.maximumf %672, %696 : vector<2x32xf32>
    %699 = arith.addf %673, %696 : vector<2x32xf32>
    %c5_i32_226 = arith.constant 5 : i32
    %c2_i32_227 = arith.constant 2 : i32
    %700 = arith.muli %c5_i32_226, %c2_i32_227 : i32
    %701 = arith.index_cast %700 : i32 to index
    %c0_228 = arith.constant 0 : index
    %702 = vector.load %arg3[%701, %c0_228] : memref<16x128xf32, #tpu.memory_space<vmem>>, vector<2x128xf32>
    %cst_229 = arith.constant dense<0.000000e+00> : vector<2x128xf32>
    %703 = tpu.matmul %696, %566, %cst_229 {dimension_numbers = #tpu.dot_dimension_numbers<[1], [0], [0], [1], [0, 0, 1, 1], [], []>} : vector<2x32xf32>, vector<32x128xf32>, vector<2x128xf32> -> vector<2x128xf32>
    %704 = arith.addf %702, %703 : vector<2x128xf32>
    %705 = vector.extract_strided_slice %704 {offsets = [0, 0], sizes = [2, 96], strides = [1, 1]} : vector<2x128xf32> to vector<2x96xf32>
    %cst_230 = arith.constant 5.000000e-01 : f32
    %706 = vector.broadcast %cst_230 : f32 to vector<2x96xf32>
    %707 = arith.mulf %706, %705 : vector<2x96xf32>
    %708 = math.tanh %707 : vector<2x96xf32>
    %cst_231 = arith.constant 5.000000e-01 : f32
    %709 = vector.broadcast %cst_231 : f32 to vector<2x96xf32>
    %710 = arith.mulf %709, %708 : vector<2x96xf32>
    %cst_232 = arith.constant 5.000000e-01 : f32
    %711 = vector.broadcast %cst_232 : f32 to vector<2x96xf32>
    %712 = arith.addf %710, %711 : vector<2x96xf32>
    %713 = vector.extract_strided_slice %704 {offsets = [0, 96], sizes = [2, 32], strides = [1, 1]} : vector<2x128xf32> to vector<2x32xf32>
    %714 = math.tanh %713 : vector<2x32xf32>
    %715 = vector.extract_strided_slice %712 {offsets = [0, 0], sizes = [2, 32], strides = [1, 1]} : vector<2x96xf32> to vector<2x32xf32>
    %716 = vector.extract_strided_slice %712 {offsets = [0, 32], sizes = [2, 32], strides = [1, 1]} : vector<2x96xf32> to vector<2x32xf32>
    %717 = vector.extract_strided_slice %712 {offsets = [0, 64], sizes = [2, 32], strides = [1, 1]} : vector<2x96xf32> to vector<2x32xf32>
    %718 = arith.mulf %716, %694 : vector<2x32xf32>
    %719 = arith.mulf %715, %714 : vector<2x32xf32>
    %720 = arith.addf %718, %719 : vector<2x32xf32>
    %721 = math.tanh %720 : vector<2x32xf32>
    %722 = arith.mulf %717, %721 : vector<2x32xf32>
    %723 = arith.minimumf %697, %722 : vector<2x32xf32>
    %724 = arith.maximumf %698, %722 : vector<2x32xf32>
    %725 = arith.addf %699, %722 : vector<2x32xf32>
    %c6_i32_233 = arith.constant 6 : i32
    %c2_i32_234 = arith.constant 2 : i32
    %726 = arith.muli %c6_i32_233, %c2_i32_234 : i32
    %727 = arith.index_cast %726 : i32 to index
    %c0_235 = arith.constant 0 : index
    %728 = vector.load %arg3[%727, %c0_235] : memref<16x128xf32, #tpu.memory_space<vmem>>, vector<2x128xf32>
    %cst_236 = arith.constant dense<0.000000e+00> : vector<2x128xf32>
    %729 = tpu.matmul %722, %566, %cst_236 {dimension_numbers = #tpu.dot_dimension_numbers<[1], [0], [0], [1], [0, 0, 1, 1], [], []>} : vector<2x32xf32>, vector<32x128xf32>, vector<2x128xf32> -> vector<2x128xf32>
    %730 = arith.addf %728, %729 : vector<2x128xf32>
    %731 = vector.extract_strided_slice %730 {offsets = [0, 0], sizes = [2, 96], strides = [1, 1]} : vector<2x128xf32> to vector<2x96xf32>
    %cst_237 = arith.constant 5.000000e-01 : f32
    %732 = vector.broadcast %cst_237 : f32 to vector<2x96xf32>
    %733 = arith.mulf %732, %731 : vector<2x96xf32>
    %734 = math.tanh %733 : vector<2x96xf32>
    %cst_238 = arith.constant 5.000000e-01 : f32
    %735 = vector.broadcast %cst_238 : f32 to vector<2x96xf32>
    %736 = arith.mulf %735, %734 : vector<2x96xf32>
    %cst_239 = arith.constant 5.000000e-01 : f32
    %737 = vector.broadcast %cst_239 : f32 to vector<2x96xf32>
    %738 = arith.addf %736, %737 : vector<2x96xf32>
    %739 = vector.extract_strided_slice %730 {offsets = [0, 96], sizes = [2, 32], strides = [1, 1]} : vector<2x128xf32> to vector<2x32xf32>
    %740 = math.tanh %739 : vector<2x32xf32>
    %741 = vector.extract_strided_slice %738 {offsets = [0, 0], sizes = [2, 32], strides = [1, 1]} : vector<2x96xf32> to vector<2x32xf32>
    %742 = vector.extract_strided_slice %738 {offsets = [0, 32], sizes = [2, 32], strides = [1, 1]} : vector<2x96xf32> to vector<2x32xf32>
    %743 = vector.extract_strided_slice %738 {offsets = [0, 64], sizes = [2, 32], strides = [1, 1]} : vector<2x96xf32> to vector<2x32xf32>
    %744 = arith.mulf %742, %720 : vector<2x32xf32>
    %745 = arith.mulf %741, %740 : vector<2x32xf32>
    %746 = arith.addf %744, %745 : vector<2x32xf32>
    %747 = math.tanh %746 : vector<2x32xf32>
    %748 = arith.mulf %743, %747 : vector<2x32xf32>
    %749 = arith.minimumf %723, %748 : vector<2x32xf32>
    %750 = arith.maximumf %724, %748 : vector<2x32xf32>
    %751 = arith.addf %725, %748 : vector<2x32xf32>
    %c7_i32_240 = arith.constant 7 : i32
    %c2_i32_241 = arith.constant 2 : i32
    %752 = arith.muli %c7_i32_240, %c2_i32_241 : i32
    %753 = arith.index_cast %752 : i32 to index
    %c0_242 = arith.constant 0 : index
    %754 = vector.load %arg3[%753, %c0_242] : memref<16x128xf32, #tpu.memory_space<vmem>>, vector<2x128xf32>
    %cst_243 = arith.constant dense<0.000000e+00> : vector<2x128xf32>
    %755 = tpu.matmul %748, %566, %cst_243 {dimension_numbers = #tpu.dot_dimension_numbers<[1], [0], [0], [1], [0, 0, 1, 1], [], []>} : vector<2x32xf32>, vector<32x128xf32>, vector<2x128xf32> -> vector<2x128xf32>
    %756 = arith.addf %754, %755 : vector<2x128xf32>
    %757 = vector.extract_strided_slice %756 {offsets = [0, 0], sizes = [2, 96], strides = [1, 1]} : vector<2x128xf32> to vector<2x96xf32>
    %cst_244 = arith.constant 5.000000e-01 : f32
    %758 = vector.broadcast %cst_244 : f32 to vector<2x96xf32>
    %759 = arith.mulf %758, %757 : vector<2x96xf32>
    %760 = math.tanh %759 : vector<2x96xf32>
    %cst_245 = arith.constant 5.000000e-01 : f32
    %761 = vector.broadcast %cst_245 : f32 to vector<2x96xf32>
    %762 = arith.mulf %761, %760 : vector<2x96xf32>
    %cst_246 = arith.constant 5.000000e-01 : f32
    %763 = vector.broadcast %cst_246 : f32 to vector<2x96xf32>
    %764 = arith.addf %762, %763 : vector<2x96xf32>
    %765 = vector.extract_strided_slice %756 {offsets = [0, 96], sizes = [2, 32], strides = [1, 1]} : vector<2x128xf32> to vector<2x32xf32>
    %766 = math.tanh %765 : vector<2x32xf32>
    %767 = vector.extract_strided_slice %764 {offsets = [0, 0], sizes = [2, 32], strides = [1, 1]} : vector<2x96xf32> to vector<2x32xf32>
    %768 = vector.extract_strided_slice %764 {offsets = [0, 32], sizes = [2, 32], strides = [1, 1]} : vector<2x96xf32> to vector<2x32xf32>
    %769 = vector.extract_strided_slice %764 {offsets = [0, 64], sizes = [2, 32], strides = [1, 1]} : vector<2x96xf32> to vector<2x32xf32>
    %770 = arith.mulf %768, %746 : vector<2x32xf32>
    %771 = arith.mulf %767, %766 : vector<2x32xf32>
    %772 = arith.addf %770, %771 : vector<2x32xf32>
    %773 = math.tanh %772 : vector<2x32xf32>
    %774 = arith.mulf %769, %773 : vector<2x32xf32>
    %775 = arith.minimumf %749, %774 : vector<2x32xf32>
    %776 = arith.maximumf %750, %774 : vector<2x32xf32>
    %777 = arith.addf %751, %774 : vector<2x32xf32>
    %c8_i32_247 = arith.constant 8 : i32
    %cst_248 = arith.constant 1.250000e-01 : f32
    %778 = vector.broadcast %cst_248 : f32 to vector<2x32xf32>
    %779 = arith.mulf %777, %778 : vector<2x32xf32>
    %c216 = arith.constant 216 : index
    %c0_249 = arith.constant 0 : index
    %780 = vector.load %arg1[%c216, %c0_249] : memref<384x128xf32, #tpu.memory_space<vmem>>, vector<32x32xf32>
    %cst_250 = arith.constant dense<0.000000e+00> : vector<2x32xf32>
    %781 = tpu.matmul %775, %780, %cst_250 {dimension_numbers = #tpu.dot_dimension_numbers<[1], [0], [0], [1], [0, 0, 1, 1], [], []>} : vector<2x32xf32>, vector<32x32xf32>, vector<2x32xf32> -> vector<2x32xf32>
    %c248 = arith.constant 248 : index
    %c0_251 = arith.constant 0 : index
    %782 = vector.load %arg1[%c248, %c0_251] : memref<384x128xf32, #tpu.memory_space<vmem>>, vector<32x32xf32>
    %cst_252 = arith.constant dense<0.000000e+00> : vector<2x32xf32>
    %783 = tpu.matmul %779, %782, %cst_252 {dimension_numbers = #tpu.dot_dimension_numbers<[1], [0], [0], [1], [0, 0, 1, 1], [], []>} : vector<2x32xf32>, vector<32x32xf32>, vector<2x32xf32> -> vector<2x32xf32>
    %784 = arith.addf %781, %783 : vector<2x32xf32>
    %c280 = arith.constant 280 : index
    %c0_253 = arith.constant 0 : index
    %785 = vector.load %arg1[%c280, %c0_253] : memref<384x128xf32, #tpu.memory_space<vmem>>, vector<32x32xf32>
    %cst_254 = arith.constant dense<0.000000e+00> : vector<2x32xf32>
    %786 = tpu.matmul %776, %785, %cst_254 {dimension_numbers = #tpu.dot_dimension_numbers<[1], [0], [0], [1], [0, 0, 1, 1], [], []>} : vector<2x32xf32>, vector<32x32xf32>, vector<2x32xf32> -> vector<2x32xf32>
    %787 = arith.addf %784, %786 : vector<2x32xf32>
    %c312 = arith.constant 312 : index
    %c0_255 = arith.constant 0 : index
    %788 = vector.load %arg1[%c312, %c0_255] : memref<384x128xf32, #tpu.memory_space<vmem>>, vector<1x32xf32>
    %789 = vector.broadcast %788 : vector<1x32xf32> to vector<2x32xf32>
    %790 = arith.addf %787, %789 : vector<2x32xf32>
    %791 = math.tanh %790 : vector<2x32xf32>
    %c320 = arith.constant 320 : index
    %c0_256 = arith.constant 0 : index
    %792 = vector.load %arg1[%c320, %c0_256] : memref<384x128xf32, #tpu.memory_space<vmem>>, vector<32x16xf32>
    %cst_257 = arith.constant dense<0.000000e+00> : vector<2x16xf32>
    %793 = tpu.matmul %791, %792, %cst_257 {dimension_numbers = #tpu.dot_dimension_numbers<[1], [0], [0], [1], [0, 0, 1, 1], [], []>} : vector<2x32xf32>, vector<32x16xf32>, vector<2x16xf32> -> vector<2x16xf32>
    %c352 = arith.constant 352 : index
    %c0_258 = arith.constant 0 : index
    %794 = vector.load %arg1[%c352, %c0_258] : memref<384x128xf32, #tpu.memory_space<vmem>>, vector<1x16xf32>
    %795 = vector.broadcast %794 : vector<1x16xf32> to vector<2x16xf32>
    %796 = arith.addf %793, %795 : vector<2x16xf32>
    %797 = math.tanh %796 : vector<2x16xf32>
    %c360 = arith.constant 360 : index
    %c0_259 = arith.constant 0 : index
    %798 = vector.load %arg1[%c360, %c0_259] : memref<384x128xf32, #tpu.memory_space<vmem>>, vector<16x5xf32>
    %cst_260 = arith.constant dense<0.000000e+00> : vector<2x5xf32>
    %799 = tpu.matmul %797, %798, %cst_260 {dimension_numbers = #tpu.dot_dimension_numbers<[1], [0], [0], [1], [0, 0, 1, 1], [], []>} : vector<2x16xf32>, vector<16x5xf32>, vector<2x5xf32> -> vector<2x5xf32>
    %c376 = arith.constant 376 : index
    %c0_261 = arith.constant 0 : index
    %800 = vector.load %arg1[%c376, %c0_261] : memref<384x128xf32, #tpu.memory_space<vmem>>, vector<1x5xf32>
    %801 = vector.broadcast %800 : vector<1x5xf32> to vector<2x5xf32>
    %802 = arith.addf %799, %801 : vector<2x5xf32>
    %cst_262 = arith.constant 5.000000e-01 : f32
    %803 = vector.broadcast %cst_262 : f32 to vector<2x5xf32>
    %804 = arith.mulf %803, %802 : vector<2x5xf32>
    %805 = math.tanh %804 : vector<2x5xf32>
    %cst_263 = arith.constant 5.000000e-01 : f32
    %806 = vector.broadcast %cst_263 : f32 to vector<2x5xf32>
    %807 = arith.mulf %806, %805 : vector<2x5xf32>
    %cst_264 = arith.constant 5.000000e-01 : f32
    %808 = vector.broadcast %cst_264 : f32 to vector<2x5xf32>
    %809 = arith.addf %807, %808 : vector<2x5xf32>
    %c0_265 = arith.constant 0 : index
    %c0_266 = arith.constant 0 : index
    %810 = vector.load %arg2[%c0_265, %c0_266] : memref<2x5xf32, #tpu.memory_space<vmem>>, vector<2x5xf32>
    tpu.vector_store %arg2[%c0_265, %c0_266], %809 {strides = array<i32>} : memref<2x5xf32, #tpu.memory_space<vmem>>, vector<2x5xf32>,
    return
  }
}

</mosaic_0001>

<bundles_post_ra>
// kernel: classifier_forward.1
= control target key start
LH: loop header
LB: loop body
LE: loop exit
PB: predicated region body
PF: predicated region fallthrough
CT: control target
= control target key end

     0   :  { %7 = vsyncpa [#allocation5], 0  ;;  %s4789_s0 = inlined_call_operand.vmem [shape: f32[16,3], index: 0, kind: input, shape index: {}]   ;;  %s4790_s1 = inlined_call_operand.hbm [shape: f32[384,128], index: 1, kind: input, shape index: {}]   ;;  %s4791_s2 = inlined_call_operand.hbm [shape: f32[2,5], index: 2, kind: output, shape index: {}]  }
   0x1   :  { %8 = vsyncpa [#allocation6], 0  ;;  %s4398_s9 = smov [#allocation4]   ;;  %s4350_s13 = scalar_lea.hbm %s4790_s1, 6144 }
   0x2   :  { %s16_s10 = sshll.u32 %s4398_s9, 4  ;;  %p4351_p0 = scmp.ne.s32.totalorder %s4790_s1, %s4350_s13  ;;  %s17_s10 = int_to_ptr.vmem [resolvable:$true] %s16_s10 }
   0x3   :  { %p4354_p1 = scmp.lt.u32.totalorder %s4350_s13, %s4790_s1 }
   0x5   :  { %p4356_p2 = pnand %p4354_p1, %p4351_p0 }
   0x7   :  { %4359 = shalt.err (!%p4356_p2)
}
   0x8   :  { %s4360_s18 = scalar_lea.vmem %s17_s10, 6144  ;;  %p4365_p4 = scmp.lt.s32.totalorder %s17_s10, %s17_s10 }
   0x9   :  { %p4361_p3 = scmp.ne.s32.totalorder %s17_s10, %s4360_s18  ;;  %p4366_p5 = scmp.lt.s32.totalorder %s4360_s18, %s4360_s18 }
   0xb   :  { %p4367_p6 = por %p4366_p5, %p4365_p4 }
   0xd   :  { %p4368_p7 = pnand %p4367_p6, %p4361_p3 }
   0xf   :  { %4371 = shalt.err (!%p4368_p7)
}
  0x10   :  { %s4399_s19 = smov 128   ;;  %s4400_s20 = smov 8  }
  0x11   :  { %22 = dma.hbm_to_vmem [thread:$0]  %s4790_s1, 6144, %s17_s10, [#allocation5], %s4399_s19, %s4399_s19, %s4400_s20  }
  0x12   :  { %4394 = dma.done.wait [#allocation5], 6144  }
  0x13   :  { %4395 = vsyncadd [#allocation5], 4294961152  ;;  %vm38_vm0 = vcmask 1042432   ;;  %vm31_vm1 = vcmask 23552   ;;  %v26_v0 = vld [vmem:[#allocation4] sm:$0x7] }
  0x14   :  { %v27_v1 = vld [vmem:[#allocation4 + $0x8] sm:$0x7]  ;;  %v29_v2 = vld [vmem:[%s4789_s0] sm:$0xff]  ;;  %3688 = vmatprep.subr.msk.mxu0 %vm38_vm0, %v26_v0  ;;  %v229_v4 = vld [vmem:[#allocation4 + $0x10] sm:$0xff]  ;;  %v4401_v7 = vmov 0.0|0.0   ;;  %vm4402_vm2 = vmmov 0  }
  0x15   :  { %3693 = vmatprep.subr.msk.mxu1 %vm38_vm0, %v27_v1  ;;  %v30_v3 = vld [vmem:[%s4789_s0 + $0x8] sm:$0xff]  ;;  %v230_v5 = vld [vmem:[#allocation4 + $0x18] sm:$0xff]  ;;  %3689 = vmatpush3.msk.msra.mxu0 %vm38_vm0, %v26_v0  ;;  %v4403_v8 = vmov 0.0   ;;  %v3495_v15 = vld [vmem:[#allocation4 + $0x20] ss:$0 sm:$0xff]  ;;  %vm204_vm3 = vcmask 517120  }
  0x16   :  { %3690 = vmatprep.mubr.msk.f32.mxu0 %vm31_vm1, %v29_v2  ;;  %v4443_v6 = vpack.c.bf16 %v230_v5, %v229_v4  ;;  %3694 = vmatpush3.msk.msra.mxu1 %vm38_vm0, %v27_v1  ;;  %vm210_vm4 = vcmask 519170   ;;  %vm212_vm5 = vcmask 521220   ;;  %vm214_vm6 = vcmask 523270   ;;  %s4404_s0 = smov 80   ;;  %s4405_s1 = smov 16  }
  0x17   :  { %3695 = vmatprep.mubr.msk.f32.mxu1 %vm31_vm1, %v29_v2  ;;  %3691 = vmatmul.mubr.msk.f32.vlgmr.msra.gmra.mrb[0].mxu0 %vm31_vm1, %v30_v3  ;;  %s4406_s27 = smov 96   ;;  %vm333_vm7 = vcmask 123904   ;;  %vm232_vm8 = vcmask 130048   ;;  %s4407_s28 = smov 32   ;;  %vm1340_vm9 = vcmask 254976   ;;  %vm1240_vm10 = vcmask 261120  }
  0x18   :  { %3696 = vmatmul.mubr.msk.f32.vlgmr.msra.gmra.mrb[0].mxu1 %vm31_vm1, %v30_v3  ;;  %4017 = vmatprep.subr.bf16.mxu0 %v4401_v7  ;;  %s4408_s29 = smov 64   ;;  %s4409_s30 = smov [#allocation7]   ;;  %vm3472_vm11 = vcmask 33792  }
  0x19   :  { %3702 = vmatprep.mubr.msk.f32.mxu0 %vm4402_vm2, %v4403_v8  ;;  %4019 = vmatpush3.bf16.msra.mxu0 %v4443_v6  ;;  %s3480_s3 = sshll.u32 %s4409_s30, 4  ;;  %s3481_s3 = int_to_ptr.vmem [resolvable:$true] %s3480_s3 }
  0x1a   :  { %4020 = vmatprep.subr.bf16.mxu1 %v4401_v7  ;;  %3709 = vmatprep.mubr.msk.f32.mxu1 %vm4402_vm2, %v4403_v8  ;;  %s4372_s4 = scalar_lea.vmem %s3481_s3, 32  ;;  %p4377_p9 = scmp.lt.s32.totalorder %s3481_s3, %s3481_s3 }
  0x1b   :  { %4022 = vmatpush3.bf16.msra.mxu1 %v4443_v6  ;;  %4023 = vmatprep.subr.bf16.mxu0 %v4401_v7  ;;  %p4373_p8 = scmp.ne.s32.totalorder %s3481_s3, %s4372_s4  ;;  %p4378_p10 = scmp.lt.s32.totalorder %s4372_s4, %s4372_s4 }
  0x1c   :  { %4026 = vmatprep.subr.bf16.mxu1 %v4401_v7  ;;  %3703 = vmatmul.mubr.f32.vlgmr.msra.gmra.mrb[2].mxu0 %v4403_v8 }
  0x1d   :  { %4025 = vmatpush3.bf16.msra.mxu0 %v4443_v6  ;;  %3716 = vmatprep.mubr.msk.f32.mxu0 %vm4402_vm2, %v4403_v8  ;;  %p4379_p11 = por %p4378_p10, %p4377_p9 }
  0x1e   :  { %4029 = vmatprep.subr.bf16.mxu0 %v4401_v7 }
  0x1f   :  { %p4380_p12 = pnand %p4379_p11, %p4373_p8 }
  0xea   :  { %v3692_v9 = vpop.f32.mrb[0].mxu0 }
  0xeb   :  { %v3697_v10 = vpop.f32.mrb[0].mxu1  ;;  %v108_v13 = vpop.f32.mrb[1].mxu0 }
  0xec   :  { %v196_v11 = vrot.slane %v3697_v10, 6  ;;  %v206_v12 = vrot.slane %v3697_v10, 2  ;;  %v186_v14 = vpop.f32.mrb[1].mxu1 }
  0xed   :  { %v217_v16 = vrot.slane %v186_v14, 6  ;;  %v222_v17 = vrot.slane %v186_v14, 2 }
  0xee   :  { %v198_v18 = vadd.f32 %v196_v11, %v108_v13  ;;  %v208_v19 = vadd.f32 %v206_v12, %v108_v13 }
  0xef   :  { %v219_v20 = vadd.f32 %v3692_v9, %v217_v16  ;;  %v224_v21 = vadd.f32 %v3692_v9, %v222_v17  ;;  %v302_v24 = vpop.f32.mrb[2].mxu0 }
  0xf0   :  { %v203_v22 = vadd.f32 %v3495_v15, %v198_v18  ;;  %v209_v23 = vadd.f32 %v3495_v15, %v208_v19  ;;  %v3704_v27 = vpop.f32.mrb[3].mxu0 }
  0xf1   :  { %v220_v25 = vadd.f32 %v3495_v15, %v219_v20  ;;  %v225_v26 = vadd.f32 %v3495_v15, %v224_v21 }
  0xf2   :  { %205 = vst.msk [vmem:[#allocation2] sm:$0x3] %vm204_vm3, %v203_v22 }
  0xf3   :  { %211 = vst.msk [vmem:[#allocation2] sm:$0xc] %vm210_vm4, %v209_v23  ;;  %226 = vst.msk [vmem:[#allocation2 + $0x8] sm:$0xc] %vm210_vm4, %v225_v26 }
  0xf4   :  { %213 = vst.msk [vmem:[#allocation2] sm:$0x30] %vm212_vm5, %v203_v22  ;;  %227 = vst.msk [vmem:[#allocation2 + $0x8] sm:$0x30] %vm212_vm5, %v220_v25 }
  0xf5   :  { %215 = vst.msk [vmem:[#allocation2] sm:$0xc0] %vm214_vm6, %v209_v23  ;;  %228 = vst.msk [vmem:[#allocation2 + $0x8] sm:$0xc0] %vm214_vm6, %v225_v26 }
  0xf6   :  { %221 = vst.msk [vmem:[#allocation2 + $0x8] sm:$0x3] %vm204_vm3, %v220_v25 }
  0xf9   :  { %v231_v28 = vld [vmem:[#allocation2] sm:$0x3] }
  0xfa   :  { %v306_v29 = vadd.f32 %v302_v24, %v231_v28  ;;  %v335_v44 = vld [vmem:[#allocation2 + $0x2] sm:$0x3] }
  0xfb   :  { %v436_v62 = vld [vmem:[#allocation2 + $0x4] sm:$0x3] }
  0xfc   :  { %4200 = vtanh.f32 %v306_v29  ;;  %v307_v31 = vmul.f32 0.5, %v306_v29  ;;  %v537_v19 = vld [vmem:[#allocation2 + $0x6] sm:$0x3] }
  0xfe   :  { %4202 = vtanh.f32 %v307_v31 }
 0x106   :  { %v4201_v30 = vpop.eup %4200 }
 0x107   :  { %314 = vrot.lane.b32.xlu0 %v4201_v30, %s4404_s0 }
 0x108   :  { %v4203_v32 = vpop.eup %4202 }
 0x109   :  { %v309_v33 = vmul.f32 0.5, %v4203_v32 }
 0x10b   :  { %v310_v34 = vadd.f32 0.5, %v309_v33 }
 0x10d   :  { %v312_v37 = vmul.f32 0.0, %v310_v34 }
 0x179   :  { %v315_v35 = vpop.permute.xlu0 %314 }
 0x17a   :  { %v317_v36 = vmul.f32 %v315_v35, %v310_v34 }
 0x17c   :  { %319 = vrot.lane.b32.xlu0 %v317_v36, %s4405_s1 }
 0x1ee   :  { %v320_v38 = vpop.permute.xlu0 %319 }
 0x1ef   :  { %v322_v39 = vadd.f32 %v320_v38, %v312_v37  ;;  %v638_v37 = vld [vmem:[#allocation2 + $0x8] sm:$0x3] }
 0x1f1   :  { %4204 = vtanh.f32 %v322_v39 }
 0x1fb   :  { %v4205_v40 = vpop.eup %4204 }
 0x1fc   :  { %325 = vrot.lane.b32.xlu1 %v4205_v40, %s4405_s1 }
 0x26e   :  { %v326_v41 = vpop.permute.xlu1 %325 }
 0x26f   :  { %v328_v42 = vmul.f32 %v326_v41, %v310_v34 }
 0x271   :  { %330 = vrot.lane.b32.xlu1 %v328_v42, %s4406_s27 }
 0x2e3   :  { %v331_v43 = vpop.permute.xlu1 %330 }
 0x2e4   :  { %334 = vst.msk [vmem:[#allocation3] sm:$0x3] %vm333_vm7, %v331_v43  ;;  %3710 = vmatmul.mubr.msk.f32.vlgmr.msra.gmra.mrb[2].mxu1 %vm232_vm8, %v331_v43 }
 0x2e5   :  { %4028 = vmatpush3.bf16.msra.mxu1 %v4443_v6  ;;  %3723 = vmatprep.mubr.msk.f32.mxu1 %vm4402_vm2, %v4403_v8 }
 0x2e6   :  { %4032 = vmatprep.subr.bf16.mxu1 %v4401_v7 }
 0x3b7   :  { %v404_v45 = vpop.f32.mrb[2].mxu1 }
 0x3b8   :  { %v408_v46 = vadd.f32 %v404_v45, %v335_v44  ;;  %v3711_v47 = vpop.f32.mrb[3].mxu1 }
 0x3ba   :  { %4206 = vtanh.f32 %v408_v46  ;;  %v409_v49 = vmul.f32 0.5, %v408_v46 }
 0x3bc   :  { %4208 = vtanh.f32 %v409_v49 }
 0x3c4   :  { %v4207_v48 = vpop.eup %4206 }
 0x3c5   :  { %416 = vrot.lane.b32.xlu0 %v4207_v48, %s4404_s0 }
 0x3c6   :  { %v4209_v50 = vpop.eup %4208 }
 0x3c7   :  { %v411_v51 = vmul.f32 0.5, %v4209_v50 }
 0x3c9   :  { %v412_v52 = vadd.f32 0.5, %v411_v51 }
 0x3cb   :  { %v414_v55 = vmul.f32 %v412_v52, %v322_v39 }
 0x437   :  { %v417_v53 = vpop.permute.xlu0 %416 }
 0x438   :  { %v419_v54 = vmul.f32 %v417_v53, %v412_v52 }
 0x43a   :  { %421 = vrot.lane.b32.xlu1 %v419_v54, %s4405_s1 }
 0x4ac   :  { %v422_v56 = vpop.permute.xlu1 %421 }
 0x4ad   :  { %v424_v57 = vadd.f32 %v422_v56, %v414_v55  ;;  %v739_v55 = vld [vmem:[#allocation2 + $0xa] sm:$0x3] }
 0x4af   :  { %4210 = vtanh.f32 %v424_v57 }
 0x4b9   :  { %v4211_v58 = vpop.eup %4210 }
 0x4ba   :  { %427 = vrot.lane.b32.xlu0 %v4211_v58, %s4405_s1 }
 0x52c   :  { %v428_v59 = vpop.permute.xlu0 %427 }
 0x52d   :  { %v430_v60 = vmul.f32 %v428_v59, %v412_v52 }
 0x52f   :  { %432 = vrot.lane.b32.xlu1 %v430_v60, %s4406_s27 }
 0x5a1   :  { %v433_v61 = vpop.permute.xlu1 %432 }
 0x5a2   :  { %435 = vst.msk [vmem:[#allocation3 + $0x2] sm:$0x3] %vm333_vm7, %v433_v61  ;;  %3717 = vmatmul.mubr.msk.f32.vlgmr.msra.gmra.mrb[4].mxu0 %vm232_vm8, %v433_v61 }
 0x5a3   :  { %4031 = vmatpush3.bf16.msra.mxu0 %v4443_v6  ;;  %3730 = vmatprep.mubr.msk.f32.mxu0 %vm4402_vm2, %v4403_v8 }
 0x5a4   :  { %4035 = vmatprep.subr.bf16.mxu0 %v4401_v7 }
 0x675   :  { %v505_v63 = vpop.f32.mrb[4].mxu0 }
 0x676   :  { %v509_v0 = vadd.f32 %v505_v63, %v436_v62  ;;  %v3718_v1 = vpop.f32.mrb[5].mxu0 }
 0x678   :  { %4212 = vtanh.f32 %v509_v0  ;;  %v510_v3 = vmul.f32 0.5, %v509_v0 }
 0x67a   :  { %4214 = vtanh.f32 %v510_v3 }
 0x682   :  { %v4213_v2 = vpop.eup %4212 }
 0x683   :  { %517 = vrot.lane.b32.xlu0 %v4213_v2, %s4404_s0 }
 0x684   :  { %v4215_v4 = vpop.eup %4214 }
 0x685   :  { %v512_v5 = vmul.f32 0.5, %v4215_v4 }
 0x687   :  { %v513_v9 = vadd.f32 0.5, %v512_v5 }
 0x689   :  { %v515_v12 = vmul.f32 %v513_v9, %v424_v57 }
 0x6f5   :  { %v518_v10 = vpop.permute.xlu0 %517 }
 0x6f6   :  { %v520_v11 = vmul.f32 %v518_v10, %v513_v9 }
 0x6f8   :  { %522 = vrot.lane.b32.xlu1 %v520_v11, %s4405_s1 }
 0x76a   :  { %v523_v13 = vpop.permute.xlu1 %522 }
 0x76b   :  { %v525_v14 = vadd.f32 %v523_v13, %v515_v12  ;;  %v840_v12 = vld [vmem:[#allocation2 + $0xc] sm:$0x3] }
 0x76d   :  { %4216 = vtanh.f32 %v525_v14 }
 0x777   :  { %v4217_v15 = vpop.eup %4216 }
 0x778   :  { %528 = vrot.lane.b32.xlu0 %v4217_v15, %s4405_s1 }
 0x7ea   :  { %v529_v16 = vpop.permute.xlu0 %528 }
 0x7eb   :  { %v531_v17 = vmul.f32 %v529_v16, %v513_v9 }
 0x7ed   :  { %533 = vrot.lane.b32.xlu1 %v531_v17, %s4406_s27 }
 0x85f   :  { %v534_v18 = vpop.permute.xlu1 %533 }
 0x860   :  { %536 = vst.msk [vmem:[#allocation3 + $0x4] sm:$0x3] %vm333_vm7, %v534_v18  ;;  %3724 = vmatmul.mubr.msk.f32.vlgmr.msra.gmra.mrb[4].mxu1 %vm232_vm8, %v534_v18 }
 0x861   :  { %4034 = vmatpush3.bf16.msra.mxu1 %v4443_v6  ;;  %3737 = vmatprep.mubr.msk.f32.mxu1 %vm4402_vm2, %v4403_v8 }
 0x862   :  { %4038 = vmatprep.subr.bf16.mxu1 %v4401_v7 }
 0x933   :  { %v606_v20 = vpop.f32.mrb[4].mxu1 }
 0x934   :  { %v610_v21 = vadd.f32 %v606_v20, %v537_v19  ;;  %v3725_v22 = vpop.f32.mrb[5].mxu1 }
 0x936   :  { %4218 = vtanh.f32 %v610_v21  ;;  %v611_v24 = vmul.f32 0.5, %v610_v21 }
 0x938   :  { %4220 = vtanh.f32 %v611_v24 }
 0x940   :  { %v4219_v23 = vpop.eup %4218 }
 0x941   :  { %618 = vrot.lane.b32.xlu0 %v4219_v23, %s4404_s0 }
 0x942   :  { %v4221_v25 = vpop.eup %4220 }
 0x943   :  { %v613_v26 = vmul.f32 0.5, %v4221_v25 }
 0x945   :  { %v614_v27 = vadd.f32 0.5, %v613_v26 }
 0x947   :  { %v616_v30 = vmul.f32 %v614_v27, %v525_v14 }
 0x9b3   :  { %v619_v28 = vpop.permute.xlu0 %618 }
 0x9b4   :  { %v621_v29 = vmul.f32 %v619_v28, %v614_v27 }
 0x9b6   :  { %623 = vrot.lane.b32.xlu1 %v621_v29, %s4405_s1 }
 0xa28   :  { %v624_v31 = vpop.permute.xlu1 %623 }
 0xa29   :  { %v626_v32 = vadd.f32 %v624_v31, %v616_v30  ;;  %v941_v30 = vld [vmem:[#allocation2 + $0xe] sm:$0x3] }
 0xa2b   :  { %4222 = vtanh.f32 %v626_v32 }
 0xa35   :  { %v4223_v33 = vpop.eup %4222 }
 0xa36   :  { %629 = vrot.lane.b32.xlu0 %v4223_v33, %s4405_s1 }
 0xaa8   :  { %v630_v34 = vpop.permute.xlu0 %629 }
 0xaa9   :  { %v632_v35 = vmul.f32 %v630_v34, %v614_v27 }
 0xaab   :  { %634 = vrot.lane.b32.xlu1 %v632_v35, %s4406_s27 }
 0xb1d   :  { %v635_v36 = vpop.permute.xlu1 %634 }
 0xb1e   :  { %637 = vst.msk [vmem:[#allocation3 + $0x6] sm:$0x3] %vm333_vm7, %v635_v36  ;;  %3731 = vmatmul.mubr.msk.f32.vlgmr.msra.gmra.mrb[6].mxu0 %vm232_vm8, %v635_v36 }
 0xb1f   :  { %4037 = vmatpush3.bf16.msra.mxu0 %v4443_v6  ;;  %3744 = vmatprep.mubr.msk.f32.mxu0 %vm4402_vm2, %v4403_v8 }
 0xb25   :  { %v1047_v11 = vld [vmem:[#allocation3] sm:$0xff] }
 0xbf1   :  { %v707_v38 = vpop.f32.mrb[6].mxu0 }
 0xbf2   :  { %v711_v39 = vadd.f32 %v707_v38, %v638_v37  ;;  %v3732_v40 = vpop.f32.mrb[7].mxu0 }
 0xbf4   :  { %4224 = vtanh.f32 %v711_v39  ;;  %v712_v42 = vmul.f32 0.5, %v711_v39 }
 0xbf6   :  { %4226 = vtanh.f32 %v712_v42 }
 0xbfe   :  { %v4225_v41 = vpop.eup %4224 }
 0xbff   :  { %719 = vrot.lane.b32.xlu0 %v4225_v41, %s4404_s0 }
 0xc00   :  { %v4227_v43 = vpop.eup %4226 }
 0xc01   :  { %v714_v44 = vmul.f32 0.5, %v4227_v43 }
 0xc03   :  { %v715_v45 = vadd.f32 0.5, %v714_v44 }
 0xc05   :  { %v717_v48 = vmul.f32 %v715_v45, %v626_v32 }
 0xc71   :  { %v720_v46 = vpop.permute.xlu0 %719 }
 0xc72   :  { %v722_v47 = vmul.f32 %v720_v46, %v715_v45  ;;  %v1045_v46 = vld [vmem:[#allocation4 + $0x40] sm:$0xff] }
 0xc74   :  { %724 = vrot.lane.b32.xlu1 %v722_v47, %s4405_s1  ;;  %v1042_v47 = vld [vmem:[#allocation4 + $0x28] sm:$0xff] }
 0xce6   :  { %v725_v49 = vpop.permute.xlu1 %724 }
 0xce7   :  { %v727_v50 = vadd.f32 %v725_v49, %v717_v48  ;;  %v1043_v49 = vld [vmem:[#allocation4 + $0x30] sm:$0xff] }
 0xce9   :  { %4228 = vtanh.f32 %v727_v50 }
 0xcf3   :  { %v4229_v51 = vpop.eup %4228 }
 0xcf4   :  { %730 = vrot.lane.b32.xlu0 %v4229_v51, %s4405_s1 }
 0xd66   :  { %v731_v52 = vpop.permute.xlu0 %730 }
 0xd67   :  { %v733_v53 = vmul.f32 %v731_v52, %v715_v45  ;;  %v1044_v45 = vld [vmem:[#allocation4 + $0x38] sm:$0xff] }
 0xd68   :  { %v4045_v48 = vpack.c.bf16 %v1045_v46, %v1044_v45 }
 0xd69   :  { %735 = vrot.lane.b32.xlu1 %v733_v53, %s4406_s27 }
 0xddb   :  { %v736_v54 = vpop.permute.xlu1 %735 }
 0xddc   :  { %738 = vst.msk [vmem:[#allocation3 + $0x8] sm:$0x3] %vm333_vm7, %v736_v54  ;;  %3738 = vmatmul.mubr.msk.f32.vlgmr.msra.gmra.mrb[6].mxu1 %vm232_vm8, %v736_v54  ;;  %v1235_v54 = vld [vmem:[#allocation4 + $0x48] sm:$0xff] }
 0xddd   :  { %4040 = vmatpush3.bf16.msra.mxu1 %v4443_v6  ;;  %3751 = vmatprep.mubr.msk.f32.mxu1 %vm4402_vm2, %v4403_v8 }
 0xdde   :  { %4046 = vmatprep.subr.bf16.mxu1 %v4045_v48 }
 0xeaf   :  { %v808_v56 = vpop.f32.mrb[6].mxu1 }
 0xeb0   :  { %v812_v57 = vadd.f32 %v808_v56, %v739_v55  ;;  %v3739_v58 = vpop.f32.mrb[7].mxu1  ;;  %v1236_v55 = vld [vmem:[#allocation4 + $0x50] sm:$0xff] }
 0xeb1   :  { %v4537_v56 = vpack.c.bf16 %v1236_v55, %v1235_v54  ;;  %v1238_v58 = vld [vmem:[#allocation4 + $0x60] sm:$0xff] }
 0xeb2   :  { %4230 = vtanh.f32 %v812_v57  ;;  %v813_v60 = vmul.f32 0.5, %v812_v57  ;;  %v1237_v57 = vld [vmem:[#allocation4 + $0x58] sm:$0xff] }
 0xeb4   :  { %4232 = vtanh.f32 %v813_v60  ;;  %v4542_v60 = vpack.c.bf16 %v1238_v58, %v1237_v57 }
 0xebc   :  { %v4231_v59 = vpop.eup %4230 }
 0xebd   :  { %820 = vrot.lane.b32.xlu0 %v4231_v59, %s4404_s0 }
 0xebe   :  { %v4233_v61 = vpop.eup %4232 }
 0xebf   :  { %v815_v62 = vmul.f32 0.5, %v4233_v61 }
 0xec1   :  { %v816_v63 = vadd.f32 0.5, %v815_v62 }
 0xec3   :  { %v818_v6 = vmul.f32 %v816_v63, %v727_v50  ;;  %v4041_v50 = vpack.c.bf16 %v1043_v49, %v1042_v47 }
 0xec5   :  { %4042 = vmatprep.subr.bf16.mxu0 %v4041_v50 }
 0xf2f   :  { %v821_v0 = vpop.permute.xlu0 %820 }
 0xf30   :  { %v823_v1 = vmul.f32 %v821_v0, %v816_v63 }
 0xf32   :  { %825 = vrot.lane.b32.xlu1 %v823_v1, %s4405_s1 }
 0xfa4   :  { %v826_v2 = vpop.permute.xlu1 %825 }
 0xfa5   :  { %v828_v3 = vadd.f32 %v826_v2, %v818_v6  ;;  %v3507_v2 = vld [vmem:[#allocation4 + $0x68] ss:$0 sm:$0xff] }
 0xfa7   :  { %4234 = vtanh.f32 %v828_v3 }
 0xfb1   :  { %v4235_v4 = vpop.eup %4234 }
 0xfb2   :  { %831 = vrot.lane.b32.xlu0 %v4235_v4, %s4405_s1 }
0x1024   :  { %v832_v5 = vpop.permute.xlu0 %831 }
0x1025   :  { %v834_v9 = vmul.f32 %v832_v5, %v816_v63 }
0x1027   :  { %836 = vrot.lane.b32.xlu1 %v834_v9, %s4406_s27 }
0x1099   :  { %v837_v10 = vpop.permute.xlu1 %836 }
0x109a   :  { %839 = vst.msk [vmem:[#allocation3 + $0xa] sm:$0x3] %vm333_vm7, %v837_v10  ;;  %3745 = vmatmul.mubr.msk.f32.vlgmr.msra.gmra.mrb[8].mxu0 %vm232_vm8, %v837_v10 }
0x109b   :  { %3758 = vmatprep.mubr.msk.f32.mxu0 %vm232_vm8, %v1047_v11  ;;  %4044 = vmatpush3.bf16.msra.mxu0 %v4041_v50 }
0x109c   :  { %4049 = vmatprep.subr.bf16.mxu0 %v4401_v7 }
0x116d   :  { %v909_v13 = vpop.f32.mrb[8].mxu0 }
0x116e   :  { %v913_v14 = vadd.f32 %v909_v13, %v840_v12  ;;  %v3746_v15 = vpop.f32.mrb[9].mxu0 }
0x1170   :  { %4236 = vtanh.f32 %v913_v14  ;;  %v914_v17 = vmul.f32 0.5, %v913_v14 }
0x1172   :  { %4238 = vtanh.f32 %v914_v17 }
0x117a   :  { %v4237_v16 = vpop.eup %4236 }
0x117b   :  { %921 = vrot.lane.b32.xlu0 %v4237_v16, %s4404_s0 }
0x117c   :  { %v4239_v18 = vpop.eup %4238 }
0x117d   :  { %v916_v19 = vmul.f32 0.5, %v4239_v18 }
0x117f   :  { %v917_v20 = vadd.f32 0.5, %v916_v19 }
0x1181   :  { %v919_v23 = vmul.f32 %v917_v20, %v828_v3 }
0x11ed   :  { %v922_v21 = vpop.permute.xlu0 %921 }
0x11ee   :  { %v924_v22 = vmul.f32 %v922_v21, %v917_v20 }
0x11f0   :  { %926 = vrot.lane.b32.xlu1 %v924_v22, %s4405_s1 }
0x1262   :  { %v927_v24 = vpop.permute.xlu1 %926 }
0x1263   :  { %v929_v25 = vadd.f32 %v927_v24, %v919_v23 }
0x1265   :  { %4240 = vtanh.f32 %v929_v25 }
0x126f   :  { %v4241_v26 = vpop.eup %4240 }
0x1270   :  { %932 = vrot.lane.b32.xlu0 %v4241_v26, %s4405_s1 }
0x12e2   :  { %v933_v27 = vpop.permute.xlu0 %932 }
0x12e3   :  { %v935_v28 = vmul.f32 %v933_v27, %v917_v20 }
0x12e5   :  { %937 = vrot.lane.b32.xlu1 %v935_v28, %s4406_s27 }
0x1357   :  { %v938_v29 = vpop.permute.xlu1 %937 }
0x1358   :  { %940 = vst.msk [vmem:[#allocation3 + $0xc] sm:$0x3] %vm333_vm7, %v938_v29  ;;  %3752 = vmatmul.mubr.msk.f32.vlgmr.msra.gmra.mrb[8].mxu1 %vm232_vm8, %v938_v29 }
0x1359   :  { %3765 = vmatprep.mubr.msk.f32.mxu1 %vm232_vm8, %v1047_v11  ;;  %4048 = vmatpush3.bf16.msra.mxu1 %v4045_v48 }
0x135a   :  { %4055 = vmatprep.subr.bf16.mxu1 %v4401_v7 }
0x142b   :  { %v1010_v31 = vpop.f32.mrb[8].mxu1 }
0x142c   :  { %v1014_v32 = vadd.f32 %v1010_v31, %v941_v30  ;;  %v3753_v33 = vpop.f32.mrb[9].mxu1 }
0x142e   :  { %4242 = vtanh.f32 %v1014_v32  ;;  %v1015_v35 = vmul.f32 0.5, %v1014_v32 }
0x1430   :  { %4244 = vtanh.f32 %v1015_v35 }
0x1438   :  { %v4243_v34 = vpop.eup %4242 }
0x1439   :  { %1022 = vrot.lane.b32.xlu0 %v4243_v34, %s4404_s0 }
0x143a   :  { %v4245_v36 = vpop.eup %4244 }
0x143b   :  { %v1017_v37 = vmul.f32 0.5, %v4245_v36 }
0x143d   :  { %v1018_v38 = vadd.f32 0.5, %v1017_v37 }
0x143f   :  { %v1020_v41 = vmul.f32 %v1018_v38, %v929_v25 }
0x14ab   :  { %v1023_v39 = vpop.permute.xlu0 %1022 }
0x14ac   :  { %v1025_v40 = vmul.f32 %v1023_v39, %v1018_v38 }
0x14ae   :  { %1027 = vrot.lane.b32.xlu1 %v1025_v40, %s4405_s1 }
0x1520   :  { %v1028_v42 = vpop.permute.xlu1 %1027 }
0x1521   :  { %v1030_v43 = vadd.f32 %v1028_v42, %v1020_v41 }
0x1523   :  { %4246 = vtanh.f32 %v1030_v43 }
0x152d   :  { %v4247_v44 = vpop.eup %4246 }
0x152e   :  { %1033 = vrot.lane.b32.xlu0 %v4247_v44, %s4405_s1 }
0x15a0   :  { %v1034_v51 = vpop.permute.xlu0 %1033 }
0x15a1   :  { %v1036_v52 = vmul.f32 %v1034_v51, %v1018_v38 }
0x15a3   :  { %1038 = vrot.lane.b32.xlu1 %v1036_v52, %s4406_s27 }
0x1615   :  { %v1039_v53 = vpop.permute.xlu1 %1038 }
0x1616   :  { %1041 = vst.msk [vmem:[#allocation3 + $0xe] sm:$0x3] %vm333_vm7, %v1039_v53 }
0x161d   :  { %v1048_v59 = vld [vmem:[#allocation3 + $0x8] sm:$0xff] }
0x161e   :  { %3759 = vmatmul.mubr.msk.f32.vlgmr.msra.gmra.mrb[10].mxu0 %vm232_vm8, %v1048_v59  ;;  %3766 = vmatmul.mubr.msk.f32.vlgmr.msra.gmra.mrb[10].mxu1 %vm232_vm8, %v1048_v59 }
0x161f   :  { %4051 = vmatpush3.bf16.msra.mxu0 %v4537_v56  ;;  %3776 = vmatprep.mubr.msk.f32.mxu0 %vm4402_vm2, %v4403_v8 }
0x1620   :  { %4052 = vmatprep.subr.bf16.mxu0 %v4401_v7  ;;  %4057 = vmatpush3.bf16.msra.mxu1 %v4537_v56 }
0x1621   :  { %4058 = vmatprep.subr.bf16.mxu1 %v4401_v7  ;;  %3787 = vmatprep.mubr.msk.f32.mxu1 %vm4402_vm2, %v4403_v8 }
0x1623   :  { %4054 = vmatpush3.bf16.msra.mxu0 %v4542_v60 }
0x1624   :  { %4060 = vmatpush3.bf16.msra.mxu1 %v4542_v60  ;;  %4061 = vmatprep.subr.bf16.mxu0 %v4401_v7 }
0x1625   :  { %4067 = vmatprep.subr.bf16.mxu1 %v4401_v7 }
0x1626   :  { %3777 = vmatmul.mubr.f32.vlgmr.msra.gmra.mrb[12].mxu0 %v4403_v8 }
0x1627   :  { %4063 = vmatpush3.bf16.msra.mxu0 %v4537_v56  ;;  %3798 = vmatprep.mubr.msk.f32.mxu0 %vm4402_vm2, %v4403_v8 }
0x1628   :  { %4064 = vmatprep.subr.bf16.mxu0 %v4401_v7 }
0x162b   :  { %4066 = vmatpush3.bf16.msra.mxu0 %v4542_v60 }
0x162c   :  { %4073 = vmatprep.subr.bf16.mxu0 %v4401_v7 }
0x16f1   :  { %v3760_v61 = vpop.f32.mrb[10].mxu0  ;;  %v3767_v62 = vpop.f32.mrb[10].mxu1 }
0x16f2   :  { %v1206_v63 = vrot.slane %v3767_v62, 6  ;;  %v1215_v0 = vrot.slane %v3767_v62, 2  ;;  %v1121_v1 = vpop.f32.mrb[11].mxu0  ;;  %v1196_v6 = vpop.f32.mrb[11].mxu1 }
0x16f3   :  { %v1223_v3 = vrot.slane %v1196_v6, 6  ;;  %v1228_v4 = vrot.slane %v1196_v6, 2 }
0x16f4   :  { %v1208_v5 = vadd.f32 %v1206_v63, %v1121_v1  ;;  %v1217_v9 = vadd.f32 %v1215_v0, %v1121_v1 }
0x16f5   :  { %v1225_v10 = vadd.f32 %v3760_v61, %v1223_v3  ;;  %v1230_v11 = vadd.f32 %v3760_v61, %v1228_v4 }
0x16f6   :  { %v1213_v12 = vadd.f32 %v3507_v2, %v1208_v5  ;;  %v1218_v13 = vadd.f32 %v3507_v2, %v1217_v9 }
0x16f7   :  { %v1226_v14 = vadd.f32 %v3507_v2, %v1225_v10  ;;  %v1231_v15 = vadd.f32 %v3507_v2, %v1230_v11 }
0x16f8   :  { %1214 = vst [vmem:[#allocation2] sm:$0x33] %v1213_v12   ;;  %1219 = vst [vmem:[#allocation2] sm:$0xcc] %v1218_v13  }
0x16f9   :  { %1227 = vst [vmem:[#allocation2 + $0x8] sm:$0x33] %v1226_v14   ;;  %1232 = vst [vmem:[#allocation2 + $0x8] sm:$0xcc] %v1231_v15   ;;  %v1309_v16 = vpop.f32.mrb[12].mxu0 }
0x16fa   :  { %v3778_v17 = vpop.f32.mrb[13].mxu0 }
0x16ff   :  { %v1239_v18 = vld [vmem:[#allocation2] sm:$0x3]  ;;  %v1342_v34 = vld [vmem:[#allocation2 + $0x2] sm:$0x3]  ;;  %v1443_v52 = vld [vmem:[#allocation2 + $0x4] sm:$0x3] }
0x1700   :  { %v1313_v19 = vadd.f32 %v1309_v16, %v1239_v18  ;;  %v1544_v10 = vld [vmem:[#allocation2 + $0x6] sm:$0x3] }
0x1702   :  { %4248 = vtanh.f32 %v1313_v19  ;;  %v1314_v21 = vmul.f32 0.5, %v1313_v19 }
0x1704   :  { %4250 = vtanh.f32 %v1314_v21 }
0x170c   :  { %v4249_v20 = vpop.eup %4248 }
0x170d   :  { %1321 = vrot.lane.b32.xlu0 %v4249_v20, %s4407_s28 }
0x170e   :  { %v4251_v22 = vpop.eup %4250 }
0x170f   :  { %v1316_v23 = vmul.f32 0.5, %v4251_v22 }
0x1711   :  { %v1317_v24 = vadd.f32 0.5, %v1316_v23 }
0x1713   :  { %v1319_v27 = vmul.f32 0.0, %v1317_v24 }
0x177f   :  { %v1322_v25 = vpop.permute.xlu0 %1321 }
0x1780   :  { %v1324_v26 = vmul.f32 %v1322_v25, %v1317_v24 }
0x1782   :  { %1326 = vrot.lane.b32.xlu1 %v1324_v26, %s4407_s28 }
0x17f4   :  { %v1327_v28 = vpop.permute.xlu1 %1326 }
0x17f5   :  { %v1329_v29 = vadd.f32 %v1327_v28, %v1319_v27  ;;  %v1645_v28 = vld [vmem:[#allocation2 + $0x8] sm:$0x3] }
0x17f7   :  { %4252 = vtanh.f32 %v1329_v29 }
0x1801   :  { %v4253_v30 = vpop.eup %4252 }
0x1802   :  { %1332 = vrot.lane.b32.xlu0 %v4253_v30, %s4407_s28 }
0x1874   :  { %v1333_v31 = vpop.permute.xlu0 %1332 }
0x1875   :  { %v1335_v32 = vmul.f32 %v1333_v31, %v1317_v24 }
0x1877   :  { %1337 = vrot.lane.b32.xlu1 %v1335_v32, %s4408_s29 }
0x18e9   :  { %v1338_v33 = vpop.permute.xlu1 %1337 }
0x18ea   :  { %1341 = vst.msk [vmem:[#allocation3] sm:$0x3] %vm1340_vm9, %v1338_v33  ;;  %3788 = vmatmul.mubr.msk.f32.vlgmr.msra.gmra.mrb[12].mxu1 %vm1240_vm10, %v1338_v33 }
0x18eb   :  { %4069 = vmatpush3.bf16.msra.mxu1 %v4537_v56  ;;  %3809 = vmatprep.mubr.msk.f32.mxu1 %vm4402_vm2, %v4403_v8 }
0x18ec   :  { %4070 = vmatprep.subr.bf16.mxu1 %v4401_v7 }
0x18ef   :  { %4072 = vmatpush3.bf16.msra.mxu1 %v4542_v60 }
0x18f0   :  { %4079 = vmatprep.subr.bf16.mxu1 %v4401_v7 }
0x19bd   :  { %v1411_v35 = vpop.f32.mrb[12].mxu1 }
0x19be   :  { %v1415_v36 = vadd.f32 %v1411_v35, %v1342_v34  ;;  %v3789_v37 = vpop.f32.mrb[13].mxu1 }
0x19c0   :  { %4254 = vtanh.f32 %v1415_v36  ;;  %v1416_v39 = vmul.f32 0.5, %v1415_v36 }
0x19c2   :  { %4256 = vtanh.f32 %v1416_v39 }
0x19ca   :  { %v4255_v38 = vpop.eup %4254 }
0x19cb   :  { %1423 = vrot.lane.b32.xlu0 %v4255_v38, %s4407_s28 }
0x19cc   :  { %v4257_v40 = vpop.eup %4256 }
0x19cd   :  { %v1418_v41 = vmul.f32 0.5, %v4257_v40 }
0x19cf   :  { %v1419_v42 = vadd.f32 0.5, %v1418_v41 }
0x19d1   :  { %v1421_v45 = vmul.f32 %v1419_v42, %v1329_v29 }
0x1a3d   :  { %v1424_v43 = vpop.permute.xlu0 %1423 }
0x1a3e   :  { %v1426_v44 = vmul.f32 %v1424_v43, %v1419_v42 }
0x1a40   :  { %1428 = vrot.lane.b32.xlu1 %v1426_v44, %s4407_s28 }
0x1ab2   :  { %v1429_v46 = vpop.permute.xlu1 %1428 }
0x1ab3   :  { %v1431_v47 = vadd.f32 %v1429_v46, %v1421_v45  ;;  %v1746_v46 = vld [vmem:[#allocation2 + $0xa] sm:$0x3] }
0x1ab5   :  { %4258 = vtanh.f32 %v1431_v47 }
0x1abf   :  { %v4259_v48 = vpop.eup %4258 }
0x1ac0   :  { %1434 = vrot.lane.b32.xlu0 %v4259_v48, %s4407_s28 }
0x1b32   :  { %v1435_v49 = vpop.permute.xlu0 %1434 }
0x1b33   :  { %v1437_v50 = vmul.f32 %v1435_v49, %v1419_v42 }
0x1b35   :  { %1439 = vrot.lane.b32.xlu1 %v1437_v50, %s4408_s29 }
0x1ba7   :  { %v1440_v51 = vpop.permute.xlu1 %1439 }
0x1ba8   :  { %1442 = vst.msk [vmem:[#allocation3 + $0x2] sm:$0x3] %vm1340_vm9, %v1440_v51  ;;  %3799 = vmatmul.mubr.msk.f32.vlgmr.msra.gmra.mrb[14].mxu0 %vm1240_vm10, %v1440_v51 }
0x1ba9   :  { %4075 = vmatpush3.bf16.msra.mxu0 %v4537_v56  ;;  %3820 = vmatprep.mubr.msk.f32.mxu0 %vm4402_vm2, %v4403_v8 }
0x1baa   :  { %4076 = vmatprep.subr.bf16.mxu0 %v4401_v7 }
0x1bad   :  { %4078 = vmatpush3.bf16.msra.mxu0 %v4542_v60 }
0x1bae   :  { %4085 = vmatprep.subr.bf16.mxu0 %v4401_v7 }
0x1c7b   :  { %v1512_v53 = vpop.f32.mrb[14].mxu0 }
0x1c7c   :  { %v1516_v54 = vadd.f32 %v1512_v53, %v1443_v52  ;;  %v3800_v55 = vpop.f32.mrb[15].mxu0 }
0x1c7e   :  { %4260 = vtanh.f32 %v1516_v54  ;;  %v1517_v58 = vmul.f32 0.5, %v1516_v54 }
0x1c80   :  { %4262 = vtanh.f32 %v1517_v58 }
0x1c88   :  { %v4261_v57 = vpop.eup %4260 }
0x1c89   :  { %1524 = vrot.lane.b32.xlu0 %v4261_v57, %s4407_s28 }
0x1c8a   :  { %v4263_v59 = vpop.eup %4262 }
0x1c8b   :  { %v1519_v61 = vmul.f32 0.5, %v4263_v59 }
0x1c8d   :  { %v1520_v62 = vadd.f32 0.5, %v1519_v61 }
0x1c8f   :  { %v1522_v1 = vmul.f32 %v1520_v62, %v1431_v47 }
0x1cfb   :  { %v1525_v63 = vpop.permute.xlu0 %1524 }
0x1cfc   :  { %v1527_v0 = vmul.f32 %v1525_v63, %v1520_v62 }
0x1cfe   :  { %1529 = vrot.lane.b32.xlu1 %v1527_v0, %s4407_s28 }
0x1d70   :  { %v1530_v6 = vpop.permute.xlu1 %1529 }
0x1d71   :  { %v1532_v2 = vadd.f32 %v1530_v6, %v1522_v1  ;;  %v1847_v1 = vld [vmem:[#allocation2 + $0xc] sm:$0x3] }
0x1d73   :  { %4264 = vtanh.f32 %v1532_v2 }
0x1d7d   :  { %v4265_v3 = vpop.eup %4264 }
0x1d7e   :  { %1535 = vrot.lane.b32.xlu0 %v4265_v3, %s4407_s28 }
0x1df0   :  { %v1536_v4 = vpop.permute.xlu0 %1535 }
0x1df1   :  { %v1538_v5 = vmul.f32 %v1536_v4, %v1520_v62 }
0x1df3   :  { %1540 = vrot.lane.b32.xlu1 %v1538_v5, %s4408_s29 }
0x1e65   :  { %v1541_v9 = vpop.permute.xlu1 %1540 }
0x1e66   :  { %1543 = vst.msk [vmem:[#allocation3 + $0x4] sm:$0x3] %vm1340_vm9, %v1541_v9  ;;  %3810 = vmatmul.mubr.msk.f32.vlgmr.msra.gmra.mrb[14].mxu1 %vm1240_vm10, %v1541_v9 }
0x1e67   :  { %4081 = vmatpush3.bf16.msra.mxu1 %v4537_v56  ;;  %3831 = vmatprep.mubr.msk.f32.mxu1 %vm4402_vm2, %v4403_v8 }
0x1e68   :  { %4082 = vmatprep.subr.bf16.mxu1 %v4401_v7 }
0x1e6b   :  { %4084 = vmatpush3.bf16.msra.mxu1 %v4542_v60 }
0x1e6c   :  { %4091 = vmatprep.subr.bf16.mxu1 %v4401_v7 }
0x1f39   :  { %v1613_v11 = vpop.f32.mrb[14].mxu1 }
0x1f3a   :  { %v1617_v12 = vadd.f32 %v1613_v11, %v1544_v10  ;;  %v3811_v13 = vpop.f32.mrb[15].mxu1 }
0x1f3c   :  { %4266 = vtanh.f32 %v1617_v12  ;;  %v1618_v15 = vmul.f32 0.5, %v1617_v12 }
0x1f3e   :  { %4268 = vtanh.f32 %v1618_v15 }
0x1f46   :  { %v4267_v14 = vpop.eup %4266 }
0x1f47   :  { %1625 = vrot.lane.b32.xlu0 %v4267_v14, %s4407_s28 }
0x1f48   :  { %v4269_v16 = vpop.eup %4268 }
0x1f49   :  { %v1620_v17 = vmul.f32 0.5, %v4269_v16 }
0x1f4b   :  { %v1621_v18 = vadd.f32 0.5, %v1620_v17 }
0x1f4d   :  { %v1623_v21 = vmul.f32 %v1621_v18, %v1532_v2 }
0x1fb9   :  { %v1626_v19 = vpop.permute.xlu0 %1625 }
0x1fba   :  { %v1628_v20 = vmul.f32 %v1626_v19, %v1621_v18 }
0x1fbc   :  { %1630 = vrot.lane.b32.xlu1 %v1628_v20, %s4407_s28 }
0x202e   :  { %v1631_v22 = vpop.permute.xlu1 %1630 }
0x202f   :  { %v1633_v23 = vadd.f32 %v1631_v22, %v1623_v21  ;;  %v1948_v21 = vld [vmem:[#allocation2 + $0xe] sm:$0x3] }
0x2031   :  { %4270 = vtanh.f32 %v1633_v23 }
0x203b   :  { %v4271_v24 = vpop.eup %4270 }
0x203c   :  { %1636 = vrot.lane.b32.xlu0 %v4271_v24, %s4407_s28 }
0x20ae   :  { %v1637_v25 = vpop.permute.xlu0 %1636 }
0x20af   :  { %v1639_v26 = vmul.f32 %v1637_v25, %v1621_v18 }
0x20b1   :  { %1641 = vrot.lane.b32.xlu1 %v1639_v26, %s4408_s29 }
0x2123   :  { %v1642_v27 = vpop.permute.xlu1 %1641 }
0x2124   :  { %1644 = vst.msk [vmem:[#allocation3 + $0x6] sm:$0x3] %vm1340_vm9, %v1642_v27  ;;  %3821 = vmatmul.mubr.msk.f32.vlgmr.msra.gmra.mrb[16].mxu0 %vm1240_vm10, %v1642_v27 }
0x2125   :  { %4087 = vmatpush3.bf16.msra.mxu0 %v4537_v56  ;;  %3842 = vmatprep.mubr.msk.f32.mxu0 %vm4402_vm2, %v4403_v8 }
0x2126   :  { %4088 = vmatprep.subr.bf16.mxu0 %v4401_v7 }
0x2129   :  { %4090 = vmatpush3.bf16.msra.mxu0 %v4542_v60 }
0x212b   :  { %v2058_v0 = vld [vmem:[#allocation3] sm:$0xff] }
0x21f7   :  { %v1714_v29 = vpop.f32.mrb[16].mxu0 }
0x21f8   :  { %v1718_v30 = vadd.f32 %v1714_v29, %v1645_v28  ;;  %v3822_v31 = vpop.f32.mrb[17].mxu0 }
0x21fa   :  { %4272 = vtanh.f32 %v1718_v30  ;;  %v1719_v33 = vmul.f32 0.5, %v1718_v30 }
0x21fc   :  { %4274 = vtanh.f32 %v1719_v33 }
0x2204   :  { %v4273_v32 = vpop.eup %4272 }
0x2205   :  { %1726 = vrot.lane.b32.xlu0 %v4273_v32, %s4407_s28 }
0x2206   :  { %v4275_v34 = vpop.eup %4274 }
0x2207   :  { %v1721_v35 = vmul.f32 0.5, %v4275_v34 }
0x2209   :  { %v1722_v36 = vadd.f32 0.5, %v1721_v35 }
0x220b   :  { %v1724_v39 = vmul.f32 %v1722_v36, %v1633_v23 }
0x2277   :  { %v1727_v37 = vpop.permute.xlu0 %1726 }
0x2278   :  { %v1729_v38 = vmul.f32 %v1727_v37, %v1722_v36  ;;  %v2050_v37 = vld [vmem:[#allocation4 + $0x78] sm:$0xff] }
0x227a   :  { %1731 = vrot.lane.b32.xlu1 %v1729_v38, %s4407_s28  ;;  %v2053_v38 = vld [vmem:[#allocation4 + $0x90] sm:$0xff] }
0x22ec   :  { %v1732_v40 = vpop.permute.xlu1 %1731 }
0x22ed   :  { %v1734_v41 = vadd.f32 %v1732_v40, %v1724_v39  ;;  %v2054_v40 = vld [vmem:[#allocation4 + $0x98] sm:$0xff] }
0x22ef   :  { %4276 = vtanh.f32 %v1734_v41 }
0x22f9   :  { %v4277_v42 = vpop.eup %4276 }
0x22fa   :  { %1737 = vrot.lane.b32.xlu0 %v4277_v42, %s4407_s28  ;;  %v2051_v42 = vld [vmem:[#allocation4 + $0x80] sm:$0xff] }
0x236c   :  { %v1738_v43 = vpop.permute.xlu0 %1737 }
0x236d   :  { %v1740_v44 = vmul.f32 %v1738_v43, %v1722_v36  ;;  %v2049_v36 = vld [vmem:[#allocation4 + $0x70] sm:$0xff]  ;;  %v2052_v43 = vld [vmem:[#allocation4 + $0x88] sm:$0xff] }
0x236e   :  { %v4097_v39 = vpack.c.bf16 %v2050_v37, %v2049_v36 }
0x236f   :  { %1742 = vrot.lane.b32.xlu1 %v1740_v44, %s4408_s29  ;;  %v2055_v44 = vld [vmem:[#allocation4 + $0xa0] sm:$0xff] }
0x2370   :  { %4098 = vmatprep.subr.bf16.mxu0 %v4097_v39 }
0x23e1   :  { %v1743_v45 = vpop.permute.xlu1 %1742 }
0x23e2   :  { %1745 = vst.msk [vmem:[#allocation3 + $0x8] sm:$0x3] %vm1340_vm9, %v1743_v45  ;;  %3832 = vmatmul.mubr.msk.f32.vlgmr.msra.gmra.mrb[16].mxu1 %vm1240_vm10, %v1743_v45  ;;  %v4101_v45 = vpack.c.bf16 %v2052_v43, %v2051_v42 }
0x23e3   :  { %4093 = vmatpush3.bf16.msra.mxu1 %v4537_v56  ;;  %3853 = vmatprep.mubr.msk.f32.mxu1 %vm4402_vm2, %v4403_v8 }
0x23e4   :  { %4094 = vmatprep.subr.bf16.mxu1 %v4401_v7 }
0x23e7   :  { %4096 = vmatpush3.bf16.msra.mxu1 %v4542_v60 }
0x24b5   :  { %v1815_v47 = vpop.f32.mrb[16].mxu1 }
0x24b6   :  { %v1819_v48 = vadd.f32 %v1815_v47, %v1746_v46  ;;  %v3833_v49 = vpop.f32.mrb[17].mxu1  ;;  %v2056_v46 = vld [vmem:[#allocation4 + $0xa8] sm:$0xff] }
0x24b7   :  { %v4109_v47 = vpack.c.bf16 %v2056_v46, %v2055_v44 }
0x24b8   :  { %4278 = vtanh.f32 %v1819_v48  ;;  %v1820_v51 = vmul.f32 0.5, %v1819_v48 }
0x24ba   :  { %4280 = vtanh.f32 %v1820_v51  ;;  %v2246_v51 = vld [vmem:[#allocation4 + $0xb0] sm:$0xff] }
0x24c2   :  { %v4279_v50 = vpop.eup %4278 }
0x24c3   :  { %1827 = vrot.lane.b32.xlu0 %v4279_v50, %s4407_s28 }
0x24c4   :  { %v4281_v52 = vpop.eup %4280 }
0x24c5   :  { %v1822_v53 = vmul.f32 0.5, %v4281_v52  ;;  %v2247_v52 = vld [vmem:[#allocation4 + $0xb8] sm:$0xff] }
0x24c7   :  { %v1823_v56 = vadd.f32 0.5, %v1822_v53  ;;  %v4641_v53 = vpack.c.bf16 %v2247_v52, %v2246_v51 }
0x24c9   :  { %v1825_v57 = vmul.f32 %v1823_v56, %v1734_v41  ;;  %v4105_v41 = vpack.c.bf16 %v2054_v40, %v2053_v38 }
0x24cb   :  { %4106 = vmatprep.subr.bf16.mxu1 %v4105_v41 }
0x2535   :  { %v1828_v54 = vpop.permute.xlu0 %1827 }
0x2536   :  { %v1830_v55 = vmul.f32 %v1828_v54, %v1823_v56  ;;  %v2249_v54 = vld [vmem:[#allocation4 + $0xc8] sm:$0xff] }
0x2538   :  { %1832 = vrot.lane.b32.xlu1 %v1830_v55, %s4407_s28 }
0x25aa   :  { %v1833_v58 = vpop.permute.xlu1 %1832 }
0x25ab   :  { %v1835_v60 = vadd.f32 %v1833_v58, %v1825_v57 }
0x25ad   :  { %4282 = vtanh.f32 %v1835_v60 }
0x25b7   :  { %v4283_v59 = vpop.eup %4282 }
0x25b8   :  { %1838 = vrot.lane.b32.xlu0 %v4283_v59, %s4407_s28 }
0x262a   :  { %v1839_v61 = vpop.permute.xlu0 %1838 }
0x262b   :  { %v1841_v62 = vmul.f32 %v1839_v61, %v1823_v56  ;;  %v2248_v56 = vld [vmem:[#allocation4 + $0xc0] sm:$0xff] }
0x262c   :  { %v4646_v57 = vpack.c.bf16 %v2249_v54, %v2248_v56 }
0x262d   :  { %1843 = vrot.lane.b32.xlu1 %v1841_v62, %s4408_s29 }
0x269f   :  { %v1844_v63 = vpop.permute.xlu1 %1843 }
0x26a0   :  { %1846 = vst.msk [vmem:[#allocation3 + $0xa] sm:$0x3] %vm1340_vm9, %v1844_v63  ;;  %3843 = vmatmul.mubr.msk.f32.vlgmr.msra.gmra.mrb[18].mxu0 %vm1240_vm10, %v1844_v63 }
0x26a1   :  { %3864 = vmatprep.mubr.msk.f32.mxu0 %vm1240_vm10, %v2058_v0  ;;  %4100 = vmatpush3.bf16.msra.mxu0 %v4097_v39 }
0x26a2   :  { %4102 = vmatprep.subr.bf16.mxu0 %v4101_v45 }
0x26a5   :  { %4104 = vmatpush3.bf16.msra.mxu0 %v4101_v45 }
0x26a6   :  { %4113 = vmatprep.subr.bf16.mxu0 %v4401_v7 }
0x2773   :  { %v1916_v6 = vpop.f32.mrb[18].mxu0 }
0x2774   :  { %v1920_v2 = vadd.f32 %v1916_v6, %v1847_v1  ;;  %v3844_v3 = vpop.f32.mrb[19].mxu0 }
0x2776   :  { %4284 = vtanh.f32 %v1920_v2  ;;  %v1921_v5 = vmul.f32 0.5, %v1920_v2 }
0x2778   :  { %4286 = vtanh.f32 %v1921_v5 }
0x2780   :  { %v4285_v4 = vpop.eup %4284 }
0x2781   :  { %1928 = vrot.lane.b32.xlu0 %v4285_v4, %s4407_s28 }
0x2782   :  { %v4287_v9 = vpop.eup %4286 }
0x2783   :  { %v1923_v10 = vmul.f32 0.5, %v4287_v9 }
0x2785   :  { %v1924_v11 = vadd.f32 0.5, %v1923_v10 }
0x2787   :  { %v1926_v14 = vmul.f32 %v1924_v11, %v1835_v60 }
0x27f3   :  { %v1929_v12 = vpop.permute.xlu0 %1928 }
0x27f4   :  { %v1931_v13 = vmul.f32 %v1929_v12, %v1924_v11 }
0x27f6   :  { %1933 = vrot.lane.b32.xlu1 %v1931_v13, %s4407_s28 }
0x2868   :  { %v1934_v15 = vpop.permute.xlu1 %1933 }
0x2869   :  { %v1936_v16 = vadd.f32 %v1934_v15, %v1926_v14 }
0x286b   :  { %4288 = vtanh.f32 %v1936_v16 }
0x2875   :  { %v4289_v17 = vpop.eup %4288 }
0x2876   :  { %1939 = vrot.lane.b32.xlu0 %v4289_v17, %s4407_s28 }
0x28e8   :  { %v1940_v18 = vpop.permute.xlu0 %1939 }
0x28e9   :  { %v1942_v19 = vmul.f32 %v1940_v18, %v1924_v11 }
0x28eb   :  { %1944 = vrot.lane.b32.xlu1 %v1942_v19, %s4408_s29 }
0x295d   :  { %v1945_v20 = vpop.permute.xlu1 %1944 }
0x295e   :  { %1947 = vst.msk [vmem:[#allocation3 + $0xc] sm:$0x3] %vm1340_vm9, %v1945_v20  ;;  %3854 = vmatmul.mubr.msk.f32.vlgmr.msra.gmra.mrb[18].mxu1 %vm1240_vm10, %v1945_v20 }
0x295f   :  { %3875 = vmatprep.mubr.msk.f32.mxu1 %vm1240_vm10, %v2058_v0  ;;  %4108 = vmatpush3.bf16.msra.mxu1 %v4105_v41  ;;  %v3519_v0 = vld [vmem:[#allocation4 + $0xd0] ss:$0 sm:$0xff] }
0x2960   :  { %4110 = vmatprep.subr.bf16.mxu1 %v4109_v47 }
0x2963   :  { %4112 = vmatpush3.bf16.msra.mxu1 %v4109_v47 }
0x2964   :  { %4119 = vmatprep.subr.bf16.mxu1 %v4401_v7 }
0x2a31   :  { %v2017_v22 = vpop.f32.mrb[18].mxu1 }
0x2a32   :  { %v2021_v23 = vadd.f32 %v2017_v22, %v1948_v21  ;;  %v3855_v24 = vpop.f32.mrb[19].mxu1 }
0x2a34   :  { %4290 = vtanh.f32 %v2021_v23  ;;  %v2022_v26 = vmul.f32 0.5, %v2021_v23 }
0x2a36   :  { %4292 = vtanh.f32 %v2022_v26 }
0x2a3e   :  { %v4291_v25 = vpop.eup %4290 }
0x2a3f   :  { %2029 = vrot.lane.b32.xlu0 %v4291_v25, %s4407_s28 }
0x2a40   :  { %v4293_v27 = vpop.eup %4292 }
0x2a41   :  { %v2024_v28 = vmul.f32 0.5, %v4293_v27 }
0x2a43   :  { %v2025_v29 = vadd.f32 0.5, %v2024_v28 }
0x2a45   :  { %v2027_v32 = vmul.f32 %v2025_v29, %v1936_v16 }
0x2ab1   :  { %v2030_v30 = vpop.permute.xlu0 %2029 }
0x2ab2   :  { %v2032_v31 = vmul.f32 %v2030_v30, %v2025_v29 }
0x2ab4   :  { %2034 = vrot.lane.b32.xlu1 %v2032_v31, %s4407_s28 }
0x2b26   :  { %v2035_v33 = vpop.permute.xlu1 %2034 }
0x2b27   :  { %v2037_v34 = vadd.f32 %v2035_v33, %v2027_v32 }
0x2b29   :  { %4294 = vtanh.f32 %v2037_v34 }
0x2b33   :  { %v4295_v35 = vpop.eup %4294 }
0x2b34   :  { %2040 = vrot.lane.b32.xlu0 %v4295_v35, %s4407_s28 }
0x2ba6   :  { %v2041_v48 = vpop.permute.xlu0 %2040 }
0x2ba7   :  { %v2043_v49 = vmul.f32 %v2041_v48, %v2025_v29 }
0x2ba9   :  { %2045 = vrot.lane.b32.xlu1 %v2043_v49, %s4408_s29 }
0x2c1b   :  { %v2046_v50 = vpop.permute.xlu1 %2045 }
0x2c1c   :  { %2048 = vst.msk [vmem:[#allocation3 + $0xe] sm:$0x3] %vm1340_vm9, %v2046_v50 }
0x2c23   :  { %v2059_v55 = vld [vmem:[#allocation3 + $0x8] sm:$0xff] }
0x2c24   :  { %3865 = vmatmul.mubr.msk.f32.vlgmr.msra.gmra.mrb[20].mxu0 %vm1240_vm10, %v2059_v55  ;;  %3876 = vmatmul.mubr.msk.f32.vlgmr.msra.gmra.mrb[20].mxu1 %vm1240_vm10, %v2059_v55 }
0x2c25   :  { %4115 = vmatpush3.bf16.msra.mxu0 %v4641_v53  ;;  %3886 = vmatprep.mubr.msk.f32.mxu0 %vm4402_vm2, %v4403_v8 }
0x2c26   :  { %4116 = vmatprep.subr.bf16.mxu0 %v4401_v7  ;;  %4121 = vmatpush3.bf16.msra.mxu1 %v4641_v53 }
0x2c27   :  { %4122 = vmatprep.subr.bf16.mxu1 %v4401_v7  ;;  %3897 = vmatprep.mubr.msk.f32.mxu1 %vm4402_vm2, %v4403_v8 }
0x2c29   :  { %4118 = vmatpush3.bf16.msra.mxu0 %v4646_v57 }
0x2c2a   :  { %4124 = vmatpush3.bf16.msra.mxu1 %v4646_v57  ;;  %4125 = vmatprep.subr.bf16.mxu0 %v4401_v7 }
0x2c2b   :  { %4131 = vmatprep.subr.bf16.mxu1 %v4401_v7 }
0x2c2c   :  { %3887 = vmatmul.mubr.f32.vlgmr.msra.gmra.mrb[22].mxu0 %v4403_v8 }
0x2c2d   :  { %4127 = vmatpush3.bf16.msra.mxu0 %v4641_v53  ;;  %3908 = vmatprep.mubr.msk.f32.mxu0 %vm4402_vm2, %v4403_v8 }
0x2c2e   :  { %4128 = vmatprep.subr.bf16.mxu0 %v4401_v7 }
0x2c31   :  { %4130 = vmatpush3.bf16.msra.mxu0 %v4646_v57 }
0x2c32   :  { %4137 = vmatprep.subr.bf16.mxu0 %v4401_v7 }
0x2cf7   :  { %v3866_v58 = vpop.f32.mrb[20].mxu0  ;;  %v3877_v60 = vpop.f32.mrb[20].mxu1 }
0x2cf8   :  { %v2217_v59 = vrot.slane %v3877_v60, 6  ;;  %v2226_v61 = vrot.slane %v3877_v60, 2  ;;  %v2132_v62 = vpop.f32.mrb[21].mxu0  ;;  %v2207_v63 = vpop.f32.mrb[21].mxu1 }
0x2cf9   :  { %v2234_v1 = vrot.slane %v2207_v63, 6  ;;  %v2239_v6 = vrot.slane %v2207_v63, 2 }
0x2cfa   :  { %v2219_v2 = vadd.f32 %v2217_v59, %v2132_v62  ;;  %v2228_v3 = vadd.f32 %v2226_v61, %v2132_v62 }
0x2cfb   :  { %v2236_v4 = vadd.f32 %v3866_v58, %v2234_v1  ;;  %v2241_v5 = vadd.f32 %v3866_v58, %v2239_v6 }
0x2cfc   :  { %v2224_v9 = vadd.f32 %v3519_v0, %v2219_v2  ;;  %v2229_v10 = vadd.f32 %v3519_v0, %v2228_v3 }
0x2cfd   :  { %v2237_v11 = vadd.f32 %v3519_v0, %v2236_v4  ;;  %v2242_v12 = vadd.f32 %v3519_v0, %v2241_v5 }
0x2cfe   :  { %2225 = vst [vmem:[#allocation2] sm:$0x33] %v2224_v9   ;;  %2230 = vst [vmem:[#allocation2] sm:$0xcc] %v2229_v10  }
0x2cff   :  { %2238 = vst [vmem:[#allocation2 + $0x8] sm:$0x33] %v2237_v11   ;;  %2243 = vst [vmem:[#allocation2 + $0x8] sm:$0xcc] %v2242_v12   ;;  %v2317_v13 = vpop.f32.mrb[22].mxu0 }
0x2d00   :  { %v3888_v14 = vpop.f32.mrb[23].mxu0 }
0x2d05   :  { %v2250_v15 = vld [vmem:[#allocation2] sm:$0x3]  ;;  %v2345_v31 = vld [vmem:[#allocation2 + $0x2] sm:$0x3]  ;;  %v2447_v49 = vld [vmem:[#allocation2 + $0x4] sm:$0x3] }
0x2d06   :  { %v2321_v16 = vadd.f32 %v2317_v13, %v2250_v15  ;;  %v2549_v13 = vld [vmem:[#allocation2 + $0x6] sm:$0x3] }
0x2d08   :  { %4296 = vtanh.f32 %v2321_v16  ;;  %v2322_v18 = vmul.f32 0.5, %v2321_v16 }
0x2d0a   :  { %4298 = vtanh.f32 %v2322_v18 }
0x2d12   :  { %v4297_v17 = vpop.eup %4296 }
0x2d13   :  { %2329 = vrot.lane.b32.xlu0 %v4297_v17, %s4407_s28 }
0x2d14   :  { %v4299_v19 = vpop.eup %4298 }
0x2d15   :  { %v2324_v20 = vmul.f32 0.5, %v4299_v19 }
0x2d17   :  { %v2325_v21 = vadd.f32 0.5, %v2324_v20 }
0x2d19   :  { %v2327_v24 = vmul.f32 0.0, %v2325_v21 }
0x2d85   :  { %v2330_v22 = vpop.permute.xlu0 %2329 }
0x2d86   :  { %v2332_v23 = vmul.f32 %v2330_v22, %v2325_v21 }
0x2d88   :  { %2334 = vrot.lane.b32.xlu1 %v2332_v23, %s4407_s28 }
0x2dfa   :  { %v2335_v25 = vpop.permute.xlu1 %2334 }
0x2dfb   :  { %v2337_v26 = vadd.f32 %v2335_v25, %v2327_v24 }
0x2dfd   :  { %4300 = vtanh.f32 %v2337_v26 }
0x2e07   :  { %v4301_v27 = vpop.eup %4300 }
0x2e08   :  { %2340 = vrot.lane.b32.xlu0 %v4301_v27, %s4407_s28 }
0x2e7a   :  { %v2341_v28 = vpop.permute.xlu0 %2340 }
0x2e7b   :  { %v4669_v29 = vmul.f32 %v2341_v28, %v2325_v21 }
0x2e7d   :  { %2347 = vrot.lane.b32.xlu1 %v4669_v29, %s4408_s29 }
0x2eef   :  { %v2348_v30 = vpop.permute.xlu1 %2347 }
0x2ef0   :  { %3898 = vmatmul.mubr.msk.f32.vlgmr.msra.gmra.mrb[22].mxu1 %vm1240_vm10, %v2348_v30 }
0x2ef1   :  { %4133 = vmatpush3.bf16.msra.mxu1 %v4641_v53  ;;  %3919 = vmatprep.mubr.msk.f32.mxu1 %vm4402_vm2, %v4403_v8 }
0x2ef2   :  { %4134 = vmatprep.subr.bf16.mxu1 %v4401_v7 }
0x2ef5   :  { %4136 = vmatpush3.bf16.msra.mxu1 %v4646_v57 }
0x2ef6   :  { %4143 = vmatprep.subr.bf16.mxu1 %v4401_v7 }
0x2fc3   :  { %v2417_v32 = vpop.f32.mrb[22].mxu1 }
0x2fc4   :  { %v2421_v33 = vadd.f32 %v2417_v32, %v2345_v31  ;;  %v3899_v34 = vpop.f32.mrb[23].mxu1 }
0x2fc5   :  { %v2651_v34 = vld [vmem:[#allocation2 + $0x8] sm:$0x3] }
0x2fc6   :  { %4302 = vtanh.f32 %v2421_v33  ;;  %v2422_v36 = vmul.f32 0.5, %v2421_v33 }
0x2fc8   :  { %4304 = vtanh.f32 %v2422_v36 }
0x2fd0   :  { %v4303_v35 = vpop.eup %4302 }
0x2fd1   :  { %2429 = vrot.lane.b32.xlu0 %v4303_v35, %s4407_s28 }
0x2fd2   :  { %v4305_v37 = vpop.eup %4304 }
0x2fd3   :  { %v2424_v38 = vmul.f32 0.5, %v4305_v37 }
0x2fd5   :  { %v2425_v39 = vadd.f32 0.5, %v2424_v38 }
0x2fd7   :  { %v2427_v42 = vmul.f32 %v2425_v39, %v2337_v26 }
0x3043   :  { %v2430_v40 = vpop.permute.xlu0 %2429 }
0x3044   :  { %v2432_v41 = vmul.f32 %v2430_v40, %v2425_v39 }
0x3046   :  { %2434 = vrot.lane.b32.xlu1 %v2432_v41, %s4407_s28 }
0x30b8   :  { %v2435_v43 = vpop.permute.xlu1 %2434 }
0x30b9   :  { %v2437_v44 = vadd.f32 %v2435_v43, %v2427_v42 }
0x30bb   :  { %4306 = vtanh.f32 %v2437_v44 }
0x30c5   :  { %v4307_v45 = vpop.eup %4306 }
0x30c6   :  { %2440 = vrot.lane.b32.xlu0 %v4307_v45, %s4407_s28 }
0x3138   :  { %v2441_v46 = vpop.permute.xlu0 %2440 }
0x3139   :  { %v2443_v47 = vmul.f32 %v2441_v46, %v2425_v39 }
0x313b   :  { %2449 = vrot.lane.b32.xlu1 %v2443_v47, %s4408_s29  ;;  %v2444_v2 = vmin.f32 %v4669_v29, %v2443_v47  ;;  %v2445_v3 = vmax.f32 %v4669_v29, %v2443_v47  ;;  %v2446_v4 = vadd.f32 %v2443_v47, %v4669_v29 }
0x31ad   :  { %v2450_v48 = vpop.permute.xlu1 %2449 }
0x31ae   :  { %3909 = vmatmul.mubr.msk.f32.vlgmr.msra.gmra.mrb[24].mxu0 %vm1240_vm10, %v2450_v48 }
0x31af   :  { %4139 = vmatpush3.bf16.msra.mxu0 %v4641_v53  ;;  %3930 = vmatprep.mubr.msk.f32.mxu0 %vm4402_vm2, %v4403_v8 }
0x31b0   :  { %4140 = vmatprep.subr.bf16.mxu0 %v4401_v7 }
0x31b3   :  { %4142 = vmatpush3.bf16.msra.mxu0 %v4646_v57 }
0x31b4   :  { %4149 = vmatprep.subr.bf16.mxu0 %v4401_v7 }
0x3281   :  { %v2519_v50 = vpop.f32.mrb[24].mxu0 }
0x3282   :  { %v2523_v51 = vadd.f32 %v2519_v50, %v2447_v49  ;;  %v3910_v52 = vpop.f32.mrb[25].mxu0 }
0x3284   :  { %4308 = vtanh.f32 %v2523_v51  ;;  %v2524_v54 = vmul.f32 0.5, %v2523_v51 }
0x3286   :  { %4310 = vtanh.f32 %v2524_v54 }
0x328e   :  { %v4309_v56 = vpop.eup %4308 }
0x328f   :  { %2531 = vrot.lane.b32.xlu0 %v4309_v56, %s4407_s28 }
0x3290   :  { %v4311_v55 = vpop.eup %4310 }
0x3291   :  { %v2526_v58 = vmul.f32 0.5, %v4311_v55  ;;  %v2753_v55 = vld [vmem:[#allocation2 + $0xa] sm:$0x3] }
0x3293   :  { %v2527_v60 = vadd.f32 0.5, %v2526_v58 }
0x3295   :  { %v2529_v62 = vmul.f32 %v2527_v60, %v2437_v44 }
0x3301   :  { %v2532_v59 = vpop.permute.xlu0 %2531 }
0x3302   :  { %v2534_v61 = vmul.f32 %v2532_v59, %v2527_v60 }
0x3304   :  { %2536 = vrot.lane.b32.xlu1 %v2534_v61, %s4407_s28 }
0x3376   :  { %v2537_v63 = vpop.permute.xlu1 %2536 }
0x3377   :  { %v2539_v0 = vadd.f32 %v2537_v63, %v2529_v62 }
0x3379   :  { %4312 = vtanh.f32 %v2539_v0 }
0x3383   :  { %v4313_v1 = vpop.eup %4312 }
0x3384   :  { %2542 = vrot.lane.b32.xlu0 %v4313_v1, %s4407_s28 }
0x33f6   :  { %v2543_v6 = vpop.permute.xlu0 %2542 }
0x33f7   :  { %v2545_v5 = vmul.f32 %v2543_v6, %v2527_v60 }
0x33f9   :  { %v4697_v9 = vmin.f32 %v2444_v2, %v2545_v5  ;;  %v4699_v10 = vmax.f32 %v2445_v3, %v2545_v5  ;;  %v2548_v11 = vadd.f32 %v2545_v5, %v2446_v4  ;;  %2551 = vrot.lane.b32.xlu1 %v2545_v5, %s4408_s29 }
0x346b   :  { %v2552_v12 = vpop.permute.xlu1 %2551 }
0x346c   :  { %3920 = vmatmul.mubr.msk.f32.vlgmr.msra.gmra.mrb[24].mxu1 %vm1240_vm10, %v2552_v12 }
0x346d   :  { %4145 = vmatpush3.bf16.msra.mxu1 %v4641_v53  ;;  %3941 = vmatprep.mubr.msk.f32.mxu1 %vm4402_vm2, %v4403_v8 }
0x346e   :  { %4146 = vmatprep.subr.bf16.mxu1 %v4401_v7 }
0x3471   :  { %4148 = vmatpush3.bf16.msra.mxu1 %v4646_v57 }
0x3472   :  { %4155 = vmatprep.subr.bf16.mxu1 %v4401_v7 }
0x353f   :  { %v2621_v14 = vpop.f32.mrb[24].mxu1 }
0x3540   :  { %v2625_v15 = vadd.f32 %v2621_v14, %v2549_v13  ;;  %v3921_v16 = vpop.f32.mrb[25].mxu1  ;;  %v2855_v14 = vld [vmem:[#allocation2 + $0xc] sm:$0x3] }
0x3542   :  { %4314 = vtanh.f32 %v2625_v15  ;;  %v2626_v18 = vmul.f32 0.5, %v2625_v15 }
0x3544   :  { %4316 = vtanh.f32 %v2626_v18 }
0x354c   :  { %v4315_v17 = vpop.eup %4314 }
0x354d   :  { %2633 = vrot.lane.b32.xlu0 %v4315_v17, %s4407_s28 }
0x354e   :  { %v4317_v19 = vpop.eup %4316 }
0x354f   :  { %v2628_v20 = vmul.f32 0.5, %v4317_v19 }
0x3551   :  { %v2629_v21 = vadd.f32 0.5, %v2628_v20 }
0x3553   :  { %v2631_v24 = vmul.f32 %v2629_v21, %v2539_v0 }
0x35bf   :  { %v2634_v22 = vpop.permute.xlu0 %2633 }
0x35c0   :  { %v2636_v23 = vmul.f32 %v2634_v22, %v2629_v21 }
0x35c2   :  { %2638 = vrot.lane.b32.xlu1 %v2636_v23, %s4407_s28 }
0x3634   :  { %v2639_v25 = vpop.permute.xlu1 %2638 }
0x3635   :  { %v2641_v26 = vadd.f32 %v2639_v25, %v2631_v24 }
0x3637   :  { %4318 = vtanh.f32 %v2641_v26 }
0x3641   :  { %v4319_v27 = vpop.eup %4318 }
0x3642   :  { %2644 = vrot.lane.b32.xlu0 %v4319_v27, %s4407_s28 }
0x36b4   :  { %v2645_v28 = vpop.permute.xlu0 %2644 }
0x36b5   :  { %v2647_v29 = vmul.f32 %v2645_v28, %v2629_v21 }
0x36b7   :  { %v2648_v30 = vmin.f32 %v4697_v9, %v2647_v29  ;;  %v2649_v31 = vmax.f32 %v4699_v10, %v2647_v29  ;;  %v2650_v32 = vadd.f32 %v2647_v29, %v2548_v11  ;;  %2653 = vrot.lane.b32.xlu1 %v2647_v29, %s4408_s29 }
0x3729   :  { %v2654_v33 = vpop.permute.xlu1 %2653 }
0x372a   :  { %3931 = vmatmul.mubr.msk.f32.vlgmr.msra.gmra.mrb[26].mxu0 %vm1240_vm10, %v2654_v33 }
0x372b   :  { %4151 = vmatpush3.bf16.msra.mxu0 %v4641_v53  ;;  %3952 = vmatprep.mubr.msk.f32.mxu0 %vm4402_vm2, %v4403_v8 }
0x372c   :  { %4152 = vmatprep.subr.bf16.mxu0 %v4401_v7 }
0x372f   :  { %4154 = vmatpush3.bf16.msra.mxu0 %v4646_v57 }
0x3730   :  { %4161 = vmatprep.subr.bf16.mxu0 %v4401_v7 }
0x37fd   :  { %v2723_v35 = vpop.f32.mrb[26].mxu0 }
0x37fe   :  { %v2727_v36 = vadd.f32 %v2723_v35, %v2651_v34  ;;  %v3932_v37 = vpop.f32.mrb[27].mxu0  ;;  %v2957_v35 = vld [vmem:[#allocation2 + $0xe] sm:$0x3] }
0x3800   :  { %4320 = vtanh.f32 %v2727_v36  ;;  %v2728_v39 = vmul.f32 0.5, %v2727_v36 }
0x3802   :  { %4322 = vtanh.f32 %v2728_v39 }
0x380a   :  { %v4321_v38 = vpop.eup %4320 }
0x380b   :  { %2735 = vrot.lane.b32.xlu0 %v4321_v38, %s4407_s28 }
0x380c   :  { %v4323_v40 = vpop.eup %4322 }
0x380d   :  { %v2730_v41 = vmul.f32 0.5, %v4323_v40 }
0x380f   :  { %v2731_v42 = vadd.f32 0.5, %v2730_v41 }
0x3811   :  { %v2733_v45 = vmul.f32 %v2731_v42, %v2641_v26 }
0x387d   :  { %v2736_v43 = vpop.permute.xlu0 %2735 }
0x387e   :  { %v2738_v44 = vmul.f32 %v2736_v43, %v2731_v42 }
0x3880   :  { %2740 = vrot.lane.b32.xlu1 %v2738_v44, %s4407_s28 }
0x38f2   :  { %v2741_v46 = vpop.permute.xlu1 %2740 }
0x38f3   :  { %v2743_v47 = vadd.f32 %v2741_v46, %v2733_v45 }
0x38f5   :  { %4324 = vtanh.f32 %v2743_v47 }
0x38ff   :  { %v4325_v48 = vpop.eup %4324 }
0x3900   :  { %2746 = vrot.lane.b32.xlu0 %v4325_v48, %s4407_s28 }
0x3972   :  { %v2747_v49 = vpop.permute.xlu0 %2746 }
0x3973   :  { %v2749_v50 = vmul.f32 %v2747_v49, %v2731_v42  ;;  %v3060_v49 = vld [vmem:[#allocation4 + $0xd8] sm:$0xff] }
0x3975   :  { %v4725_v51 = vmin.f32 %v2648_v30, %v2749_v50  ;;  %v4727_v52 = vmax.f32 %v2649_v31, %v2749_v50  ;;  %v2752_v56 = vadd.f32 %v2749_v50, %v2650_v32  ;;  %2755 = vrot.lane.b32.xlu1 %v2749_v50, %s4408_s29  ;;  %v3061_v50 = vld [vmem:[#allocation4 + $0xe0] sm:$0xff] }
0x39e7   :  { %v2756_v54 = vpop.permute.xlu1 %2755 }
0x39e8   :  { %3942 = vmatmul.mubr.msk.f32.vlgmr.msra.gmra.mrb[26].mxu1 %vm1240_vm10, %v2756_v54  ;;  %v3062_v54 = vld [vmem:[#allocation4 + $0xe8] sm:$0xff] }
0x39e9   :  { %4157 = vmatpush3.bf16.msra.mxu1 %v4641_v53  ;;  %3963 = vmatprep.mubr.msk.f32.mxu1 %vm4402_vm2, %v4403_v8 }
0x39ea   :  { %4158 = vmatprep.subr.bf16.mxu1 %v4401_v7 }
0x39ed   :  { %4160 = vmatpush3.bf16.msra.mxu1 %v4646_v57 }
0x39ee   :  { %4167 = vmatprep.subr.bf16.mxu1 %v4401_v7 }
0x3abb   :  { %v2825_v58 = vpop.f32.mrb[26].mxu1 }
0x3abc   :  { %v2829_v60 = vadd.f32 %v2825_v58, %v2753_v55  ;;  %v3943_v59 = vpop.f32.mrb[27].mxu1  ;;  %v3063_v55 = vld [vmem:[#allocation4 + $0xf0] sm:$0xff] }
0x3abd   :  { %v3066_v59 = vld [vmem:[#allocation4 + $0x108] sm:$0xff] }
0x3abe   :  { %4326 = vtanh.f32 %v2829_v60  ;;  %v2830_v62 = vmul.f32 0.5, %v2829_v60 }
0x3ac0   :  { %4328 = vtanh.f32 %v2830_v62  ;;  %v4171_v62 = vpack.c.bf16 %v3063_v55, %v3062_v54 }
0x3ac8   :  { %v4327_v61 = vpop.eup %4326 }
0x3ac9   :  { %2837 = vrot.lane.b32.xlu0 %v4327_v61, %s4407_s28  ;;  %v3067_v61 = vld [vmem:[#allocation4 + $0x110] sm:$0xff] }
0x3aca   :  { %v4329_v53 = vpop.eup %4328 }
0x3acb   :  { %v2832_v63 = vmul.f32 0.5, %v4329_v53  ;;  %v4165_v53 = vpack.c.bf16 %v3067_v61, %v3066_v59 }
0x3acd   :  { %v2833_v0 = vadd.f32 0.5, %v2832_v63 }
0x3acf   :  { %v2835_v57 = vmul.f32 %v2833_v0, %v2743_v47 }
0x3b3b   :  { %v2838_v1 = vpop.permute.xlu0 %2837 }
0x3b3c   :  { %v2840_v6 = vmul.f32 %v2838_v1, %v2833_v0 }
0x3b3e   :  { %2842 = vrot.lane.b32.xlu1 %v2840_v6, %s4407_s28 }
0x3bb0   :  { %v2843_v2 = vpop.permute.xlu1 %2842 }
0x3bb1   :  { %v2845_v3 = vadd.f32 %v2843_v2, %v2835_v57 }
0x3bb3   :  { %4330 = vtanh.f32 %v2845_v3 }
0x3bbd   :  { %v4331_v4 = vpop.eup %4330 }
0x3bbe   :  { %2848 = vrot.lane.b32.xlu0 %v4331_v4, %s4407_s28  ;;  %v3219_v4 = vld [vmem:[#allocation4 + $0x120] sm:$0xff] }
0x3c30   :  { %v2849_v5 = vpop.permute.xlu0 %2848 }
0x3c31   :  { %v2851_v9 = vmul.f32 %v2849_v5, %v2833_v0 }
0x3c33   :  { %2857 = vrot.lane.b32.xlu1 %v2851_v9, %s4408_s29  ;;  %v2852_v10 = vmin.f32 %v4725_v51, %v2851_v9  ;;  %v2854_v11 = vadd.f32 %v2851_v9, %v2752_v56  ;;  %v2853_v12 = vmax.f32 %v4727_v52, %v2851_v9  ;;  %v3064_v51 = vld [vmem:[#allocation4 + $0xf8] sm:$0xff]  ;;  %v4168_v52 = vpack.c.bf16 %v3061_v50, %v3060_v49  ;;  %v3065_v56 = vld [vmem:[#allocation4 + $0x100] sm:$0xff] }
0x3c34   :  { %v4162_v60 = vpack.c.bf16 %v3065_v56, %v3064_v51 }
0x3ca5   :  { %v2858_v13 = vpop.permute.xlu1 %2857 }
0x3ca6   :  { %3953 = vmatmul.mubr.msk.f32.vlgmr.msra.gmra.mrb[28].mxu0 %vm1240_vm10, %v2858_v13 }
0x3ca7   :  { %3974 = vmatprep.mubr.msk.f32.mxu0 %vm4402_vm2, %v4403_v8  ;;  %4163 = vmatpush3.bf16.msra.mxu0 %v4162_v60 }
0x3ca8   :  { %4164 = vmatprep.subr.bf16.mxu0 %v4401_v7 }
0x3cab   :  { %4166 = vmatpush3.bf16.msra.mxu0 %v4165_v53 }
0x3cac   :  { %4173 = vmatprep.subr.bf16.mxu0 %v4401_v7 }
0x3d79   :  { %v2927_v15 = vpop.f32.mrb[28].mxu0 }
0x3d7a   :  { %v2931_v16 = vadd.f32 %v2927_v15, %v2855_v14  ;;  %v3954_v17 = vpop.f32.mrb[29].mxu0  ;;  %v3305_v15 = vld [vmem:[#allocation4 + $0x140] sm:$0xff] }
0x3d7b   :  { %v3307_v17 = vld [vmem:[#allocation4 + $0x150] sm:$0xff] }
0x3d7c   :  { %4332 = vtanh.f32 %v2931_v16  ;;  %v2932_v19 = vmul.f32 0.5, %v2931_v16  ;;  %v3306_v16 = vld [vmem:[#allocation4 + $0x148] sm:$0xff] }
0x3d7e   :  { %4334 = vtanh.f32 %v2932_v19  ;;  %v3308_v19 = vld [vmem:[#allocation4 + $0x158] sm:$0xff] }
0x3d86   :  { %v4333_v18 = vpop.eup %4332 }
0x3d87   :  { %2939 = vrot.lane.b32.xlu0 %v4333_v18, %s4407_s28  ;;  %v4180_v18 = vpack.c.bf16 %v3306_v16, %v3305_v15 }
0x3d88   :  { %v4335_v20 = vpop.eup %4334 }
0x3d89   :  { %v2934_v21 = vmul.f32 0.5, %v4335_v20  ;;  %v4183_v20 = vpack.c.bf16 %v3308_v19, %v3307_v17 }
0x3d8b   :  { %v2935_v22 = vadd.f32 0.5, %v2934_v21 }
0x3d8d   :  { %v2937_v25 = vmul.f32 %v2935_v22, %v2845_v3  ;;  %v3218_v3 = vld [vmem:[#allocation4 + $0x118] sm:$0xff] }
0x3d8e   :  { %v4174_v9 = vpack.c.bf16 %v3219_v4, %v3218_v3 }
0x3df9   :  { %v2940_v23 = vpop.permute.xlu0 %2939 }
0x3dfa   :  { %v2942_v24 = vmul.f32 %v2940_v23, %v2935_v22 }
0x3dfc   :  { %2944 = vrot.lane.b32.xlu1 %v2942_v24, %s4407_s28 }
0x3e6e   :  { %v2945_v26 = vpop.permute.xlu1 %2944 }
0x3e6f   :  { %v2947_v27 = vadd.f32 %v2945_v26, %v2937_v25 }
0x3e71   :  { %4336 = vtanh.f32 %v2947_v27 }
0x3e7b   :  { %v4337_v28 = vpop.eup %4336 }
0x3e7c   :  { %2950 = vrot.lane.b32.xlu0 %v4337_v28, %s4407_s28 }
0x3eee   :  { %v2951_v29 = vpop.permute.xlu0 %2950 }
0x3eef   :  { %v2953_v30 = vmul.f32 %v2951_v29, %v2935_v22 }
0x3ef1   :  { %2959 = vrot.lane.b32.xlu1 %v2953_v30, %s4408_s29  ;;  %v2954_v31 = vmin.f32 %v2852_v10, %v2953_v30  ;;  %v2956_v32 = vadd.f32 %v2953_v30, %v2854_v11  ;;  %v2955_v33 = vmax.f32 %v2853_v12, %v2953_v30  ;;  %v3220_v10 = vld [vmem:[#allocation4 + $0x128] sm:$0xff]  ;;  %v3221_v11 = vld [vmem:[#allocation4 + $0x130] sm:$0xff] }
0x3ef2   :  { %v4177_v13 = vpack.c.bf16 %v3221_v11, %v3220_v10 }
0x3f63   :  { %v2960_v34 = vpop.permute.xlu1 %2959 }
0x3f64   :  { %3964 = vmatmul.mubr.msk.f32.vlgmr.msra.gmra.mrb[28].mxu1 %vm1240_vm10, %v2960_v34 }
0x3f65   :  { %3985 = vmatprep.mubr.msk.f32.mxu1 %vm4402_vm2, %v4403_v8  ;;  %4169 = vmatpush3.bf16.msra.mxu1 %v4168_v52 }
0x3f66   :  { %4170 = vmatprep.subr.bf16.mxu1 %v4401_v7 }
0x3f69   :  { %4172 = vmatpush3.bf16.msra.mxu1 %v4171_v62 }
0x3f6a   :  { %4179 = vmatprep.subr.bf16.mxu1 %v4401_v7 }
0x4037   :  { %v3029_v36 = vpop.f32.mrb[28].mxu1 }
0x4038   :  { %v3033_v37 = vadd.f32 %v3029_v36, %v2957_v35  ;;  %v3965_v38 = vpop.f32.mrb[29].mxu1 }
0x4039   :  { %v3533_v38 = vld [vmem:[#allocation4 + $0x178] ss:$0 sm:$0xff] }
0x403a   :  { %4338 = vtanh.f32 %v3033_v37  ;;  %v3034_v40 = vmul.f32 0.5, %v3033_v37 }
0x403c   :  { %4340 = vtanh.f32 %v3034_v40 }
0x4044   :  { %v4339_v39 = vpop.eup %4338 }
0x4045   :  { %3041 = vrot.lane.b32.xlu0 %v4339_v39, %s4407_s28 }
0x4046   :  { %v4341_v41 = vpop.eup %4340 }
0x4047   :  { %v3036_v42 = vmul.f32 0.5, %v4341_v41 }
0x4049   :  { %v3037_v43 = vadd.f32 0.5, %v3036_v42 }
0x404b   :  { %v3039_v46 = vmul.f32 %v3037_v43, %v2947_v27  ;;  %v3530_v27 = vld [vmem:[#allocation4 + $0x138] ss:$0 sm:$0xff] }
0x40b7   :  { %v3042_v44 = vpop.permute.xlu0 %3041 }
0x40b8   :  { %v3044_v45 = vmul.f32 %v3042_v44, %v3037_v43 }
0x40ba   :  { %3046 = vrot.lane.b32.xlu1 %v3044_v45, %s4407_s28 }
0x412c   :  { %v3047_v47 = vpop.permute.xlu1 %3046 }
0x412d   :  { %v3049_v48 = vadd.f32 %v3047_v47, %v3039_v46 }
0x412f   :  { %4342 = vtanh.f32 %v3049_v48 }
0x4139   :  { %v4343_v58 = vpop.eup %4342 }
0x413a   :  { %3052 = vrot.lane.b32.xlu0 %v4343_v58, %s4407_s28 }
0x41ac   :  { %v3053_v63 = vpop.permute.xlu0 %3052 }
0x41ad   :  { %v3055_v0 = vmul.f32 %v3053_v63, %v3037_v43 }
0x41af   :  { %v3056_v1 = vmin.f32 %v2954_v31, %v3055_v0  ;;  %v3058_v6 = vadd.f32 %v3055_v0, %v2956_v32  ;;  %v3057_v2 = vmax.f32 %v2955_v33, %v3055_v0  ;;  %v3388_v31 = vld [vmem:[#allocation4 + $0x168] sm:$0xff]  ;;  %v3389_v32 = vld [vmem:[#allocation4 + $0x170] sm:$0xff] }
0x41b0   :  { %v4186_v33 = vpack.c.bf16 %v3389_v32, %v3388_v31 }
0x41b1   :  { %3144 = vrot.lane.b32.xlu0 %v3056_v1, %s4408_s29  ;;  %v3059_v57 = vmul.f32 0.125, %v3058_v6 }
0x41b3   :  { %3069 = vrot.lane.b32.xlu1 %v3059_v57, %s4408_s29 }
0x41b7   :  { %3223 = vrot.lane.b32.xlu1 %v3057_v2, %s4408_s29 }
0x4223   :  { %v3145_v5 = vpop.permute.xlu0 %3144 }
0x4224   :  { %3986 = vmatmul.mubr.msk.f32.vlgmr.msra.gmra.mrb[30].mxu1 %vm1240_vm10, %v3145_v5 }
0x4225   :  { %v3070_v12 = vpop.permute.xlu1 %3069  ;;  %4007 = vmatprep.mubr.msk.f32.mxu1 %vm4402_vm2, %v4403_v8  ;;  %4181 = vmatpush3.bf16.msra.mxu1 %v4180_v18 }
0x4226   :  { %3975 = vmatmul.mubr.msk.f32.vlgmr.msra.gmra.mrb[30].mxu0 %vm1240_vm10, %v3070_v12  ;;  %4182 = vmatprep.subr.bf16.mxu1 %v4401_v7 }
0x4227   :  { %4175 = vmatpush3.bf16.msra.mxu0 %v4174_v9  ;;  %3996 = vmatprep.mubr.msk.f32.mxu0 %vm4402_vm2, %v4403_v8 }
0x4228   :  { %4176 = vmatprep.subr.bf16.mxu0 %v4401_v7 }
0x4229   :  { %v3224_v14 = vpop.permute.xlu1 %3223  ;;  %4184 = vmatpush3.bf16.msra.mxu1 %v4183_v20 }
0x422b   :  { %4178 = vmatpush3.bf16.msra.mxu0 %v4177_v13 }
0x422c   :  { %4185 = vmatprep.subr.bf16.mxu0 %v4401_v7  ;;  %v3531_v7 = vld [vmem:[#allocation4 + $0x160] ss:$0 sm:$0xff] }
0x422e   :  { %3997 = vmatmul.mubr.msk.f32.vlgmr.msra.gmra.mrb[32].mxu0 %vm1240_vm10, %v3224_v14 }
0x422f   :  { %4014 = vmatprep.mubr.msk.f32.mxu0 %vm4402_vm2, %v4403_v8  ;;  %4187 = vmatpush3.bf16.msra.mxu0 %v4186_v33 }
0x42f7   :  { %v3214_v21 = vpop.f32.mrb[30].mxu1 }
0x42f8   :  { %v3987_v22 = vpop.f32.mrb[31].mxu1 }
0x42f9   :  { %v3139_v23 = vpop.f32.mrb[30].mxu0 }
0x42fa   :  { %v3215_v24 = vadd.f32 %v3214_v21, %v3139_v23  ;;  %v3976_v25 = vpop.f32.mrb[31].mxu0 }
0x4301   :  { %v3293_v26 = vpop.f32.mrb[32].mxu0 }
0x4302   :  { %v3297_v28 = vadd.f32 %v3293_v26, %v3215_v24  ;;  %v3998_v29 = vpop.f32.mrb[33].mxu0 }
0x4304   :  { %v3303_v8 = vadd.f32 %v3530_v27, %v3297_v28 }
0x4306   :  { %4344 = vtanh.f32 %v3303_v8 }
0x4310   :  { %v4345_v30 = vpop.eup %4344 }
0x4311   :  { %4008 = vmatmul.mubr.msk.f32.vlgmr.msra.gmra.mrb[32].mxu1 %vm1240_vm10, %v4345_v30 }
0x43e4   :  { %v3383_v34 = vpop.f32.mrb[32].mxu1 }
0x43e5   :  { %v3384_v35 = vadd.f32 %v3531_v7, %v3383_v34  ;;  %v4009_v36 = vpop.f32.mrb[33].mxu1 }
0x43e7   :  { %4346 = vtanh.f32 %v3384_v35 }
0x43f1   :  { %v4347_v37 = vpop.eup %4346 }
0x43f2   :  { %4015 = vmatmul.mubr.msk.f32.vlgmr.msra.gmra.mrb[34].mxu0 %vm232_vm8, %v4347_v37 }
0x44c5   :  { %v3464_v39 = vpop.f32.mrb[34].mxu0 }
0x44c6   :  { %v3465_v40 = vadd.f32 %v3533_v38, %v3464_v39  ;;  %v4016_v41 = vpop.f32.mrb[35].mxu0 }
0x44c8   :  { %v3468_v42 = vmul.f32 0.5, %v3465_v40 }
0x44ca   :  { %4348 = vtanh.f32 %v3468_v42 }
0x44d4   :  { %v4349_v43 = vpop.eup %4348 }
0x44d5   :  { %v3470_v44 = vmul.f32 0.5, %v4349_v43 }
0x44d7   :  { %v3471_v45 = vadd.f32 0.5, %v3470_v44 }
0x44d9   :  { %3473 = vst.msk [vmem:[#allocation7] sm:$0x3] %vm3472_vm11, %v3471_v45 }
0x44da   :  { %4383 = shalt.err (!%p4380_p12)
}
0x44db   :  { %s4384_s7 = scalar_lea.hbm %s4791_s2, 32 }
0x44dc   :  { %p4385_p13 = scmp.ne.s32.totalorder %s4791_s2, %s4384_s7  ;;  %p4388_p0 = scmp.lt.u32.totalorder %s4384_s7, %s4791_s2 }
0x44de   :  { %p4390_p1 = pnand %p4388_p0, %p4385_p13 }
0x44e0   :  { %4393 = shalt.err (!%p4390_p1)
}
0x44e1   :  { %3483 = dma.vmem_to_hbm [thread:$0]  %s3481_s3, 32, %s4791_s2, [#allocation6]  }
0x44e2   :  { %4396 = dma.done.wait [#allocation6], 32  }
0x44e3   :  { %4397 = vsyncadd [#allocation6], 4294967264 }
0x44e4   :  { %3487 = vsyncpa [#allocation5], 1 }
0x44e5   :  { %3488 = vsyncpa [#allocation6], 1 }

</bundles_post_ra>
